<compile_context>
chip_gen: v5e
topology: v5e:2x2
jax: 0.10.0
libtpu: 0.0.40
codegen_flags: <defaults>
</compile_context>

<pallas_src>
import functools

import jax
import jax.numpy as jnp
from jax.experimental import pallas as pl
from jax.experimental.pallas import tpu as pltpu


def _gcn_fused_kernel(x_ref, a_ref, w_ref, b_ref, o_ref,
                      xscr_ref, h_ref, outs_ref, *, order):
    # x_ref    : (Nb, C, V, L)         NCVL input batch block (PyTorch gcn layout)
    # a_ref    : (V, S*V)              all graph supports, concatenated along dim 1
    # w_ref    : (C_out, C_total)      1x1-conv weight, C_total = (order*S + 1) * C
    # b_ref    : (C_out, 1)            1x1-conv bias
    # o_ref    : (Nb, C_out, V, L)     NCVL output block
    # xscr_ref : (Nb, L, C, V)         scratch: vertex-last copy of the input
    # h_ref    : (C_total, Nb*L*V)     scratch: concatenated diffusion features
    # outs_ref : (Nb, C_out, L, V)     scratch: vertex-last conv output
    Nb, C, V, L = x_ref.shape
    S = a_ref.shape[1] // V
    C_out = w_ref.shape[0]
    n_rows = Nb * L * C                       # M of the diffusion matmuls

    # ---- fused input permute (was a standalone XLA transpose before):
    # NCVL -> rows (n, l, c) with lanes = V, via per-(n, c) 2-D transposes and
    # tile-local scratch stores.
    for n in range(Nb):
        for c in range(C):
            xscr_ref[n, :, c, :] = jnp.swapaxes(x_ref[n, c], 0, 1)  # (V,L)->(L,V)
    x2d = xscr_ref[...].reshape(n_rows, V)    # rows = (n, l, c); lanes = V

    # h layout: rows = channel of the concatenated feature block (g*C + c),
    # lanes = (n, l, v) flat -> the 1x1 conv becomes ONE matmul later.
    # Each slab below is exactly one aligned (C=8, V=128) tile copy.
    def write_group(g, val):                  # val: (n_rows, V), rows (n, l, c)
        for t in range(Nb * L):
            h_ref[g * C:(g + 1) * C, t * V:(t + 1) * V] = val[t * C:(t + 1) * C, :]

    write_group(0, x2d)                       # identity term of the concat

    # ---- diffusion: first hop for ALL supports in a single wide MXU matmul.
    p1 = jnp.dot(x2d, a_ref[...], preferred_element_type=jnp.float32)  # (M, S*V)
    g = 1
    for s in range(S):                        # static unroll over supports
        prev = p1[:, s * V:(s + 1) * V]       # free 128-lane-aligned slice
        write_group(g, prev)
        g += 1
        for _ in range(order - 1):            # higher hops, per support
            prev = jnp.dot(prev, a_ref[:, s * V:(s + 1) * V],
                           preferred_element_type=jnp.float32)
            write_group(g, prev)
            g += 1

    # ---- 1x1 Conv2d == ONE weight-stationary matmul over all (n, l, v).
    o_mat = jnp.dot(w_ref[...], h_ref[...],
                    preferred_element_type=jnp.float32) + b_ref[...]  # (C_out, Nb*L*V)

    # ---- fused output permute back to NCVL (was a standalone XLA transpose).
    for t in range(Nb * L):
        n, l = divmod(t, L)
        outs_ref[n, :, l, :] = o_mat[:, t * V:(t + 1) * V]            # (C_out, V)
    for n in range(Nb):
        for c in range(C_out):
            o_ref[n, c] = jnp.swapaxes(outs_ref[n, c], 0, 1).astype(o_ref.dtype)


def _batch_blocks(n_batch):
    """Grid extent along the batch axis: 1 block on single-TensorCore chips
    (v5e/v6e) so one grid step sees the whole batch (max MXU row fill, no serial
    step overhead); 2 blocks on dual-core v7x so both TensorCores get work."""
    try:
        kind = jax.devices()[0].device_kind.lower().replace(" ", "")
        dual_tc = ("v7" in kind) or ("tpu7" in kind)
    except Exception:
        dual_tc = False
    if dual_tc and n_batch % 2 == 0:
        return 2
    return 1


def gcn_forward(x, supports, weight, bias, *, order=2, dropout=0.1,
                batch_blocks=None):
    """x: (N, C, V, L) f32 (PyTorch NCVL), supports: (S, V, V) f32,
    weight: (C_out, (order*S+1)*C) f32, bias: (C_out,) f32."""
    N, C, V, L = x.shape
    S = supports.shape[0]
    C_total = (order * S + 1) * C
    C_out = weight.shape[0]
    assert weight.shape == (C_out, C_total)

    blocks = _batch_blocks(N) if batch_blocks is None else batch_blocks
    assert N % blocks == 0
    Nb = N // blocks

    # All supports side by side -> the first diffusion hop is one wide matmul.
    a_cat = jnp.concatenate([supports[s] for s in range(S)], axis=1)   # (V, S*V)
    b2d = bias.reshape(C_out, 1)

    cost = pl.CostEstimate(
        flops=int(2 * N * S * order * L * C * V * V
                  + 2 * N * L * C_out * C_total * V),
        transcendentals=0,
        bytes_accessed=int(4 * (x.size + N * C_out * V * L
                                + a_cat.size + weight.size + bias.size)),
    )

    out = pl.pallas_call(
        functools.partial(_gcn_fused_kernel, order=order),
        out_shape=jax.ShapeDtypeStruct((N, C_out, V, L), jnp.float32),
        grid=(blocks,),
        in_specs=[
            pl.BlockSpec((Nb, C, V, L), lambda i: (i, 0, 0, 0)),
            pl.BlockSpec((V, S * V), lambda i: (0, 0)),            # fetched once
            pl.BlockSpec((C_out, C_total), lambda i: (0, 0)),      # fetched once
            pl.BlockSpec((C_out, 1), lambda i: (0, 0)),            # fetched once
        ],
        out_specs=pl.BlockSpec((Nb, C_out, V, L), lambda i: (i, 0, 0, 0)),
        scratch_shapes=[
            pltpu.VMEM((Nb, L, C, V), jnp.float32),          # vertex-last input
            pltpu.VMEM((C_total, Nb * L * V), jnp.float32),  # concatenated features
            pltpu.VMEM((Nb, C_out, L, V), jnp.float32),      # vertex-last output
        ],
        compiler_params=pltpu.CompilerParams(
            dimension_semantics=("parallel",)),
        cost_estimate=cost,
    )(x, a_cat, weight, b2d)

    # TODO(synk): F.dropout applied as identity (inference semantics); training
    # mode would draw pltpu.prng_seed/prng_random_bits inside the kernel.
    return out


def gcn_reference(x, supports, weight, bias, *, order=2):
    """Pure-JAX mirror of the PyTorch gcn forward (eval mode)."""
    out = [x]
    for s in range(supports.shape[0]):
        a = supports[s]
        x1 = jnp.einsum('ncvl,vw->ncwl', x, a)
        out.append(x1)
        for _ in range(2, order + 1):
            x2 = jnp.einsum('ncvl,vw->ncwl', x1, a)
            out.append(x2)
            x1 = x2
    h = jnp.concatenate(out, axis=1)
    h = jnp.einsum('oc,ncvl->novl', weight, h) + bias[None, :, None, None]
    return h


if __name__ == "__main__":
    # EncoderLayer's gconv: gcn(target_d_model, target_d_model, dropout=0.1,
    # support_len=3, order=2) applied to target features permuted to NCVL.
    N, D_MODEL, V, L = 2, 8, 128, 8      # batch, d_model (=c_in=c_out), nodes, patches
    SUPPORT_LEN, ORDER = 3, 2
    C_TOTAL = (ORDER * SUPPORT_LEN + 1) * D_MODEL

    key = jax.random.PRNGKey(0)
    kx, ka, kn1, kn2, kw, kb = jax.random.split(key, 6)
    x = jax.random.normal(kx, (N, D_MODEL, V, L), dtype=jnp.float32)

    # Two fixed (row-normalized) supports + EncoderLayer's adaptive adjacency
    # adp = softmax(relu(nodevec1 @ nodevec2), dim=1)  -> support_len = 3.
    raw = jax.random.uniform(ka, (2, V, V), dtype=jnp.float32)
    fixed = raw / jnp.sum(raw, axis=2, keepdims=True)
    nodevec1 = jax.random.normal(kn1, (V, 10), dtype=jnp.float32)
    nodevec2 = jax.random.normal(kn2, (10, V), dtype=jnp.float32)
    adp = jax.nn.softmax(jax.nn.relu(nodevec1 @ nodevec2), axis=1)
    supports = jnp.concatenate([fixed, adp[None]], axis=0)       # (3, V, V)

    # Deterministic synthetic Conv2d(1x1) parameters (weight[:, :, 0, 0], bias).
    weight = 0.05 * jax.random.normal(kw, (D_MODEL, C_TOTAL), dtype=jnp.float32)
    bias = 0.1 * jax.random.normal(kb, (D_MODEL,), dtype=jnp.float32)

    out = gcn_forward(x, supports, weight, bias, order=ORDER, dropout=0.1)
    out = jax.block_until_ready(out)

    ref = gcn_reference(x, supports, weight, bias, order=ORDER)
    assert out.shape == (N, D_MODEL, V, L), out.shape
    max_err = float(jnp.max(jnp.abs(out - ref)))
    assert jnp.allclose(out, ref, atol=1e-4, rtol=1e-4), max_err

    print("KERNEL_OK")
</pallas_src>

<mosaic_0001>
module attributes {stable_mosaic.version = 11 : i64} {
  func.func @_gcn_fused_kernel(%arg0: i32, %arg1: memref<2x8x128x8xf32, #tpu.memory_space<vmem>>, %arg2: memref<128x384xf32, #tpu.memory_space<vmem>>, %arg3: memref<8x56xf32, #tpu.memory_space<vmem>>, %arg4: memref<8x1xf32, #tpu.memory_space<vmem>>, %arg5: memref<2x8x128x8xf32, #tpu.memory_space<vmem>>, %arg6: memref<2x8x8x128xf32, #tpu.memory_space<vmem>>, %arg7: memref<56x2048xf32, #tpu.memory_space<vmem>>, %arg8: memref<2x8x8x128xf32, #tpu.memory_space<vmem>>) attributes {dimension_semantics = [#tpu.dimension_semantics<parallel>], iteration_bounds = array<i64: 1>, scalar_prefetch = 0 : i64, scratch_operands = 3 : i64, tpu.core_type = #tpu.core_type<tc>, window_params = [{transform_indices = @transform_0, window_bounds = array<i64: 2, 8, 128, 8>}, {pipeline_mode = #tpu.pipeline_mode<synchronous>, transform_indices = @transform_1, window_bounds = array<i64: 128, 384>}, {pipeline_mode = #tpu.pipeline_mode<synchronous>, transform_indices = @transform_2, window_bounds = array<i64: 8, 56>}, {pipeline_mode = #tpu.pipeline_mode<synchronous>, transform_indices = @transform_3, window_bounds = array<i64: 8, 1>}, {transform_indices = @transform_4, window_bounds = array<i64: 2, 8, 128, 8>}]} {
    %c0 = arith.constant 0 : index
    %c0_0 = arith.constant 0 : index
    %c0_1 = arith.constant 0 : index
    %c0_2 = arith.constant 0 : index
    %0 = vector.load %arg1[%c0, %c0_0, %c0_1, %c0_2] : memref<2x8x128x8xf32, #tpu.memory_space<vmem>>, vector<1x1x128x8xf32>
    %1 = vector.shape_cast %0 : vector<1x1x128x8xf32> to vector<128x8xf32>
    %2 = tpu.transpose %1, [1, 0] : vector<128x8xf32> -> vector<8x128xf32>
    %c0_3 = arith.constant 0 : index
    %c0_4 = arith.constant 0 : index
    %c0_5 = arith.constant 0 : index
    %c0_6 = arith.constant 0 : index
    %3 = vector.load %arg6[%c0_3, %c0_4, %c0_5, %c0_6] : memref<2x8x8x128xf32, #tpu.memory_space<vmem>>, vector<1x8x1x128xf32>
    %4 = vector.shape_cast %3 : vector<1x8x1x128xf32> to vector<8x128xf32>
    %5 = vector.shape_cast %2 : vector<8x128xf32> to vector<1x8x1x128xf32>
    tpu.vector_store %arg6[%c0_3, %c0_4, %c0_5, %c0_6], %5 {strides = array<i32>} : memref<2x8x8x128xf32, #tpu.memory_space<vmem>>, vector<1x8x1x128xf32>,
    %c0_7 = arith.constant 0 : index
    %c1 = arith.constant 1 : index
    %c0_8 = arith.constant 0 : index
    %c0_9 = arith.constant 0 : index
    %6 = vector.load %arg1[%c0_7, %c1, %c0_8, %c0_9] : memref<2x8x128x8xf32, #tpu.memory_space<vmem>>, vector<1x1x128x8xf32>
    %7 = vector.shape_cast %6 : vector<1x1x128x8xf32> to vector<128x8xf32>
    %8 = tpu.transpose %7, [1, 0] : vector<128x8xf32> -> vector<8x128xf32>
    %c0_10 = arith.constant 0 : index
    %c0_11 = arith.constant 0 : index
    %c1_12 = arith.constant 1 : index
    %c0_13 = arith.constant 0 : index
    %9 = vector.load %arg6[%c0_10, %c0_11, %c1_12, %c0_13] : memref<2x8x8x128xf32, #tpu.memory_space<vmem>>, vector<1x8x1x128xf32>
    %10 = vector.shape_cast %9 : vector<1x8x1x128xf32> to vector<8x128xf32>
    %11 = vector.shape_cast %8 : vector<8x128xf32> to vector<1x8x1x128xf32>
    tpu.vector_store %arg6[%c0_10, %c0_11, %c1_12, %c0_13], %11 {strides = array<i32>} : memref<2x8x8x128xf32, #tpu.memory_space<vmem>>, vector<1x8x1x128xf32>,
    %c0_14 = arith.constant 0 : index
    %c2 = arith.constant 2 : index
    %c0_15 = arith.constant 0 : index
    %c0_16 = arith.constant 0 : index
    %12 = vector.load %arg1[%c0_14, %c2, %c0_15, %c0_16] : memref<2x8x128x8xf32, #tpu.memory_space<vmem>>, vector<1x1x128x8xf32>
    %13 = vector.shape_cast %12 : vector<1x1x128x8xf32> to vector<128x8xf32>
    %14 = tpu.transpose %13, [1, 0] : vector<128x8xf32> -> vector<8x128xf32>
    %c0_17 = arith.constant 0 : index
    %c0_18 = arith.constant 0 : index
    %c2_19 = arith.constant 2 : index
    %c0_20 = arith.constant 0 : index
    %15 = vector.load %arg6[%c0_17, %c0_18, %c2_19, %c0_20] : memref<2x8x8x128xf32, #tpu.memory_space<vmem>>, vector<1x8x1x128xf32>
    %16 = vector.shape_cast %15 : vector<1x8x1x128xf32> to vector<8x128xf32>
    %17 = vector.shape_cast %14 : vector<8x128xf32> to vector<1x8x1x128xf32>
    tpu.vector_store %arg6[%c0_17, %c0_18, %c2_19, %c0_20], %17 {strides = array<i32>} : memref<2x8x8x128xf32, #tpu.memory_space<vmem>>, vector<1x8x1x128xf32>,
    %c0_21 = arith.constant 0 : index
    %c3 = arith.constant 3 : index
    %c0_22 = arith.constant 0 : index
    %c0_23 = arith.constant 0 : index
    %18 = vector.load %arg1[%c0_21, %c3, %c0_22, %c0_23] : memref<2x8x128x8xf32, #tpu.memory_space<vmem>>, vector<1x1x128x8xf32>
    %19 = vector.shape_cast %18 : vector<1x1x128x8xf32> to vector<128x8xf32>
    %20 = tpu.transpose %19, [1, 0] : vector<128x8xf32> -> vector<8x128xf32>
    %c0_24 = arith.constant 0 : index
    %c0_25 = arith.constant 0 : index
    %c3_26 = arith.constant 3 : index
    %c0_27 = arith.constant 0 : index
    %21 = vector.load %arg6[%c0_24, %c0_25, %c3_26, %c0_27] : memref<2x8x8x128xf32, #tpu.memory_space<vmem>>, vector<1x8x1x128xf32>
    %22 = vector.shape_cast %21 : vector<1x8x1x128xf32> to vector<8x128xf32>
    %23 = vector.shape_cast %20 : vector<8x128xf32> to vector<1x8x1x128xf32>
    tpu.vector_store %arg6[%c0_24, %c0_25, %c3_26, %c0_27], %23 {strides = array<i32>} : memref<2x8x8x128xf32, #tpu.memory_space<vmem>>, vector<1x8x1x128xf32>,
    %c0_28 = arith.constant 0 : index
    %c4 = arith.constant 4 : index
    %c0_29 = arith.constant 0 : index
    %c0_30 = arith.constant 0 : index
    %24 = vector.load %arg1[%c0_28, %c4, %c0_29, %c0_30] : memref<2x8x128x8xf32, #tpu.memory_space<vmem>>, vector<1x1x128x8xf32>
    %25 = vector.shape_cast %24 : vector<1x1x128x8xf32> to vector<128x8xf32>
    %26 = tpu.transpose %25, [1, 0] : vector<128x8xf32> -> vector<8x128xf32>
    %c0_31 = arith.constant 0 : index
    %c0_32 = arith.constant 0 : index
    %c4_33 = arith.constant 4 : index
    %c0_34 = arith.constant 0 : index
    %27 = vector.load %arg6[%c0_31, %c0_32, %c4_33, %c0_34] : memref<2x8x8x128xf32, #tpu.memory_space<vmem>>, vector<1x8x1x128xf32>
    %28 = vector.shape_cast %27 : vector<1x8x1x128xf32> to vector<8x128xf32>
    %29 = vector.shape_cast %26 : vector<8x128xf32> to vector<1x8x1x128xf32>
    tpu.vector_store %arg6[%c0_31, %c0_32, %c4_33, %c0_34], %29 {strides = array<i32>} : memref<2x8x8x128xf32, #tpu.memory_space<vmem>>, vector<1x8x1x128xf32>,
    %c0_35 = arith.constant 0 : index
    %c5 = arith.constant 5 : index
    %c0_36 = arith.constant 0 : index
    %c0_37 = arith.constant 0 : index
    %30 = vector.load %arg1[%c0_35, %c5, %c0_36, %c0_37] : memref<2x8x128x8xf32, #tpu.memory_space<vmem>>, vector<1x1x128x8xf32>
    %31 = vector.shape_cast %30 : vector<1x1x128x8xf32> to vector<128x8xf32>
    %32 = tpu.transpose %31, [1, 0] : vector<128x8xf32> -> vector<8x128xf32>
    %c0_38 = arith.constant 0 : index
    %c0_39 = arith.constant 0 : index
    %c5_40 = arith.constant 5 : index
    %c0_41 = arith.constant 0 : index
    %33 = vector.load %arg6[%c0_38, %c0_39, %c5_40, %c0_41] : memref<2x8x8x128xf32, #tpu.memory_space<vmem>>, vector<1x8x1x128xf32>
    %34 = vector.shape_cast %33 : vector<1x8x1x128xf32> to vector<8x128xf32>
    %35 = vector.shape_cast %32 : vector<8x128xf32> to vector<1x8x1x128xf32>
    tpu.vector_store %arg6[%c0_38, %c0_39, %c5_40, %c0_41], %35 {strides = array<i32>} : memref<2x8x8x128xf32, #tpu.memory_space<vmem>>, vector<1x8x1x128xf32>,
    %c0_42 = arith.constant 0 : index
    %c6 = arith.constant 6 : index
    %c0_43 = arith.constant 0 : index
    %c0_44 = arith.constant 0 : index
    %36 = vector.load %arg1[%c0_42, %c6, %c0_43, %c0_44] : memref<2x8x128x8xf32, #tpu.memory_space<vmem>>, vector<1x1x128x8xf32>
    %37 = vector.shape_cast %36 : vector<1x1x128x8xf32> to vector<128x8xf32>
    %38 = tpu.transpose %37, [1, 0] : vector<128x8xf32> -> vector<8x128xf32>
    %c0_45 = arith.constant 0 : index
    %c0_46 = arith.constant 0 : index
    %c6_47 = arith.constant 6 : index
    %c0_48 = arith.constant 0 : index
    %39 = vector.load %arg6[%c0_45, %c0_46, %c6_47, %c0_48] : memref<2x8x8x128xf32, #tpu.memory_space<vmem>>, vector<1x8x1x128xf32>
    %40 = vector.shape_cast %39 : vector<1x8x1x128xf32> to vector<8x128xf32>
    %41 = vector.shape_cast %38 : vector<8x128xf32> to vector<1x8x1x128xf32>
    tpu.vector_store %arg6[%c0_45, %c0_46, %c6_47, %c0_48], %41 {strides = array<i32>} : memref<2x8x8x128xf32, #tpu.memory_space<vmem>>, vector<1x8x1x128xf32>,
    %c0_49 = arith.constant 0 : index
    %c7 = arith.constant 7 : index
    %c0_50 = arith.constant 0 : index
    %c0_51 = arith.constant 0 : index
    %42 = vector.load %arg1[%c0_49, %c7, %c0_50, %c0_51] : memref<2x8x128x8xf32, #tpu.memory_space<vmem>>, vector<1x1x128x8xf32>
    %43 = vector.shape_cast %42 : vector<1x1x128x8xf32> to vector<128x8xf32>
    %44 = tpu.transpose %43, [1, 0] : vector<128x8xf32> -> vector<8x128xf32>
    %c0_52 = arith.constant 0 : index
    %c0_53 = arith.constant 0 : index
    %c7_54 = arith.constant 7 : index
    %c0_55 = arith.constant 0 : index
    %45 = vector.load %arg6[%c0_52, %c0_53, %c7_54, %c0_55] : memref<2x8x8x128xf32, #tpu.memory_space<vmem>>, vector<1x8x1x128xf32>
    %46 = vector.shape_cast %45 : vector<1x8x1x128xf32> to vector<8x128xf32>
    %47 = vector.shape_cast %44 : vector<8x128xf32> to vector<1x8x1x128xf32>
    tpu.vector_store %arg6[%c0_52, %c0_53, %c7_54, %c0_55], %47 {strides = array<i32>} : memref<2x8x8x128xf32, #tpu.memory_space<vmem>>, vector<1x8x1x128xf32>,
    %c1_56 = arith.constant 1 : index
    %c0_57 = arith.constant 0 : index
    %c0_58 = arith.constant 0 : index
    %c0_59 = arith.constant 0 : index
    %48 = vector.load %arg1[%c1_56, %c0_57, %c0_58, %c0_59] : memref<2x8x128x8xf32, #tpu.memory_space<vmem>>, vector<1x1x128x8xf32>
    %49 = vector.shape_cast %48 : vector<1x1x128x8xf32> to vector<128x8xf32>
    %50 = tpu.transpose %49, [1, 0] : vector<128x8xf32> -> vector<8x128xf32>
    %c1_60 = arith.constant 1 : index
    %c0_61 = arith.constant 0 : index
    %c0_62 = arith.constant 0 : index
    %c0_63 = arith.constant 0 : index
    %51 = vector.load %arg6[%c1_60, %c0_61, %c0_62, %c0_63] : memref<2x8x8x128xf32, #tpu.memory_space<vmem>>, vector<1x8x1x128xf32>
    %52 = vector.shape_cast %51 : vector<1x8x1x128xf32> to vector<8x128xf32>
    %53 = vector.shape_cast %50 : vector<8x128xf32> to vector<1x8x1x128xf32>
    tpu.vector_store %arg6[%c1_60, %c0_61, %c0_62, %c0_63], %53 {strides = array<i32>} : memref<2x8x8x128xf32, #tpu.memory_space<vmem>>, vector<1x8x1x128xf32>,
    %c1_64 = arith.constant 1 : index
    %c1_65 = arith.constant 1 : index
    %c0_66 = arith.constant 0 : index
    %c0_67 = arith.constant 0 : index
    %54 = vector.load %arg1[%c1_64, %c1_65, %c0_66, %c0_67] : memref<2x8x128x8xf32, #tpu.memory_space<vmem>>, vector<1x1x128x8xf32>
    %55 = vector.shape_cast %54 : vector<1x1x128x8xf32> to vector<128x8xf32>
    %56 = tpu.transpose %55, [1, 0] : vector<128x8xf32> -> vector<8x128xf32>
    %c1_68 = arith.constant 1 : index
    %c0_69 = arith.constant 0 : index
    %c1_70 = arith.constant 1 : index
    %c0_71 = arith.constant 0 : index
    %57 = vector.load %arg6[%c1_68, %c0_69, %c1_70, %c0_71] : memref<2x8x8x128xf32, #tpu.memory_space<vmem>>, vector<1x8x1x128xf32>
    %58 = vector.shape_cast %57 : vector<1x8x1x128xf32> to vector<8x128xf32>
    %59 = vector.shape_cast %56 : vector<8x128xf32> to vector<1x8x1x128xf32>
    tpu.vector_store %arg6[%c1_68, %c0_69, %c1_70, %c0_71], %59 {strides = array<i32>} : memref<2x8x8x128xf32, #tpu.memory_space<vmem>>, vector<1x8x1x128xf32>,
    %c1_72 = arith.constant 1 : index
    %c2_73 = arith.constant 2 : index
    %c0_74 = arith.constant 0 : index
    %c0_75 = arith.constant 0 : index
    %60 = vector.load %arg1[%c1_72, %c2_73, %c0_74, %c0_75] : memref<2x8x128x8xf32, #tpu.memory_space<vmem>>, vector<1x1x128x8xf32>
    %61 = vector.shape_cast %60 : vector<1x1x128x8xf32> to vector<128x8xf32>
    %62 = tpu.transpose %61, [1, 0] : vector<128x8xf32> -> vector<8x128xf32>
    %c1_76 = arith.constant 1 : index
    %c0_77 = arith.constant 0 : index
    %c2_78 = arith.constant 2 : index
    %c0_79 = arith.constant 0 : index
    %63 = vector.load %arg6[%c1_76, %c0_77, %c2_78, %c0_79] : memref<2x8x8x128xf32, #tpu.memory_space<vmem>>, vector<1x8x1x128xf32>
    %64 = vector.shape_cast %63 : vector<1x8x1x128xf32> to vector<8x128xf32>
    %65 = vector.shape_cast %62 : vector<8x128xf32> to vector<1x8x1x128xf32>
    tpu.vector_store %arg6[%c1_76, %c0_77, %c2_78, %c0_79], %65 {strides = array<i32>} : memref<2x8x8x128xf32, #tpu.memory_space<vmem>>, vector<1x8x1x128xf32>,
    %c1_80 = arith.constant 1 : index
    %c3_81 = arith.constant 3 : index
    %c0_82 = arith.constant 0 : index
    %c0_83 = arith.constant 0 : index
    %66 = vector.load %arg1[%c1_80, %c3_81, %c0_82, %c0_83] : memref<2x8x128x8xf32, #tpu.memory_space<vmem>>, vector<1x1x128x8xf32>
    %67 = vector.shape_cast %66 : vector<1x1x128x8xf32> to vector<128x8xf32>
    %68 = tpu.transpose %67, [1, 0] : vector<128x8xf32> -> vector<8x128xf32>
    %c1_84 = arith.constant 1 : index
    %c0_85 = arith.constant 0 : index
    %c3_86 = arith.constant 3 : index
    %c0_87 = arith.constant 0 : index
    %69 = vector.load %arg6[%c1_84, %c0_85, %c3_86, %c0_87] : memref<2x8x8x128xf32, #tpu.memory_space<vmem>>, vector<1x8x1x128xf32>
    %70 = vector.shape_cast %69 : vector<1x8x1x128xf32> to vector<8x128xf32>
    %71 = vector.shape_cast %68 : vector<8x128xf32> to vector<1x8x1x128xf32>
    tpu.vector_store %arg6[%c1_84, %c0_85, %c3_86, %c0_87], %71 {strides = array<i32>} : memref<2x8x8x128xf32, #tpu.memory_space<vmem>>, vector<1x8x1x128xf32>,
    %c1_88 = arith.constant 1 : index
    %c4_89 = arith.constant 4 : index
    %c0_90 = arith.constant 0 : index
    %c0_91 = arith.constant 0 : index
    %72 = vector.load %arg1[%c1_88, %c4_89, %c0_90, %c0_91] : memref<2x8x128x8xf32, #tpu.memory_space<vmem>>, vector<1x1x128x8xf32>
    %73 = vector.shape_cast %72 : vector<1x1x128x8xf32> to vector<128x8xf32>
    %74 = tpu.transpose %73, [1, 0] : vector<128x8xf32> -> vector<8x128xf32>
    %c1_92 = arith.constant 1 : index
    %c0_93 = arith.constant 0 : index
    %c4_94 = arith.constant 4 : index
    %c0_95 = arith.constant 0 : index
    %75 = vector.load %arg6[%c1_92, %c0_93, %c4_94, %c0_95] : memref<2x8x8x128xf32, #tpu.memory_space<vmem>>, vector<1x8x1x128xf32>
    %76 = vector.shape_cast %75 : vector<1x8x1x128xf32> to vector<8x128xf32>
    %77 = vector.shape_cast %74 : vector<8x128xf32> to vector<1x8x1x128xf32>
    tpu.vector_store %arg6[%c1_92, %c0_93, %c4_94, %c0_95], %77 {strides = array<i32>} : memref<2x8x8x128xf32, #tpu.memory_space<vmem>>, vector<1x8x1x128xf32>,
    %c1_96 = arith.constant 1 : index
    %c5_97 = arith.constant 5 : index
    %c0_98 = arith.constant 0 : index
    %c0_99 = arith.constant 0 : index
    %78 = vector.load %arg1[%c1_96, %c5_97, %c0_98, %c0_99] : memref<2x8x128x8xf32, #tpu.memory_space<vmem>>, vector<1x1x128x8xf32>
    %79 = vector.shape_cast %78 : vector<1x1x128x8xf32> to vector<128x8xf32>
    %80 = tpu.transpose %79, [1, 0] : vector<128x8xf32> -> vector<8x128xf32>
    %c1_100 = arith.constant 1 : index
    %c0_101 = arith.constant 0 : index
    %c5_102 = arith.constant 5 : index
    %c0_103 = arith.constant 0 : index
    %81 = vector.load %arg6[%c1_100, %c0_101, %c5_102, %c0_103] : memref<2x8x8x128xf32, #tpu.memory_space<vmem>>, vector<1x8x1x128xf32>
    %82 = vector.shape_cast %81 : vector<1x8x1x128xf32> to vector<8x128xf32>
    %83 = vector.shape_cast %80 : vector<8x128xf32> to vector<1x8x1x128xf32>
    tpu.vector_store %arg6[%c1_100, %c0_101, %c5_102, %c0_103], %83 {strides = array<i32>} : memref<2x8x8x128xf32, #tpu.memory_space<vmem>>, vector<1x8x1x128xf32>,
    %c1_104 = arith.constant 1 : index
    %c6_105 = arith.constant 6 : index
    %c0_106 = arith.constant 0 : index
    %c0_107 = arith.constant 0 : index
    %84 = vector.load %arg1[%c1_104, %c6_105, %c0_106, %c0_107] : memref<2x8x128x8xf32, #tpu.memory_space<vmem>>, vector<1x1x128x8xf32>
    %85 = vector.shape_cast %84 : vector<1x1x128x8xf32> to vector<128x8xf32>
    %86 = tpu.transpose %85, [1, 0] : vector<128x8xf32> -> vector<8x128xf32>
    %c1_108 = arith.constant 1 : index
    %c0_109 = arith.constant 0 : index
    %c6_110 = arith.constant 6 : index
    %c0_111 = arith.constant 0 : index
    %87 = vector.load %arg6[%c1_108, %c0_109, %c6_110, %c0_111] : memref<2x8x8x128xf32, #tpu.memory_space<vmem>>, vector<1x8x1x128xf32>
    %88 = vector.shape_cast %87 : vector<1x8x1x128xf32> to vector<8x128xf32>
    %89 = vector.shape_cast %86 : vector<8x128xf32> to vector<1x8x1x128xf32>
    tpu.vector_store %arg6[%c1_108, %c0_109, %c6_110, %c0_111], %89 {strides = array<i32>} : memref<2x8x8x128xf32, #tpu.memory_space<vmem>>, vector<1x8x1x128xf32>,
    %c1_112 = arith.constant 1 : index
    %c7_113 = arith.constant 7 : index
    %c0_114 = arith.constant 0 : index
    %c0_115 = arith.constant 0 : index
    %90 = vector.load %arg1[%c1_112, %c7_113, %c0_114, %c0_115] : memref<2x8x128x8xf32, #tpu.memory_space<vmem>>, vector<1x1x128x8xf32>
    %91 = vector.shape_cast %90 : vector<1x1x128x8xf32> to vector<128x8xf32>
    %92 = tpu.transpose %91, [1, 0] : vector<128x8xf32> -> vector<8x128xf32>
    %c1_116 = arith.constant 1 : index
    %c0_117 = arith.constant 0 : index
    %c7_118 = arith.constant 7 : index
    %c0_119 = arith.constant 0 : index
    %93 = vector.load %arg6[%c1_116, %c0_117, %c7_118, %c0_119] : memref<2x8x8x128xf32, #tpu.memory_space<vmem>>, vector<1x8x1x128xf32>
    %94 = vector.shape_cast %93 : vector<1x8x1x128xf32> to vector<8x128xf32>
    %95 = vector.shape_cast %92 : vector<8x128xf32> to vector<1x8x1x128xf32>
    tpu.vector_store %arg6[%c1_116, %c0_117, %c7_118, %c0_119], %95 {strides = array<i32>} : memref<2x8x8x128xf32, #tpu.memory_space<vmem>>, vector<1x8x1x128xf32>,
    %c0_120 = arith.constant 0 : index
    %c0_121 = arith.constant 0 : index
    %c0_122 = arith.constant 0 : index
    %c0_123 = arith.constant 0 : index
    %96 = vector.load %arg6[%c0_120, %c0_121, %c0_122, %c0_123] : memref<2x8x8x128xf32, #tpu.memory_space<vmem>>, vector<2x8x8x128xf32>
    %97 = vector.shape_cast %96 : vector<2x8x8x128xf32> to vector<128x128xf32>
    %98 = vector.extract_strided_slice %97 {offsets = [0, 0], sizes = [8, 128], strides = [1, 1]} : vector<128x128xf32> to vector<8x128xf32>
    %c0_124 = arith.constant 0 : index
    %c0_125 = arith.constant 0 : index
    %99 = vector.load %arg7[%c0_124, %c0_125] : memref<56x2048xf32, #tpu.memory_space<vmem>>, vector<8x128xf32>
    tpu.vector_store %arg7[%c0_124, %c0_125], %98 {strides = array<i32>} : memref<56x2048xf32, #tpu.memory_space<vmem>>, vector<8x128xf32>,
    %100 = vector.extract_strided_slice %97 {offsets = [8, 0], sizes = [8, 128], strides = [1, 1]} : vector<128x128xf32> to vector<8x128xf32>
    %c0_126 = arith.constant 0 : index
    %c128 = arith.constant 128 : index
    %101 = vector.load %arg7[%c0_126, %c128] : memref<56x2048xf32, #tpu.memory_space<vmem>>, vector<8x128xf32>
    tpu.vector_store %arg7[%c0_126, %c128], %100 {strides = array<i32>} : memref<56x2048xf32, #tpu.memory_space<vmem>>, vector<8x128xf32>,
    %102 = vector.extract_strided_slice %97 {offsets = [16, 0], sizes = [8, 128], strides = [1, 1]} : vector<128x128xf32> to vector<8x128xf32>
    %c0_127 = arith.constant 0 : index
    %c256 = arith.constant 256 : index
    %103 = vector.load %arg7[%c0_127, %c256] : memref<56x2048xf32, #tpu.memory_space<vmem>>, vector<8x128xf32>
    tpu.vector_store %arg7[%c0_127, %c256], %102 {strides = array<i32>} : memref<56x2048xf32, #tpu.memory_space<vmem>>, vector<8x128xf32>,
    %104 = vector.extract_strided_slice %97 {offsets = [24, 0], sizes = [8, 128], strides = [1, 1]} : vector<128x128xf32> to vector<8x128xf32>
    %c0_128 = arith.constant 0 : index
    %c384 = arith.constant 384 : index
    %105 = vector.load %arg7[%c0_128, %c384] : memref<56x2048xf32, #tpu.memory_space<vmem>>, vector<8x128xf32>
    tpu.vector_store %arg7[%c0_128, %c384], %104 {strides = array<i32>} : memref<56x2048xf32, #tpu.memory_space<vmem>>, vector<8x128xf32>,
    %106 = vector.extract_strided_slice %97 {offsets = [32, 0], sizes = [8, 128], strides = [1, 1]} : vector<128x128xf32> to vector<8x128xf32>
    %c0_129 = arith.constant 0 : index
    %c512 = arith.constant 512 : index
    %107 = vector.load %arg7[%c0_129, %c512] : memref<56x2048xf32, #tpu.memory_space<vmem>>, vector<8x128xf32>
    tpu.vector_store %arg7[%c0_129, %c512], %106 {strides = array<i32>} : memref<56x2048xf32, #tpu.memory_space<vmem>>, vector<8x128xf32>,
    %108 = vector.extract_strided_slice %97 {offsets = [40, 0], sizes = [8, 128], strides = [1, 1]} : vector<128x128xf32> to vector<8x128xf32>
    %c0_130 = arith.constant 0 : index
    %c640 = arith.constant 640 : index
    %109 = vector.load %arg7[%c0_130, %c640] : memref<56x2048xf32, #tpu.memory_space<vmem>>, vector<8x128xf32>
    tpu.vector_store %arg7[%c0_130, %c640], %108 {strides = array<i32>} : memref<56x2048xf32, #tpu.memory_space<vmem>>, vector<8x128xf32>,
    %110 = vector.extract_strided_slice %97 {offsets = [48, 0], sizes = [8, 128], strides = [1, 1]} : vector<128x128xf32> to vector<8x128xf32>
    %c0_131 = arith.constant 0 : index
    %c768 = arith.constant 768 : index
    %111 = vector.load %arg7[%c0_131, %c768] : memref<56x2048xf32, #tpu.memory_space<vmem>>, vector<8x128xf32>
    tpu.vector_store %arg7[%c0_131, %c768], %110 {strides = array<i32>} : memref<56x2048xf32, #tpu.memory_space<vmem>>, vector<8x128xf32>,
    %112 = vector.extract_strided_slice %97 {offsets = [56, 0], sizes = [8, 128], strides = [1, 1]} : vector<128x128xf32> to vector<8x128xf32>
    %c0_132 = arith.constant 0 : index
    %c896 = arith.constant 896 : index
    %113 = vector.load %arg7[%c0_132, %c896] : memref<56x2048xf32, #tpu.memory_space<vmem>>, vector<8x128xf32>
    tpu.vector_store %arg7[%c0_132, %c896], %112 {strides = array<i32>} : memref<56x2048xf32, #tpu.memory_space<vmem>>, vector<8x128xf32>,
    %114 = vector.extract_strided_slice %97 {offsets = [64, 0], sizes = [8, 128], strides = [1, 1]} : vector<128x128xf32> to vector<8x128xf32>
    %c0_133 = arith.constant 0 : index
    %c1024 = arith.constant 1024 : index
    %115 = vector.load %arg7[%c0_133, %c1024] : memref<56x2048xf32, #tpu.memory_space<vmem>>, vector<8x128xf32>
    tpu.vector_store %arg7[%c0_133, %c1024], %114 {strides = array<i32>} : memref<56x2048xf32, #tpu.memory_space<vmem>>, vector<8x128xf32>,
    %116 = vector.extract_strided_slice %97 {offsets = [72, 0], sizes = [8, 128], strides = [1, 1]} : vector<128x128xf32> to vector<8x128xf32>
    %c0_134 = arith.constant 0 : index
    %c1152 = arith.constant 1152 : index
    %117 = vector.load %arg7[%c0_134, %c1152] : memref<56x2048xf32, #tpu.memory_space<vmem>>, vector<8x128xf32>
    tpu.vector_store %arg7[%c0_134, %c1152], %116 {strides = array<i32>} : memref<56x2048xf32, #tpu.memory_space<vmem>>, vector<8x128xf32>,
    %118 = vector.extract_strided_slice %97 {offsets = [80, 0], sizes = [8, 128], strides = [1, 1]} : vector<128x128xf32> to vector<8x128xf32>
    %c0_135 = arith.constant 0 : index
    %c1280 = arith.constant 1280 : index
    %119 = vector.load %arg7[%c0_135, %c1280] : memref<56x2048xf32, #tpu.memory_space<vmem>>, vector<8x128xf32>
    tpu.vector_store %arg7[%c0_135, %c1280], %118 {strides = array<i32>} : memref<56x2048xf32, #tpu.memory_space<vmem>>, vector<8x128xf32>,
    %120 = vector.extract_strided_slice %97 {offsets = [88, 0], sizes = [8, 128], strides = [1, 1]} : vector<128x128xf32> to vector<8x128xf32>
    %c0_136 = arith.constant 0 : index
    %c1408 = arith.constant 1408 : index
    %121 = vector.load %arg7[%c0_136, %c1408] : memref<56x2048xf32, #tpu.memory_space<vmem>>, vector<8x128xf32>
    tpu.vector_store %arg7[%c0_136, %c1408], %120 {strides = array<i32>} : memref<56x2048xf32, #tpu.memory_space<vmem>>, vector<8x128xf32>,
    %122 = vector.extract_strided_slice %97 {offsets = [96, 0], sizes = [8, 128], strides = [1, 1]} : vector<128x128xf32> to vector<8x128xf32>
    %c0_137 = arith.constant 0 : index
    %c1536 = arith.constant 1536 : index
    %123 = vector.load %arg7[%c0_137, %c1536] : memref<56x2048xf32, #tpu.memory_space<vmem>>, vector<8x128xf32>
    tpu.vector_store %arg7[%c0_137, %c1536], %122 {strides = array<i32>} : memref<56x2048xf32, #tpu.memory_space<vmem>>, vector<8x128xf32>,
    %124 = vector.extract_strided_slice %97 {offsets = [104, 0], sizes = [8, 128], strides = [1, 1]} : vector<128x128xf32> to vector<8x128xf32>
    %c0_138 = arith.constant 0 : index
    %c1664 = arith.constant 1664 : index
    %125 = vector.load %arg7[%c0_138, %c1664] : memref<56x2048xf32, #tpu.memory_space<vmem>>, vector<8x128xf32>
    tpu.vector_store %arg7[%c0_138, %c1664], %124 {strides = array<i32>} : memref<56x2048xf32, #tpu.memory_space<vmem>>, vector<8x128xf32>,
    %126 = vector.extract_strided_slice %97 {offsets = [112, 0], sizes = [8, 128], strides = [1, 1]} : vector<128x128xf32> to vector<8x128xf32>
    %c0_139 = arith.constant 0 : index
    %c1792 = arith.constant 1792 : index
    %127 = vector.load %arg7[%c0_139, %c1792] : memref<56x2048xf32, #tpu.memory_space<vmem>>, vector<8x128xf32>
    tpu.vector_store %arg7[%c0_139, %c1792], %126 {strides = array<i32>} : memref<56x2048xf32, #tpu.memory_space<vmem>>, vector<8x128xf32>,
    %128 = vector.extract_strided_slice %97 {offsets = [120, 0], sizes = [8, 128], strides = [1, 1]} : vector<128x128xf32> to vector<8x128xf32>
    %c0_140 = arith.constant 0 : index
    %c1920 = arith.constant 1920 : index
    %129 = vector.load %arg7[%c0_140, %c1920] : memref<56x2048xf32, #tpu.memory_space<vmem>>, vector<8x128xf32>
    tpu.vector_store %arg7[%c0_140, %c1920], %128 {strides = array<i32>} : memref<56x2048xf32, #tpu.memory_space<vmem>>, vector<8x128xf32>,
    %c0_141 = arith.constant 0 : index
    %c0_142 = arith.constant 0 : index
    %130 = vector.load %arg2[%c0_141, %c0_142] : memref<128x384xf32, #tpu.memory_space<vmem>>, vector<128x384xf32>
    %cst = arith.constant dense<0.000000e+00> : vector<128x384xf32>
    %131 = tpu.matmul %97, %130, %cst {dimension_numbers = #tpu.dot_dimension_numbers<[1], [0], [0], [1], [0, 0, 1, 1], [], []>} : vector<128x128xf32>, vector<128x384xf32>, vector<128x384xf32> -> vector<128x384xf32>
    %132 = vector.extract_strided_slice %131 {offsets = [0, 0], sizes = [128, 128], strides = [1, 1]} : vector<128x384xf32> to vector<128x128xf32>
    %133 = vector.extract_strided_slice %132 {offsets = [0, 0], sizes = [8, 128], strides = [1, 1]} : vector<128x128xf32> to vector<8x128xf32>
    %c8 = arith.constant 8 : index
    %c0_143 = arith.constant 0 : index
    %134 = vector.load %arg7[%c8, %c0_143] : memref<56x2048xf32, #tpu.memory_space<vmem>>, vector<8x128xf32>
    tpu.vector_store %arg7[%c8, %c0_143], %133 {strides = array<i32>} : memref<56x2048xf32, #tpu.memory_space<vmem>>, vector<8x128xf32>,
    %135 = vector.extract_strided_slice %132 {offsets = [8, 0], sizes = [8, 128], strides = [1, 1]} : vector<128x128xf32> to vector<8x128xf32>
    %c8_144 = arith.constant 8 : index
    %c128_145 = arith.constant 128 : index
    %136 = vector.load %arg7[%c8_144, %c128_145] : memref<56x2048xf32, #tpu.memory_space<vmem>>, vector<8x128xf32>
    tpu.vector_store %arg7[%c8_144, %c128_145], %135 {strides = array<i32>} : memref<56x2048xf32, #tpu.memory_space<vmem>>, vector<8x128xf32>,
    %137 = vector.extract_strided_slice %132 {offsets = [16, 0], sizes = [8, 128], strides = [1, 1]} : vector<128x128xf32> to vector<8x128xf32>
    %c8_146 = arith.constant 8 : index
    %c256_147 = arith.constant 256 : index
    %138 = vector.load %arg7[%c8_146, %c256_147] : memref<56x2048xf32, #tpu.memory_space<vmem>>, vector<8x128xf32>
    tpu.vector_store %arg7[%c8_146, %c256_147], %137 {strides = array<i32>} : memref<56x2048xf32, #tpu.memory_space<vmem>>, vector<8x128xf32>,
    %139 = vector.extract_strided_slice %132 {offsets = [24, 0], sizes = [8, 128], strides = [1, 1]} : vector<128x128xf32> to vector<8x128xf32>
    %c8_148 = arith.constant 8 : index
    %c384_149 = arith.constant 384 : index
    %140 = vector.load %arg7[%c8_148, %c384_149] : memref<56x2048xf32, #tpu.memory_space<vmem>>, vector<8x128xf32>
    tpu.vector_store %arg7[%c8_148, %c384_149], %139 {strides = array<i32>} : memref<56x2048xf32, #tpu.memory_space<vmem>>, vector<8x128xf32>,
    %141 = vector.extract_strided_slice %132 {offsets = [32, 0], sizes = [8, 128], strides = [1, 1]} : vector<128x128xf32> to vector<8x128xf32>
    %c8_150 = arith.constant 8 : index
    %c512_151 = arith.constant 512 : index
    %142 = vector.load %arg7[%c8_150, %c512_151] : memref<56x2048xf32, #tpu.memory_space<vmem>>, vector<8x128xf32>
    tpu.vector_store %arg7[%c8_150, %c512_151], %141 {strides = array<i32>} : memref<56x2048xf32, #tpu.memory_space<vmem>>, vector<8x128xf32>,
    %143 = vector.extract_strided_slice %132 {offsets = [40, 0], sizes = [8, 128], strides = [1, 1]} : vector<128x128xf32> to vector<8x128xf32>
    %c8_152 = arith.constant 8 : index
    %c640_153 = arith.constant 640 : index
    %144 = vector.load %arg7[%c8_152, %c640_153] : memref<56x2048xf32, #tpu.memory_space<vmem>>, vector<8x128xf32>
    tpu.vector_store %arg7[%c8_152, %c640_153], %143 {strides = array<i32>} : memref<56x2048xf32, #tpu.memory_space<vmem>>, vector<8x128xf32>,
    %145 = vector.extract_strided_slice %132 {offsets = [48, 0], sizes = [8, 128], strides = [1, 1]} : vector<128x128xf32> to vector<8x128xf32>
    %c8_154 = arith.constant 8 : index
    %c768_155 = arith.constant 768 : index
    %146 = vector.load %arg7[%c8_154, %c768_155] : memref<56x2048xf32, #tpu.memory_space<vmem>>, vector<8x128xf32>
    tpu.vector_store %arg7[%c8_154, %c768_155], %145 {strides = array<i32>} : memref<56x2048xf32, #tpu.memory_space<vmem>>, vector<8x128xf32>,
    %147 = vector.extract_strided_slice %132 {offsets = [56, 0], sizes = [8, 128], strides = [1, 1]} : vector<128x128xf32> to vector<8x128xf32>
    %c8_156 = arith.constant 8 : index
    %c896_157 = arith.constant 896 : index
    %148 = vector.load %arg7[%c8_156, %c896_157] : memref<56x2048xf32, #tpu.memory_space<vmem>>, vector<8x128xf32>
    tpu.vector_store %arg7[%c8_156, %c896_157], %147 {strides = array<i32>} : memref<56x2048xf32, #tpu.memory_space<vmem>>, vector<8x128xf32>,
    %149 = vector.extract_strided_slice %132 {offsets = [64, 0], sizes = [8, 128], strides = [1, 1]} : vector<128x128xf32> to vector<8x128xf32>
    %c8_158 = arith.constant 8 : index
    %c1024_159 = arith.constant 1024 : index
    %150 = vector.load %arg7[%c8_158, %c1024_159] : memref<56x2048xf32, #tpu.memory_space<vmem>>, vector<8x128xf32>
    tpu.vector_store %arg7[%c8_158, %c1024_159], %149 {strides = array<i32>} : memref<56x2048xf32, #tpu.memory_space<vmem>>, vector<8x128xf32>,
    %151 = vector.extract_strided_slice %132 {offsets = [72, 0], sizes = [8, 128], strides = [1, 1]} : vector<128x128xf32> to vector<8x128xf32>
    %c8_160 = arith.constant 8 : index
    %c1152_161 = arith.constant 1152 : index
    %152 = vector.load %arg7[%c8_160, %c1152_161] : memref<56x2048xf32, #tpu.memory_space<vmem>>, vector<8x128xf32>
    tpu.vector_store %arg7[%c8_160, %c1152_161], %151 {strides = array<i32>} : memref<56x2048xf32, #tpu.memory_space<vmem>>, vector<8x128xf32>,
    %153 = vector.extract_strided_slice %132 {offsets = [80, 0], sizes = [8, 128], strides = [1, 1]} : vector<128x128xf32> to vector<8x128xf32>
    %c8_162 = arith.constant 8 : index
    %c1280_163 = arith.constant 1280 : index
    %154 = vector.load %arg7[%c8_162, %c1280_163] : memref<56x2048xf32, #tpu.memory_space<vmem>>, vector<8x128xf32>
    tpu.vector_store %arg7[%c8_162, %c1280_163], %153 {strides = array<i32>} : memref<56x2048xf32, #tpu.memory_space<vmem>>, vector<8x128xf32>,
    %155 = vector.extract_strided_slice %132 {offsets = [88, 0], sizes = [8, 128], strides = [1, 1]} : vector<128x128xf32> to vector<8x128xf32>
    %c8_164 = arith.constant 8 : index
    %c1408_165 = arith.constant 1408 : index
    %156 = vector.load %arg7[%c8_164, %c1408_165] : memref<56x2048xf32, #tpu.memory_space<vmem>>, vector<8x128xf32>
    tpu.vector_store %arg7[%c8_164, %c1408_165], %155 {strides = array<i32>} : memref<56x2048xf32, #tpu.memory_space<vmem>>, vector<8x128xf32>,
    %157 = vector.extract_strided_slice %132 {offsets = [96, 0], sizes = [8, 128], strides = [1, 1]} : vector<128x128xf32> to vector<8x128xf32>
    %c8_166 = arith.constant 8 : index
    %c1536_167 = arith.constant 1536 : index
    %158 = vector.load %arg7[%c8_166, %c1536_167] : memref<56x2048xf32, #tpu.memory_space<vmem>>, vector<8x128xf32>
    tpu.vector_store %arg7[%c8_166, %c1536_167], %157 {strides = array<i32>} : memref<56x2048xf32, #tpu.memory_space<vmem>>, vector<8x128xf32>,
    %159 = vector.extract_strided_slice %132 {offsets = [104, 0], sizes = [8, 128], strides = [1, 1]} : vector<128x128xf32> to vector<8x128xf32>
    %c8_168 = arith.constant 8 : index
    %c1664_169 = arith.constant 1664 : index
    %160 = vector.load %arg7[%c8_168, %c1664_169] : memref<56x2048xf32, #tpu.memory_space<vmem>>, vector<8x128xf32>
    tpu.vector_store %arg7[%c8_168, %c1664_169], %159 {strides = array<i32>} : memref<56x2048xf32, #tpu.memory_space<vmem>>, vector<8x128xf32>,
    %161 = vector.extract_strided_slice %132 {offsets = [112, 0], sizes = [8, 128], strides = [1, 1]} : vector<128x128xf32> to vector<8x128xf32>
    %c8_170 = arith.constant 8 : index
    %c1792_171 = arith.constant 1792 : index
    %162 = vector.load %arg7[%c8_170, %c1792_171] : memref<56x2048xf32, #tpu.memory_space<vmem>>, vector<8x128xf32>
    tpu.vector_store %arg7[%c8_170, %c1792_171], %161 {strides = array<i32>} : memref<56x2048xf32, #tpu.memory_space<vmem>>, vector<8x128xf32>,
    %163 = vector.extract_strided_slice %132 {offsets = [120, 0], sizes = [8, 128], strides = [1, 1]} : vector<128x128xf32> to vector<8x128xf32>
    %c8_172 = arith.constant 8 : index
    %c1920_173 = arith.constant 1920 : index
    %164 = vector.load %arg7[%c8_172, %c1920_173] : memref<56x2048xf32, #tpu.memory_space<vmem>>, vector<8x128xf32>
    tpu.vector_store %arg7[%c8_172, %c1920_173], %163 {strides = array<i32>} : memref<56x2048xf32, #tpu.memory_space<vmem>>, vector<8x128xf32>,
    %c0_174 = arith.constant 0 : index
    %c0_175 = arith.constant 0 : index
    %165 = vector.load %arg2[%c0_174, %c0_175] : memref<128x384xf32, #tpu.memory_space<vmem>>, vector<128x128xf32>
    %cst_176 = arith.constant dense<0.000000e+00> : vector<128x128xf32>
    %166 = tpu.matmul %132, %165, %cst_176 {dimension_numbers = #tpu.dot_dimension_numbers<[1], [0], [0], [1], [0, 0, 1, 1], [], []>} : vector<128x128xf32>, vector<128x128xf32>, vector<128x128xf32> -> vector<128x128xf32>
    %167 = vector.extract_strided_slice %166 {offsets = [0, 0], sizes = [8, 128], strides = [1, 1]} : vector<128x128xf32> to vector<8x128xf32>
    %c16 = arith.constant 16 : index
    %c0_177 = arith.constant 0 : index
    %168 = vector.load %arg7[%c16, %c0_177] : memref<56x2048xf32, #tpu.memory_space<vmem>>, vector<8x128xf32>
    tpu.vector_store %arg7[%c16, %c0_177], %167 {strides = array<i32>} : memref<56x2048xf32, #tpu.memory_space<vmem>>, vector<8x128xf32>,
    %169 = vector.extract_strided_slice %166 {offsets = [8, 0], sizes = [8, 128], strides = [1, 1]} : vector<128x128xf32> to vector<8x128xf32>
    %c16_178 = arith.constant 16 : index
    %c128_179 = arith.constant 128 : index
    %170 = vector.load %arg7[%c16_178, %c128_179] : memref<56x2048xf32, #tpu.memory_space<vmem>>, vector<8x128xf32>
    tpu.vector_store %arg7[%c16_178, %c128_179], %169 {strides = array<i32>} : memref<56x2048xf32, #tpu.memory_space<vmem>>, vector<8x128xf32>,
    %171 = vector.extract_strided_slice %166 {offsets = [16, 0], sizes = [8, 128], strides = [1, 1]} : vector<128x128xf32> to vector<8x128xf32>
    %c16_180 = arith.constant 16 : index
    %c256_181 = arith.constant 256 : index
    %172 = vector.load %arg7[%c16_180, %c256_181] : memref<56x2048xf32, #tpu.memory_space<vmem>>, vector<8x128xf32>
    tpu.vector_store %arg7[%c16_180, %c256_181], %171 {strides = array<i32>} : memref<56x2048xf32, #tpu.memory_space<vmem>>, vector<8x128xf32>,
    %173 = vector.extract_strided_slice %166 {offsets = [24, 0], sizes = [8, 128], strides = [1, 1]} : vector<128x128xf32> to vector<8x128xf32>
    %c16_182 = arith.constant 16 : index
    %c384_183 = arith.constant 384 : index
    %174 = vector.load %arg7[%c16_182, %c384_183] : memref<56x2048xf32, #tpu.memory_space<vmem>>, vector<8x128xf32>
    tpu.vector_store %arg7[%c16_182, %c384_183], %173 {strides = array<i32>} : memref<56x2048xf32, #tpu.memory_space<vmem>>, vector<8x128xf32>,
    %175 = vector.extract_strided_slice %166 {offsets = [32, 0], sizes = [8, 128], strides = [1, 1]} : vector<128x128xf32> to vector<8x128xf32>
    %c16_184 = arith.constant 16 : index
    %c512_185 = arith.constant 512 : index
    %176 = vector.load %arg7[%c16_184, %c512_185] : memref<56x2048xf32, #tpu.memory_space<vmem>>, vector<8x128xf32>
    tpu.vector_store %arg7[%c16_184, %c512_185], %175 {strides = array<i32>} : memref<56x2048xf32, #tpu.memory_space<vmem>>, vector<8x128xf32>,
    %177 = vector.extract_strided_slice %166 {offsets = [40, 0], sizes = [8, 128], strides = [1, 1]} : vector<128x128xf32> to vector<8x128xf32>
    %c16_186 = arith.constant 16 : index
    %c640_187 = arith.constant 640 : index
    %178 = vector.load %arg7[%c16_186, %c640_187] : memref<56x2048xf32, #tpu.memory_space<vmem>>, vector<8x128xf32>
    tpu.vector_store %arg7[%c16_186, %c640_187], %177 {strides = array<i32>} : memref<56x2048xf32, #tpu.memory_space<vmem>>, vector<8x128xf32>,
    %179 = vector.extract_strided_slice %166 {offsets = [48, 0], sizes = [8, 128], strides = [1, 1]} : vector<128x128xf32> to vector<8x128xf32>
    %c16_188 = arith.constant 16 : index
    %c768_189 = arith.constant 768 : index
    %180 = vector.load %arg7[%c16_188, %c768_189] : memref<56x2048xf32, #tpu.memory_space<vmem>>, vector<8x128xf32>
    tpu.vector_store %arg7[%c16_188, %c768_189], %179 {strides = array<i32>} : memref<56x2048xf32, #tpu.memory_space<vmem>>, vector<8x128xf32>,
    %181 = vector.extract_strided_slice %166 {offsets = [56, 0], sizes = [8, 128], strides = [1, 1]} : vector<128x128xf32> to vector<8x128xf32>
    %c16_190 = arith.constant 16 : index
    %c896_191 = arith.constant 896 : index
    %182 = vector.load %arg7[%c16_190, %c896_191] : memref<56x2048xf32, #tpu.memory_space<vmem>>, vector<8x128xf32>
    tpu.vector_store %arg7[%c16_190, %c896_191], %181 {strides = array<i32>} : memref<56x2048xf32, #tpu.memory_space<vmem>>, vector<8x128xf32>,
    %183 = vector.extract_strided_slice %166 {offsets = [64, 0], sizes = [8, 128], strides = [1, 1]} : vector<128x128xf32> to vector<8x128xf32>
    %c16_192 = arith.constant 16 : index
    %c1024_193 = arith.constant 1024 : index
    %184 = vector.load %arg7[%c16_192, %c1024_193] : memref<56x2048xf32, #tpu.memory_space<vmem>>, vector<8x128xf32>
    tpu.vector_store %arg7[%c16_192, %c1024_193], %183 {strides = array<i32>} : memref<56x2048xf32, #tpu.memory_space<vmem>>, vector<8x128xf32>,
    %185 = vector.extract_strided_slice %166 {offsets = [72, 0], sizes = [8, 128], strides = [1, 1]} : vector<128x128xf32> to vector<8x128xf32>
    %c16_194 = arith.constant 16 : index
    %c1152_195 = arith.constant 1152 : index
    %186 = vector.load %arg7[%c16_194, %c1152_195] : memref<56x2048xf32, #tpu.memory_space<vmem>>, vector<8x128xf32>
    tpu.vector_store %arg7[%c16_194, %c1152_195], %185 {strides = array<i32>} : memref<56x2048xf32, #tpu.memory_space<vmem>>, vector<8x128xf32>,
    %187 = vector.extract_strided_slice %166 {offsets = [80, 0], sizes = [8, 128], strides = [1, 1]} : vector<128x128xf32> to vector<8x128xf32>
    %c16_196 = arith.constant 16 : index
    %c1280_197 = arith.constant 1280 : index
    %188 = vector.load %arg7[%c16_196, %c1280_197] : memref<56x2048xf32, #tpu.memory_space<vmem>>, vector<8x128xf32>
    tpu.vector_store %arg7[%c16_196, %c1280_197], %187 {strides = array<i32>} : memref<56x2048xf32, #tpu.memory_space<vmem>>, vector<8x128xf32>,
    %189 = vector.extract_strided_slice %166 {offsets = [88, 0], sizes = [8, 128], strides = [1, 1]} : vector<128x128xf32> to vector<8x128xf32>
    %c16_198 = arith.constant 16 : index
    %c1408_199 = arith.constant 1408 : index
    %190 = vector.load %arg7[%c16_198, %c1408_199] : memref<56x2048xf32, #tpu.memory_space<vmem>>, vector<8x128xf32>
    tpu.vector_store %arg7[%c16_198, %c1408_199], %189 {strides = array<i32>} : memref<56x2048xf32, #tpu.memory_space<vmem>>, vector<8x128xf32>,
    %191 = vector.extract_strided_slice %166 {offsets = [96, 0], sizes = [8, 128], strides = [1, 1]} : vector<128x128xf32> to vector<8x128xf32>
    %c16_200 = arith.constant 16 : index
    %c1536_201 = arith.constant 1536 : index
    %192 = vector.load %arg7[%c16_200, %c1536_201] : memref<56x2048xf32, #tpu.memory_space<vmem>>, vector<8x128xf32>
    tpu.vector_store %arg7[%c16_200, %c1536_201], %191 {strides = array<i32>} : memref<56x2048xf32, #tpu.memory_space<vmem>>, vector<8x128xf32>,
    %193 = vector.extract_strided_slice %166 {offsets = [104, 0], sizes = [8, 128], strides = [1, 1]} : vector<128x128xf32> to vector<8x128xf32>
    %c16_202 = arith.constant 16 : index
    %c1664_203 = arith.constant 1664 : index
    %194 = vector.load %arg7[%c16_202, %c1664_203] : memref<56x2048xf32, #tpu.memory_space<vmem>>, vector<8x128xf32>
    tpu.vector_store %arg7[%c16_202, %c1664_203], %193 {strides = array<i32>} : memref<56x2048xf32, #tpu.memory_space<vmem>>, vector<8x128xf32>,
    %195 = vector.extract_strided_slice %166 {offsets = [112, 0], sizes = [8, 128], strides = [1, 1]} : vector<128x128xf32> to vector<8x128xf32>
    %c16_204 = arith.constant 16 : index
    %c1792_205 = arith.constant 1792 : index
    %196 = vector.load %arg7[%c16_204, %c1792_205] : memref<56x2048xf32, #tpu.memory_space<vmem>>, vector<8x128xf32>
    tpu.vector_store %arg7[%c16_204, %c1792_205], %195 {strides = array<i32>} : memref<56x2048xf32, #tpu.memory_space<vmem>>, vector<8x128xf32>,
    %197 = vector.extract_strided_slice %166 {offsets = [120, 0], sizes = [8, 128], strides = [1, 1]} : vector<128x128xf32> to vector<8x128xf32>
    %c16_206 = arith.constant 16 : index
    %c1920_207 = arith.constant 1920 : index
    %198 = vector.load %arg7[%c16_206, %c1920_207] : memref<56x2048xf32, #tpu.memory_space<vmem>>, vector<8x128xf32>
    tpu.vector_store %arg7[%c16_206, %c1920_207], %197 {strides = array<i32>} : memref<56x2048xf32, #tpu.memory_space<vmem>>, vector<8x128xf32>,
    %199 = vector.extract_strided_slice %131 {offsets = [0, 128], sizes = [128, 128], strides = [1, 1]} : vector<128x384xf32> to vector<128x128xf32>
    %200 = vector.extract_strided_slice %199 {offsets = [0, 0], sizes = [8, 128], strides = [1, 1]} : vector<128x128xf32> to vector<8x128xf32>
    %c24 = arith.constant 24 : index
    %c0_208 = arith.constant 0 : index
    %201 = vector.load %arg7[%c24, %c0_208] : memref<56x2048xf32, #tpu.memory_space<vmem>>, vector<8x128xf32>
    tpu.vector_store %arg7[%c24, %c0_208], %200 {strides = array<i32>} : memref<56x2048xf32, #tpu.memory_space<vmem>>, vector<8x128xf32>,
    %202 = vector.extract_strided_slice %199 {offsets = [8, 0], sizes = [8, 128], strides = [1, 1]} : vector<128x128xf32> to vector<8x128xf32>
    %c24_209 = arith.constant 24 : index
    %c128_210 = arith.constant 128 : index
    %203 = vector.load %arg7[%c24_209, %c128_210] : memref<56x2048xf32, #tpu.memory_space<vmem>>, vector<8x128xf32>
    tpu.vector_store %arg7[%c24_209, %c128_210], %202 {strides = array<i32>} : memref<56x2048xf32, #tpu.memory_space<vmem>>, vector<8x128xf32>,
    %204 = vector.extract_strided_slice %199 {offsets = [16, 0], sizes = [8, 128], strides = [1, 1]} : vector<128x128xf32> to vector<8x128xf32>
    %c24_211 = arith.constant 24 : index
    %c256_212 = arith.constant 256 : index
    %205 = vector.load %arg7[%c24_211, %c256_212] : memref<56x2048xf32, #tpu.memory_space<vmem>>, vector<8x128xf32>
    tpu.vector_store %arg7[%c24_211, %c256_212], %204 {strides = array<i32>} : memref<56x2048xf32, #tpu.memory_space<vmem>>, vector<8x128xf32>,
    %206 = vector.extract_strided_slice %199 {offsets = [24, 0], sizes = [8, 128], strides = [1, 1]} : vector<128x128xf32> to vector<8x128xf32>
    %c24_213 = arith.constant 24 : index
    %c384_214 = arith.constant 384 : index
    %207 = vector.load %arg7[%c24_213, %c384_214] : memref<56x2048xf32, #tpu.memory_space<vmem>>, vector<8x128xf32>
    tpu.vector_store %arg7[%c24_213, %c384_214], %206 {strides = array<i32>} : memref<56x2048xf32, #tpu.memory_space<vmem>>, vector<8x128xf32>,
    %208 = vector.extract_strided_slice %199 {offsets = [32, 0], sizes = [8, 128], strides = [1, 1]} : vector<128x128xf32> to vector<8x128xf32>
    %c24_215 = arith.constant 24 : index
    %c512_216 = arith.constant 512 : index
    %209 = vector.load %arg7[%c24_215, %c512_216] : memref<56x2048xf32, #tpu.memory_space<vmem>>, vector<8x128xf32>
    tpu.vector_store %arg7[%c24_215, %c512_216], %208 {strides = array<i32>} : memref<56x2048xf32, #tpu.memory_space<vmem>>, vector<8x128xf32>,
    %210 = vector.extract_strided_slice %199 {offsets = [40, 0], sizes = [8, 128], strides = [1, 1]} : vector<128x128xf32> to vector<8x128xf32>
    %c24_217 = arith.constant 24 : index
    %c640_218 = arith.constant 640 : index
    %211 = vector.load %arg7[%c24_217, %c640_218] : memref<56x2048xf32, #tpu.memory_space<vmem>>, vector<8x128xf32>
    tpu.vector_store %arg7[%c24_217, %c640_218], %210 {strides = array<i32>} : memref<56x2048xf32, #tpu.memory_space<vmem>>, vector<8x128xf32>,
    %212 = vector.extract_strided_slice %199 {offsets = [48, 0], sizes = [8, 128], strides = [1, 1]} : vector<128x128xf32> to vector<8x128xf32>
    %c24_219 = arith.constant 24 : index
    %c768_220 = arith.constant 768 : index
    %213 = vector.load %arg7[%c24_219, %c768_220] : memref<56x2048xf32, #tpu.memory_space<vmem>>, vector<8x128xf32>
    tpu.vector_store %arg7[%c24_219, %c768_220], %212 {strides = array<i32>} : memref<56x2048xf32, #tpu.memory_space<vmem>>, vector<8x128xf32>,
    %214 = vector.extract_strided_slice %199 {offsets = [56, 0], sizes = [8, 128], strides = [1, 1]} : vector<128x128xf32> to vector<8x128xf32>
    %c24_221 = arith.constant 24 : index
    %c896_222 = arith.constant 896 : index
    %215 = vector.load %arg7[%c24_221, %c896_222] : memref<56x2048xf32, #tpu.memory_space<vmem>>, vector<8x128xf32>
    tpu.vector_store %arg7[%c24_221, %c896_222], %214 {strides = array<i32>} : memref<56x2048xf32, #tpu.memory_space<vmem>>, vector<8x128xf32>,
    %216 = vector.extract_strided_slice %199 {offsets = [64, 0], sizes = [8, 128], strides = [1, 1]} : vector<128x128xf32> to vector<8x128xf32>
    %c24_223 = arith.constant 24 : index
    %c1024_224 = arith.constant 1024 : index
    %217 = vector.load %arg7[%c24_223, %c1024_224] : memref<56x2048xf32, #tpu.memory_space<vmem>>, vector<8x128xf32>
    tpu.vector_store %arg7[%c24_223, %c1024_224], %216 {strides = array<i32>} : memref<56x2048xf32, #tpu.memory_space<vmem>>, vector<8x128xf32>,
    %218 = vector.extract_strided_slice %199 {offsets = [72, 0], sizes = [8, 128], strides = [1, 1]} : vector<128x128xf32> to vector<8x128xf32>
    %c24_225 = arith.constant 24 : index
    %c1152_226 = arith.constant 1152 : index
    %219 = vector.load %arg7[%c24_225, %c1152_226] : memref<56x2048xf32, #tpu.memory_space<vmem>>, vector<8x128xf32>
    tpu.vector_store %arg7[%c24_225, %c1152_226], %218 {strides = array<i32>} : memref<56x2048xf32, #tpu.memory_space<vmem>>, vector<8x128xf32>,
    %220 = vector.extract_strided_slice %199 {offsets = [80, 0], sizes = [8, 128], strides = [1, 1]} : vector<128x128xf32> to vector<8x128xf32>
    %c24_227 = arith.constant 24 : index
    %c1280_228 = arith.constant 1280 : index
    %221 = vector.load %arg7[%c24_227, %c1280_228] : memref<56x2048xf32, #tpu.memory_space<vmem>>, vector<8x128xf32>
    tpu.vector_store %arg7[%c24_227, %c1280_228], %220 {strides = array<i32>} : memref<56x2048xf32, #tpu.memory_space<vmem>>, vector<8x128xf32>,
    %222 = vector.extract_strided_slice %199 {offsets = [88, 0], sizes = [8, 128], strides = [1, 1]} : vector<128x128xf32> to vector<8x128xf32>
    %c24_229 = arith.constant 24 : index
    %c1408_230 = arith.constant 1408 : index
    %223 = vector.load %arg7[%c24_229, %c1408_230] : memref<56x2048xf32, #tpu.memory_space<vmem>>, vector<8x128xf32>
    tpu.vector_store %arg7[%c24_229, %c1408_230], %222 {strides = array<i32>} : memref<56x2048xf32, #tpu.memory_space<vmem>>, vector<8x128xf32>,
    %224 = vector.extract_strided_slice %199 {offsets = [96, 0], sizes = [8, 128], strides = [1, 1]} : vector<128x128xf32> to vector<8x128xf32>
    %c24_231 = arith.constant 24 : index
    %c1536_232 = arith.constant 1536 : index
    %225 = vector.load %arg7[%c24_231, %c1536_232] : memref<56x2048xf32, #tpu.memory_space<vmem>>, vector<8x128xf32>
    tpu.vector_store %arg7[%c24_231, %c1536_232], %224 {strides = array<i32>} : memref<56x2048xf32, #tpu.memory_space<vmem>>, vector<8x128xf32>,
    %226 = vector.extract_strided_slice %199 {offsets = [104, 0], sizes = [8, 128], strides = [1, 1]} : vector<128x128xf32> to vector<8x128xf32>
    %c24_233 = arith.constant 24 : index
    %c1664_234 = arith.constant 1664 : index
    %227 = vector.load %arg7[%c24_233, %c1664_234] : memref<56x2048xf32, #tpu.memory_space<vmem>>, vector<8x128xf32>
    tpu.vector_store %arg7[%c24_233, %c1664_234], %226 {strides = array<i32>} : memref<56x2048xf32, #tpu.memory_space<vmem>>, vector<8x128xf32>,
    %228 = vector.extract_strided_slice %199 {offsets = [112, 0], sizes = [8, 128], strides = [1, 1]} : vector<128x128xf32> to vector<8x128xf32>
    %c24_235 = arith.constant 24 : index
    %c1792_236 = arith.constant 1792 : index
    %229 = vector.load %arg7[%c24_235, %c1792_236] : memref<56x2048xf32, #tpu.memory_space<vmem>>, vector<8x128xf32>
    tpu.vector_store %arg7[%c24_235, %c1792_236], %228 {strides = array<i32>} : memref<56x2048xf32, #tpu.memory_space<vmem>>, vector<8x128xf32>,
    %230 = vector.extract_strided_slice %199 {offsets = [120, 0], sizes = [8, 128], strides = [1, 1]} : vector<128x128xf32> to vector<8x128xf32>
    %c24_237 = arith.constant 24 : index
    %c1920_238 = arith.constant 1920 : index
    %231 = vector.load %arg7[%c24_237, %c1920_238] : memref<56x2048xf32, #tpu.memory_space<vmem>>, vector<8x128xf32>
    tpu.vector_store %arg7[%c24_237, %c1920_238], %230 {strides = array<i32>} : memref<56x2048xf32, #tpu.memory_space<vmem>>, vector<8x128xf32>,
    %c0_239 = arith.constant 0 : index
    %c128_240 = arith.constant 128 : index
    %232 = vector.load %arg2[%c0_239, %c128_240] : memref<128x384xf32, #tpu.memory_space<vmem>>, vector<128x128xf32>
    %cst_241 = arith.constant dense<0.000000e+00> : vector<128x128xf32>
    %233 = tpu.matmul %199, %232, %cst_241 {dimension_numbers = #tpu.dot_dimension_numbers<[1], [0], [0], [1], [0, 0, 1, 1], [], []>} : vector<128x128xf32>, vector<128x128xf32>, vector<128x128xf32> -> vector<128x128xf32>
    %234 = vector.extract_strided_slice %233 {offsets = [0, 0], sizes = [8, 128], strides = [1, 1]} : vector<128x128xf32> to vector<8x128xf32>
    %c32 = arith.constant 32 : index
    %c0_242 = arith.constant 0 : index
    %235 = vector.load %arg7[%c32, %c0_242] : memref<56x2048xf32, #tpu.memory_space<vmem>>, vector<8x128xf32>
    tpu.vector_store %arg7[%c32, %c0_242], %234 {strides = array<i32>} : memref<56x2048xf32, #tpu.memory_space<vmem>>, vector<8x128xf32>,
    %236 = vector.extract_strided_slice %233 {offsets = [8, 0], sizes = [8, 128], strides = [1, 1]} : vector<128x128xf32> to vector<8x128xf32>
    %c32_243 = arith.constant 32 : index
    %c128_244 = arith.constant 128 : index
    %237 = vector.load %arg7[%c32_243, %c128_244] : memref<56x2048xf32, #tpu.memory_space<vmem>>, vector<8x128xf32>
    tpu.vector_store %arg7[%c32_243, %c128_244], %236 {strides = array<i32>} : memref<56x2048xf32, #tpu.memory_space<vmem>>, vector<8x128xf32>,
    %238 = vector.extract_strided_slice %233 {offsets = [16, 0], sizes = [8, 128], strides = [1, 1]} : vector<128x128xf32> to vector<8x128xf32>
    %c32_245 = arith.constant 32 : index
    %c256_246 = arith.constant 256 : index
    %239 = vector.load %arg7[%c32_245, %c256_246] : memref<56x2048xf32, #tpu.memory_space<vmem>>, vector<8x128xf32>
    tpu.vector_store %arg7[%c32_245, %c256_246], %238 {strides = array<i32>} : memref<56x2048xf32, #tpu.memory_space<vmem>>, vector<8x128xf32>,
    %240 = vector.extract_strided_slice %233 {offsets = [24, 0], sizes = [8, 128], strides = [1, 1]} : vector<128x128xf32> to vector<8x128xf32>
    %c32_247 = arith.constant 32 : index
    %c384_248 = arith.constant 384 : index
    %241 = vector.load %arg7[%c32_247, %c384_248] : memref<56x2048xf32, #tpu.memory_space<vmem>>, vector<8x128xf32>
    tpu.vector_store %arg7[%c32_247, %c384_248], %240 {strides = array<i32>} : memref<56x2048xf32, #tpu.memory_space<vmem>>, vector<8x128xf32>,
    %242 = vector.extract_strided_slice %233 {offsets = [32, 0], sizes = [8, 128], strides = [1, 1]} : vector<128x128xf32> to vector<8x128xf32>
    %c32_249 = arith.constant 32 : index
    %c512_250 = arith.constant 512 : index
    %243 = vector.load %arg7[%c32_249, %c512_250] : memref<56x2048xf32, #tpu.memory_space<vmem>>, vector<8x128xf32>
    tpu.vector_store %arg7[%c32_249, %c512_250], %242 {strides = array<i32>} : memref<56x2048xf32, #tpu.memory_space<vmem>>, vector<8x128xf32>,
    %244 = vector.extract_strided_slice %233 {offsets = [40, 0], sizes = [8, 128], strides = [1, 1]} : vector<128x128xf32> to vector<8x128xf32>
    %c32_251 = arith.constant 32 : index
    %c640_252 = arith.constant 640 : index
    %245 = vector.load %arg7[%c32_251, %c640_252] : memref<56x2048xf32, #tpu.memory_space<vmem>>, vector<8x128xf32>
    tpu.vector_store %arg7[%c32_251, %c640_252], %244 {strides = array<i32>} : memref<56x2048xf32, #tpu.memory_space<vmem>>, vector<8x128xf32>,
    %246 = vector.extract_strided_slice %233 {offsets = [48, 0], sizes = [8, 128], strides = [1, 1]} : vector<128x128xf32> to vector<8x128xf32>
    %c32_253 = arith.constant 32 : index
    %c768_254 = arith.constant 768 : index
    %247 = vector.load %arg7[%c32_253, %c768_254] : memref<56x2048xf32, #tpu.memory_space<vmem>>, vector<8x128xf32>
    tpu.vector_store %arg7[%c32_253, %c768_254], %246 {strides = array<i32>} : memref<56x2048xf32, #tpu.memory_space<vmem>>, vector<8x128xf32>,
    %248 = vector.extract_strided_slice %233 {offsets = [56, 0], sizes = [8, 128], strides = [1, 1]} : vector<128x128xf32> to vector<8x128xf32>
    %c32_255 = arith.constant 32 : index
    %c896_256 = arith.constant 896 : index
    %249 = vector.load %arg7[%c32_255, %c896_256] : memref<56x2048xf32, #tpu.memory_space<vmem>>, vector<8x128xf32>
    tpu.vector_store %arg7[%c32_255, %c896_256], %248 {strides = array<i32>} : memref<56x2048xf32, #tpu.memory_space<vmem>>, vector<8x128xf32>,
    %250 = vector.extract_strided_slice %233 {offsets = [64, 0], sizes = [8, 128], strides = [1, 1]} : vector<128x128xf32> to vector<8x128xf32>
    %c32_257 = arith.constant 32 : index
    %c1024_258 = arith.constant 1024 : index
    %251 = vector.load %arg7[%c32_257, %c1024_258] : memref<56x2048xf32, #tpu.memory_space<vmem>>, vector<8x128xf32>
    tpu.vector_store %arg7[%c32_257, %c1024_258], %250 {strides = array<i32>} : memref<56x2048xf32, #tpu.memory_space<vmem>>, vector<8x128xf32>,
    %252 = vector.extract_strided_slice %233 {offsets = [72, 0], sizes = [8, 128], strides = [1, 1]} : vector<128x128xf32> to vector<8x128xf32>
    %c32_259 = arith.constant 32 : index
    %c1152_260 = arith.constant 1152 : index
    %253 = vector.load %arg7[%c32_259, %c1152_260] : memref<56x2048xf32, #tpu.memory_space<vmem>>, vector<8x128xf32>
    tpu.vector_store %arg7[%c32_259, %c1152_260], %252 {strides = array<i32>} : memref<56x2048xf32, #tpu.memory_space<vmem>>, vector<8x128xf32>,
    %254 = vector.extract_strided_slice %233 {offsets = [80, 0], sizes = [8, 128], strides = [1, 1]} : vector<128x128xf32> to vector<8x128xf32>
    %c32_261 = arith.constant 32 : index
    %c1280_262 = arith.constant 1280 : index
    %255 = vector.load %arg7[%c32_261, %c1280_262] : memref<56x2048xf32, #tpu.memory_space<vmem>>, vector<8x128xf32>
    tpu.vector_store %arg7[%c32_261, %c1280_262], %254 {strides = array<i32>} : memref<56x2048xf32, #tpu.memory_space<vmem>>, vector<8x128xf32>,
    %256 = vector.extract_strided_slice %233 {offsets = [88, 0], sizes = [8, 128], strides = [1, 1]} : vector<128x128xf32> to vector<8x128xf32>
    %c32_263 = arith.constant 32 : index
    %c1408_264 = arith.constant 1408 : index
    %257 = vector.load %arg7[%c32_263, %c1408_264] : memref<56x2048xf32, #tpu.memory_space<vmem>>, vector<8x128xf32>
    tpu.vector_store %arg7[%c32_263, %c1408_264], %256 {strides = array<i32>} : memref<56x2048xf32, #tpu.memory_space<vmem>>, vector<8x128xf32>,
    %258 = vector.extract_strided_slice %233 {offsets = [96, 0], sizes = [8, 128], strides = [1, 1]} : vector<128x128xf32> to vector<8x128xf32>
    %c32_265 = arith.constant 32 : index
    %c1536_266 = arith.constant 1536 : index
    %259 = vector.load %arg7[%c32_265, %c1536_266] : memref<56x2048xf32, #tpu.memory_space<vmem>>, vector<8x128xf32>
    tpu.vector_store %arg7[%c32_265, %c1536_266], %258 {strides = array<i32>} : memref<56x2048xf32, #tpu.memory_space<vmem>>, vector<8x128xf32>,
    %260 = vector.extract_strided_slice %233 {offsets = [104, 0], sizes = [8, 128], strides = [1, 1]} : vector<128x128xf32> to vector<8x128xf32>
    %c32_267 = arith.constant 32 : index
    %c1664_268 = arith.constant 1664 : index
    %261 = vector.load %arg7[%c32_267, %c1664_268] : memref<56x2048xf32, #tpu.memory_space<vmem>>, vector<8x128xf32>
    tpu.vector_store %arg7[%c32_267, %c1664_268], %260 {strides = array<i32>} : memref<56x2048xf32, #tpu.memory_space<vmem>>, vector<8x128xf32>,
    %262 = vector.extract_strided_slice %233 {offsets = [112, 0], sizes = [8, 128], strides = [1, 1]} : vector<128x128xf32> to vector<8x128xf32>
    %c32_269 = arith.constant 32 : index
    %c1792_270 = arith.constant 1792 : index
    %263 = vector.load %arg7[%c32_269, %c1792_270] : memref<56x2048xf32, #tpu.memory_space<vmem>>, vector<8x128xf32>
    tpu.vector_store %arg7[%c32_269, %c1792_270], %262 {strides = array<i32>} : memref<56x2048xf32, #tpu.memory_space<vmem>>, vector<8x128xf32>,
    %264 = vector.extract_strided_slice %233 {offsets = [120, 0], sizes = [8, 128], strides = [1, 1]} : vector<128x128xf32> to vector<8x128xf32>
    %c32_271 = arith.constant 32 : index
    %c1920_272 = arith.constant 1920 : index
    %265 = vector.load %arg7[%c32_271, %c1920_272] : memref<56x2048xf32, #tpu.memory_space<vmem>>, vector<8x128xf32>
    tpu.vector_store %arg7[%c32_271, %c1920_272], %264 {strides = array<i32>} : memref<56x2048xf32, #tpu.memory_space<vmem>>, vector<8x128xf32>,
    %266 = vector.extract_strided_slice %131 {offsets = [0, 256], sizes = [128, 128], strides = [1, 1]} : vector<128x384xf32> to vector<128x128xf32>
    %267 = vector.extract_strided_slice %266 {offsets = [0, 0], sizes = [8, 128], strides = [1, 1]} : vector<128x128xf32> to vector<8x128xf32>
    %c40 = arith.constant 40 : index
    %c0_273 = arith.constant 0 : index
    %268 = vector.load %arg7[%c40, %c0_273] : memref<56x2048xf32, #tpu.memory_space<vmem>>, vector<8x128xf32>
    tpu.vector_store %arg7[%c40, %c0_273], %267 {strides = array<i32>} : memref<56x2048xf32, #tpu.memory_space<vmem>>, vector<8x128xf32>,
    %269 = vector.extract_strided_slice %266 {offsets = [8, 0], sizes = [8, 128], strides = [1, 1]} : vector<128x128xf32> to vector<8x128xf32>
    %c40_274 = arith.constant 40 : index
    %c128_275 = arith.constant 128 : index
    %270 = vector.load %arg7[%c40_274, %c128_275] : memref<56x2048xf32, #tpu.memory_space<vmem>>, vector<8x128xf32>
    tpu.vector_store %arg7[%c40_274, %c128_275], %269 {strides = array<i32>} : memref<56x2048xf32, #tpu.memory_space<vmem>>, vector<8x128xf32>,
    %271 = vector.extract_strided_slice %266 {offsets = [16, 0], sizes = [8, 128], strides = [1, 1]} : vector<128x128xf32> to vector<8x128xf32>
    %c40_276 = arith.constant 40 : index
    %c256_277 = arith.constant 256 : index
    %272 = vector.load %arg7[%c40_276, %c256_277] : memref<56x2048xf32, #tpu.memory_space<vmem>>, vector<8x128xf32>
    tpu.vector_store %arg7[%c40_276, %c256_277], %271 {strides = array<i32>} : memref<56x2048xf32, #tpu.memory_space<vmem>>, vector<8x128xf32>,
    %273 = vector.extract_strided_slice %266 {offsets = [24, 0], sizes = [8, 128], strides = [1, 1]} : vector<128x128xf32> to vector<8x128xf32>
    %c40_278 = arith.constant 40 : index
    %c384_279 = arith.constant 384 : index
    %274 = vector.load %arg7[%c40_278, %c384_279] : memref<56x2048xf32, #tpu.memory_space<vmem>>, vector<8x128xf32>
    tpu.vector_store %arg7[%c40_278, %c384_279], %273 {strides = array<i32>} : memref<56x2048xf32, #tpu.memory_space<vmem>>, vector<8x128xf32>,
    %275 = vector.extract_strided_slice %266 {offsets = [32, 0], sizes = [8, 128], strides = [1, 1]} : vector<128x128xf32> to vector<8x128xf32>
    %c40_280 = arith.constant 40 : index
    %c512_281 = arith.constant 512 : index
    %276 = vector.load %arg7[%c40_280, %c512_281] : memref<56x2048xf32, #tpu.memory_space<vmem>>, vector<8x128xf32>
    tpu.vector_store %arg7[%c40_280, %c512_281], %275 {strides = array<i32>} : memref<56x2048xf32, #tpu.memory_space<vmem>>, vector<8x128xf32>,
    %277 = vector.extract_strided_slice %266 {offsets = [40, 0], sizes = [8, 128], strides = [1, 1]} : vector<128x128xf32> to vector<8x128xf32>
    %c40_282 = arith.constant 40 : index
    %c640_283 = arith.constant 640 : index
    %278 = vector.load %arg7[%c40_282, %c640_283] : memref<56x2048xf32, #tpu.memory_space<vmem>>, vector<8x128xf32>
    tpu.vector_store %arg7[%c40_282, %c640_283], %277 {strides = array<i32>} : memref<56x2048xf32, #tpu.memory_space<vmem>>, vector<8x128xf32>,
    %279 = vector.extract_strided_slice %266 {offsets = [48, 0], sizes = [8, 128], strides = [1, 1]} : vector<128x128xf32> to vector<8x128xf32>
    %c40_284 = arith.constant 40 : index
    %c768_285 = arith.constant 768 : index
    %280 = vector.load %arg7[%c40_284, %c768_285] : memref<56x2048xf32, #tpu.memory_space<vmem>>, vector<8x128xf32>
    tpu.vector_store %arg7[%c40_284, %c768_285], %279 {strides = array<i32>} : memref<56x2048xf32, #tpu.memory_space<vmem>>, vector<8x128xf32>,
    %281 = vector.extract_strided_slice %266 {offsets = [56, 0], sizes = [8, 128], strides = [1, 1]} : vector<128x128xf32> to vector<8x128xf32>
    %c40_286 = arith.constant 40 : index
    %c896_287 = arith.constant 896 : index
    %282 = vector.load %arg7[%c40_286, %c896_287] : memref<56x2048xf32, #tpu.memory_space<vmem>>, vector<8x128xf32>
    tpu.vector_store %arg7[%c40_286, %c896_287], %281 {strides = array<i32>} : memref<56x2048xf32, #tpu.memory_space<vmem>>, vector<8x128xf32>,
    %283 = vector.extract_strided_slice %266 {offsets = [64, 0], sizes = [8, 128], strides = [1, 1]} : vector<128x128xf32> to vector<8x128xf32>
    %c40_288 = arith.constant 40 : index
    %c1024_289 = arith.constant 1024 : index
    %284 = vector.load %arg7[%c40_288, %c1024_289] : memref<56x2048xf32, #tpu.memory_space<vmem>>, vector<8x128xf32>
    tpu.vector_store %arg7[%c40_288, %c1024_289], %283 {strides = array<i32>} : memref<56x2048xf32, #tpu.memory_space<vmem>>, vector<8x128xf32>,
    %285 = vector.extract_strided_slice %266 {offsets = [72, 0], sizes = [8, 128], strides = [1, 1]} : vector<128x128xf32> to vector<8x128xf32>
    %c40_290 = arith.constant 40 : index
    %c1152_291 = arith.constant 1152 : index
    %286 = vector.load %arg7[%c40_290, %c1152_291] : memref<56x2048xf32, #tpu.memory_space<vmem>>, vector<8x128xf32>
    tpu.vector_store %arg7[%c40_290, %c1152_291], %285 {strides = array<i32>} : memref<56x2048xf32, #tpu.memory_space<vmem>>, vector<8x128xf32>,
    %287 = vector.extract_strided_slice %266 {offsets = [80, 0], sizes = [8, 128], strides = [1, 1]} : vector<128x128xf32> to vector<8x128xf32>
    %c40_292 = arith.constant 40 : index
    %c1280_293 = arith.constant 1280 : index
    %288 = vector.load %arg7[%c40_292, %c1280_293] : memref<56x2048xf32, #tpu.memory_space<vmem>>, vector<8x128xf32>
    tpu.vector_store %arg7[%c40_292, %c1280_293], %287 {strides = array<i32>} : memref<56x2048xf32, #tpu.memory_space<vmem>>, vector<8x128xf32>,
    %289 = vector.extract_strided_slice %266 {offsets = [88, 0], sizes = [8, 128], strides = [1, 1]} : vector<128x128xf32> to vector<8x128xf32>
    %c40_294 = arith.constant 40 : index
    %c1408_295 = arith.constant 1408 : index
    %290 = vector.load %arg7[%c40_294, %c1408_295] : memref<56x2048xf32, #tpu.memory_space<vmem>>, vector<8x128xf32>
    tpu.vector_store %arg7[%c40_294, %c1408_295], %289 {strides = array<i32>} : memref<56x2048xf32, #tpu.memory_space<vmem>>, vector<8x128xf32>,
    %291 = vector.extract_strided_slice %266 {offsets = [96, 0], sizes = [8, 128], strides = [1, 1]} : vector<128x128xf32> to vector<8x128xf32>
    %c40_296 = arith.constant 40 : index
    %c1536_297 = arith.constant 1536 : index
    %292 = vector.load %arg7[%c40_296, %c1536_297] : memref<56x2048xf32, #tpu.memory_space<vmem>>, vector<8x128xf32>
    tpu.vector_store %arg7[%c40_296, %c1536_297], %291 {strides = array<i32>} : memref<56x2048xf32, #tpu.memory_space<vmem>>, vector<8x128xf32>,
    %293 = vector.extract_strided_slice %266 {offsets = [104, 0], sizes = [8, 128], strides = [1, 1]} : vector<128x128xf32> to vector<8x128xf32>
    %c40_298 = arith.constant 40 : index
    %c1664_299 = arith.constant 1664 : index
    %294 = vector.load %arg7[%c40_298, %c1664_299] : memref<56x2048xf32, #tpu.memory_space<vmem>>, vector<8x128xf32>
    tpu.vector_store %arg7[%c40_298, %c1664_299], %293 {strides = array<i32>} : memref<56x2048xf32, #tpu.memory_space<vmem>>, vector<8x128xf32>,
    %295 = vector.extract_strided_slice %266 {offsets = [112, 0], sizes = [8, 128], strides = [1, 1]} : vector<128x128xf32> to vector<8x128xf32>
    %c40_300 = arith.constant 40 : index
    %c1792_301 = arith.constant 1792 : index
    %296 = vector.load %arg7[%c40_300, %c1792_301] : memref<56x2048xf32, #tpu.memory_space<vmem>>, vector<8x128xf32>
    tpu.vector_store %arg7[%c40_300, %c1792_301], %295 {strides = array<i32>} : memref<56x2048xf32, #tpu.memory_space<vmem>>, vector<8x128xf32>,
    %297 = vector.extract_strided_slice %266 {offsets = [120, 0], sizes = [8, 128], strides = [1, 1]} : vector<128x128xf32> to vector<8x128xf32>
    %c40_302 = arith.constant 40 : index
    %c1920_303 = arith.constant 1920 : index
    %298 = vector.load %arg7[%c40_302, %c1920_303] : memref<56x2048xf32, #tpu.memory_space<vmem>>, vector<8x128xf32>
    tpu.vector_store %arg7[%c40_302, %c1920_303], %297 {strides = array<i32>} : memref<56x2048xf32, #tpu.memory_space<vmem>>, vector<8x128xf32>,
    %c0_304 = arith.constant 0 : index
    %c256_305 = arith.constant 256 : index
    %299 = vector.load %arg2[%c0_304, %c256_305] : memref<128x384xf32, #tpu.memory_space<vmem>>, vector<128x128xf32>
    %cst_306 = arith.constant dense<0.000000e+00> : vector<128x128xf32>
    %300 = tpu.matmul %266, %299, %cst_306 {dimension_numbers = #tpu.dot_dimension_numbers<[1], [0], [0], [1], [0, 0, 1, 1], [], []>} : vector<128x128xf32>, vector<128x128xf32>, vector<128x128xf32> -> vector<128x128xf32>
    %301 = vector.extract_strided_slice %300 {offsets = [0, 0], sizes = [8, 128], strides = [1, 1]} : vector<128x128xf32> to vector<8x128xf32>
    %c48 = arith.constant 48 : index
    %c0_307 = arith.constant 0 : index
    %302 = vector.load %arg7[%c48, %c0_307] : memref<56x2048xf32, #tpu.memory_space<vmem>>, vector<8x128xf32>
    tpu.vector_store %arg7[%c48, %c0_307], %301 {strides = array<i32>} : memref<56x2048xf32, #tpu.memory_space<vmem>>, vector<8x128xf32>,
    %303 = vector.extract_strided_slice %300 {offsets = [8, 0], sizes = [8, 128], strides = [1, 1]} : vector<128x128xf32> to vector<8x128xf32>
    %c48_308 = arith.constant 48 : index
    %c128_309 = arith.constant 128 : index
    %304 = vector.load %arg7[%c48_308, %c128_309] : memref<56x2048xf32, #tpu.memory_space<vmem>>, vector<8x128xf32>
    tpu.vector_store %arg7[%c48_308, %c128_309], %303 {strides = array<i32>} : memref<56x2048xf32, #tpu.memory_space<vmem>>, vector<8x128xf32>,
    %305 = vector.extract_strided_slice %300 {offsets = [16, 0], sizes = [8, 128], strides = [1, 1]} : vector<128x128xf32> to vector<8x128xf32>
    %c48_310 = arith.constant 48 : index
    %c256_311 = arith.constant 256 : index
    %306 = vector.load %arg7[%c48_310, %c256_311] : memref<56x2048xf32, #tpu.memory_space<vmem>>, vector<8x128xf32>
    tpu.vector_store %arg7[%c48_310, %c256_311], %305 {strides = array<i32>} : memref<56x2048xf32, #tpu.memory_space<vmem>>, vector<8x128xf32>,
    %307 = vector.extract_strided_slice %300 {offsets = [24, 0], sizes = [8, 128], strides = [1, 1]} : vector<128x128xf32> to vector<8x128xf32>
    %c48_312 = arith.constant 48 : index
    %c384_313 = arith.constant 384 : index
    %308 = vector.load %arg7[%c48_312, %c384_313] : memref<56x2048xf32, #tpu.memory_space<vmem>>, vector<8x128xf32>
    tpu.vector_store %arg7[%c48_312, %c384_313], %307 {strides = array<i32>} : memref<56x2048xf32, #tpu.memory_space<vmem>>, vector<8x128xf32>,
    %309 = vector.extract_strided_slice %300 {offsets = [32, 0], sizes = [8, 128], strides = [1, 1]} : vector<128x128xf32> to vector<8x128xf32>
    %c48_314 = arith.constant 48 : index
    %c512_315 = arith.constant 512 : index
    %310 = vector.load %arg7[%c48_314, %c512_315] : memref<56x2048xf32, #tpu.memory_space<vmem>>, vector<8x128xf32>
    tpu.vector_store %arg7[%c48_314, %c512_315], %309 {strides = array<i32>} : memref<56x2048xf32, #tpu.memory_space<vmem>>, vector<8x128xf32>,
    %311 = vector.extract_strided_slice %300 {offsets = [40, 0], sizes = [8, 128], strides = [1, 1]} : vector<128x128xf32> to vector<8x128xf32>
    %c48_316 = arith.constant 48 : index
    %c640_317 = arith.constant 640 : index
    %312 = vector.load %arg7[%c48_316, %c640_317] : memref<56x2048xf32, #tpu.memory_space<vmem>>, vector<8x128xf32>
    tpu.vector_store %arg7[%c48_316, %c640_317], %311 {strides = array<i32>} : memref<56x2048xf32, #tpu.memory_space<vmem>>, vector<8x128xf32>,
    %313 = vector.extract_strided_slice %300 {offsets = [48, 0], sizes = [8, 128], strides = [1, 1]} : vector<128x128xf32> to vector<8x128xf32>
    %c48_318 = arith.constant 48 : index
    %c768_319 = arith.constant 768 : index
    %314 = vector.load %arg7[%c48_318, %c768_319] : memref<56x2048xf32, #tpu.memory_space<vmem>>, vector<8x128xf32>
    tpu.vector_store %arg7[%c48_318, %c768_319], %313 {strides = array<i32>} : memref<56x2048xf32, #tpu.memory_space<vmem>>, vector<8x128xf32>,
    %315 = vector.extract_strided_slice %300 {offsets = [56, 0], sizes = [8, 128], strides = [1, 1]} : vector<128x128xf32> to vector<8x128xf32>
    %c48_320 = arith.constant 48 : index
    %c896_321 = arith.constant 896 : index
    %316 = vector.load %arg7[%c48_320, %c896_321] : memref<56x2048xf32, #tpu.memory_space<vmem>>, vector<8x128xf32>
    tpu.vector_store %arg7[%c48_320, %c896_321], %315 {strides = array<i32>} : memref<56x2048xf32, #tpu.memory_space<vmem>>, vector<8x128xf32>,
    %317 = vector.extract_strided_slice %300 {offsets = [64, 0], sizes = [8, 128], strides = [1, 1]} : vector<128x128xf32> to vector<8x128xf32>
    %c48_322 = arith.constant 48 : index
    %c1024_323 = arith.constant 1024 : index
    %318 = vector.load %arg7[%c48_322, %c1024_323] : memref<56x2048xf32, #tpu.memory_space<vmem>>, vector<8x128xf32>
    tpu.vector_store %arg7[%c48_322, %c1024_323], %317 {strides = array<i32>} : memref<56x2048xf32, #tpu.memory_space<vmem>>, vector<8x128xf32>,
    %319 = vector.extract_strided_slice %300 {offsets = [72, 0], sizes = [8, 128], strides = [1, 1]} : vector<128x128xf32> to vector<8x128xf32>
    %c48_324 = arith.constant 48 : index
    %c1152_325 = arith.constant 1152 : index
    %320 = vector.load %arg7[%c48_324, %c1152_325] : memref<56x2048xf32, #tpu.memory_space<vmem>>, vector<8x128xf32>
    tpu.vector_store %arg7[%c48_324, %c1152_325], %319 {strides = array<i32>} : memref<56x2048xf32, #tpu.memory_space<vmem>>, vector<8x128xf32>,
    %321 = vector.extract_strided_slice %300 {offsets = [80, 0], sizes = [8, 128], strides = [1, 1]} : vector<128x128xf32> to vector<8x128xf32>
    %c48_326 = arith.constant 48 : index
    %c1280_327 = arith.constant 1280 : index
    %322 = vector.load %arg7[%c48_326, %c1280_327] : memref<56x2048xf32, #tpu.memory_space<vmem>>, vector<8x128xf32>
    tpu.vector_store %arg7[%c48_326, %c1280_327], %321 {strides = array<i32>} : memref<56x2048xf32, #tpu.memory_space<vmem>>, vector<8x128xf32>,
    %323 = vector.extract_strided_slice %300 {offsets = [88, 0], sizes = [8, 128], strides = [1, 1]} : vector<128x128xf32> to vector<8x128xf32>
    %c48_328 = arith.constant 48 : index
    %c1408_329 = arith.constant 1408 : index
    %324 = vector.load %arg7[%c48_328, %c1408_329] : memref<56x2048xf32, #tpu.memory_space<vmem>>, vector<8x128xf32>
    tpu.vector_store %arg7[%c48_328, %c1408_329], %323 {strides = array<i32>} : memref<56x2048xf32, #tpu.memory_space<vmem>>, vector<8x128xf32>,
    %325 = vector.extract_strided_slice %300 {offsets = [96, 0], sizes = [8, 128], strides = [1, 1]} : vector<128x128xf32> to vector<8x128xf32>
    %c48_330 = arith.constant 48 : index
    %c1536_331 = arith.constant 1536 : index
    %326 = vector.load %arg7[%c48_330, %c1536_331] : memref<56x2048xf32, #tpu.memory_space<vmem>>, vector<8x128xf32>
    tpu.vector_store %arg7[%c48_330, %c1536_331], %325 {strides = array<i32>} : memref<56x2048xf32, #tpu.memory_space<vmem>>, vector<8x128xf32>,
    %327 = vector.extract_strided_slice %300 {offsets = [104, 0], sizes = [8, 128], strides = [1, 1]} : vector<128x128xf32> to vector<8x128xf32>
    %c48_332 = arith.constant 48 : index
    %c1664_333 = arith.constant 1664 : index
    %328 = vector.load %arg7[%c48_332, %c1664_333] : memref<56x2048xf32, #tpu.memory_space<vmem>>, vector<8x128xf32>
    tpu.vector_store %arg7[%c48_332, %c1664_333], %327 {strides = array<i32>} : memref<56x2048xf32, #tpu.memory_space<vmem>>, vector<8x128xf32>,
    %329 = vector.extract_strided_slice %300 {offsets = [112, 0], sizes = [8, 128], strides = [1, 1]} : vector<128x128xf32> to vector<8x128xf32>
    %c48_334 = arith.constant 48 : index
    %c1792_335 = arith.constant 1792 : index
    %330 = vector.load %arg7[%c48_334, %c1792_335] : memref<56x2048xf32, #tpu.memory_space<vmem>>, vector<8x128xf32>
    tpu.vector_store %arg7[%c48_334, %c1792_335], %329 {strides = array<i32>} : memref<56x2048xf32, #tpu.memory_space<vmem>>, vector<8x128xf32>,
    %331 = vector.extract_strided_slice %300 {offsets = [120, 0], sizes = [8, 128], strides = [1, 1]} : vector<128x128xf32> to vector<8x128xf32>
    %c48_336 = arith.constant 48 : index
    %c1920_337 = arith.constant 1920 : index
    %332 = vector.load %arg7[%c48_336, %c1920_337] : memref<56x2048xf32, #tpu.memory_space<vmem>>, vector<8x128xf32>
    tpu.vector_store %arg7[%c48_336, %c1920_337], %331 {strides = array<i32>} : memref<56x2048xf32, #tpu.memory_space<vmem>>, vector<8x128xf32>,
    %c0_338 = arith.constant 0 : index
    %c0_339 = arith.constant 0 : index
    %333 = vector.load %arg3[%c0_338, %c0_339] : memref<8x56xf32, #tpu.memory_space<vmem>>, vector<8x56xf32>
    %c0_340 = arith.constant 0 : index
    %c0_341 = arith.constant 0 : index
    %334 = vector.load %arg7[%c0_340, %c0_341] : memref<56x2048xf32, #tpu.memory_space<vmem>>, vector<56x2048xf32>
    %cst_342 = arith.constant dense<0.000000e+00> : vector<8x2048xf32>
    %335 = tpu.matmul %333, %334, %cst_342 {dimension_numbers = #tpu.dot_dimension_numbers<[1], [0], [0], [1], [0, 0, 1, 1], [], []>} : vector<8x56xf32>, vector<56x2048xf32>, vector<8x2048xf32> -> vector<8x2048xf32>
    %c0_343 = arith.constant 0 : index
    %c0_344 = arith.constant 0 : index
    %336 = vector.load %arg4[%c0_343, %c0_344] : memref<8x1xf32, #tpu.memory_space<vmem>>, vector<8x1xf32>
    %337 = vector.broadcast %336 : vector<8x1xf32> to vector<8x2048xf32>
    %338 = arith.addf %335, %337 : vector<8x2048xf32>
    %339 = vector.extract_strided_slice %338 {offsets = [0, 0], sizes = [8, 128], strides = [1, 1]} : vector<8x2048xf32> to vector<8x128xf32>
    %c0_345 = arith.constant 0 : index
    %c0_346 = arith.constant 0 : index
    %c0_347 = arith.constant 0 : index
    %c0_348 = arith.constant 0 : index
    %340 = vector.load %arg8[%c0_345, %c0_346, %c0_347, %c0_348] : memref<2x8x8x128xf32, #tpu.memory_space<vmem>>, vector<1x8x1x128xf32>
    %341 = vector.shape_cast %340 : vector<1x8x1x128xf32> to vector<8x128xf32>
    %342 = vector.shape_cast %339 : vector<8x128xf32> to vector<1x8x1x128xf32>
    tpu.vector_store %arg8[%c0_345, %c0_346, %c0_347, %c0_348], %342 {strides = array<i32>} : memref<2x8x8x128xf32, #tpu.memory_space<vmem>>, vector<1x8x1x128xf32>,
    %343 = vector.extract_strided_slice %338 {offsets = [0, 128], sizes = [8, 128], strides = [1, 1]} : vector<8x2048xf32> to vector<8x128xf32>
    %c0_349 = arith.constant 0 : index
    %c0_350 = arith.constant 0 : index
    %c1_351 = arith.constant 1 : index
    %c0_352 = arith.constant 0 : index
    %344 = vector.load %arg8[%c0_349, %c0_350, %c1_351, %c0_352] : memref<2x8x8x128xf32, #tpu.memory_space<vmem>>, vector<1x8x1x128xf32>
    %345 = vector.shape_cast %344 : vector<1x8x1x128xf32> to vector<8x128xf32>
    %346 = vector.shape_cast %343 : vector<8x128xf32> to vector<1x8x1x128xf32>
    tpu.vector_store %arg8[%c0_349, %c0_350, %c1_351, %c0_352], %346 {strides = array<i32>} : memref<2x8x8x128xf32, #tpu.memory_space<vmem>>, vector<1x8x1x128xf32>,
    %347 = vector.extract_strided_slice %338 {offsets = [0, 256], sizes = [8, 128], strides = [1, 1]} : vector<8x2048xf32> to vector<8x128xf32>
    %c0_353 = arith.constant 0 : index
    %c0_354 = arith.constant 0 : index
    %c2_355 = arith.constant 2 : index
    %c0_356 = arith.constant 0 : index
    %348 = vector.load %arg8[%c0_353, %c0_354, %c2_355, %c0_356] : memref<2x8x8x128xf32, #tpu.memory_space<vmem>>, vector<1x8x1x128xf32>
    %349 = vector.shape_cast %348 : vector<1x8x1x128xf32> to vector<8x128xf32>
    %350 = vector.shape_cast %347 : vector<8x128xf32> to vector<1x8x1x128xf32>
    tpu.vector_store %arg8[%c0_353, %c0_354, %c2_355, %c0_356], %350 {strides = array<i32>} : memref<2x8x8x128xf32, #tpu.memory_space<vmem>>, vector<1x8x1x128xf32>,
    %351 = vector.extract_strided_slice %338 {offsets = [0, 384], sizes = [8, 128], strides = [1, 1]} : vector<8x2048xf32> to vector<8x128xf32>
    %c0_357 = arith.constant 0 : index
    %c0_358 = arith.constant 0 : index
    %c3_359 = arith.constant 3 : index
    %c0_360 = arith.constant 0 : index
    %352 = vector.load %arg8[%c0_357, %c0_358, %c3_359, %c0_360] : memref<2x8x8x128xf32, #tpu.memory_space<vmem>>, vector<1x8x1x128xf32>
    %353 = vector.shape_cast %352 : vector<1x8x1x128xf32> to vector<8x128xf32>
    %354 = vector.shape_cast %351 : vector<8x128xf32> to vector<1x8x1x128xf32>
    tpu.vector_store %arg8[%c0_357, %c0_358, %c3_359, %c0_360], %354 {strides = array<i32>} : memref<2x8x8x128xf32, #tpu.memory_space<vmem>>, vector<1x8x1x128xf32>,
    %355 = vector.extract_strided_slice %338 {offsets = [0, 512], sizes = [8, 128], strides = [1, 1]} : vector<8x2048xf32> to vector<8x128xf32>
    %c0_361 = arith.constant 0 : index
    %c0_362 = arith.constant 0 : index
    %c4_363 = arith.constant 4 : index
    %c0_364 = arith.constant 0 : index
    %356 = vector.load %arg8[%c0_361, %c0_362, %c4_363, %c0_364] : memref<2x8x8x128xf32, #tpu.memory_space<vmem>>, vector<1x8x1x128xf32>
    %357 = vector.shape_cast %356 : vector<1x8x1x128xf32> to vector<8x128xf32>
    %358 = vector.shape_cast %355 : vector<8x128xf32> to vector<1x8x1x128xf32>
    tpu.vector_store %arg8[%c0_361, %c0_362, %c4_363, %c0_364], %358 {strides = array<i32>} : memref<2x8x8x128xf32, #tpu.memory_space<vmem>>, vector<1x8x1x128xf32>,
    %359 = vector.extract_strided_slice %338 {offsets = [0, 640], sizes = [8, 128], strides = [1, 1]} : vector<8x2048xf32> to vector<8x128xf32>
    %c0_365 = arith.constant 0 : index
    %c0_366 = arith.constant 0 : index
    %c5_367 = arith.constant 5 : index
    %c0_368 = arith.constant 0 : index
    %360 = vector.load %arg8[%c0_365, %c0_366, %c5_367, %c0_368] : memref<2x8x8x128xf32, #tpu.memory_space<vmem>>, vector<1x8x1x128xf32>
    %361 = vector.shape_cast %360 : vector<1x8x1x128xf32> to vector<8x128xf32>
    %362 = vector.shape_cast %359 : vector<8x128xf32> to vector<1x8x1x128xf32>
    tpu.vector_store %arg8[%c0_365, %c0_366, %c5_367, %c0_368], %362 {strides = array<i32>} : memref<2x8x8x128xf32, #tpu.memory_space<vmem>>, vector<1x8x1x128xf32>,
    %363 = vector.extract_strided_slice %338 {offsets = [0, 768], sizes = [8, 128], strides = [1, 1]} : vector<8x2048xf32> to vector<8x128xf32>
    %c0_369 = arith.constant 0 : index
    %c0_370 = arith.constant 0 : index
    %c6_371 = arith.constant 6 : index
    %c0_372 = arith.constant 0 : index
    %364 = vector.load %arg8[%c0_369, %c0_370, %c6_371, %c0_372] : memref<2x8x8x128xf32, #tpu.memory_space<vmem>>, vector<1x8x1x128xf32>
    %365 = vector.shape_cast %364 : vector<1x8x1x128xf32> to vector<8x128xf32>
    %366 = vector.shape_cast %363 : vector<8x128xf32> to vector<1x8x1x128xf32>
    tpu.vector_store %arg8[%c0_369, %c0_370, %c6_371, %c0_372], %366 {strides = array<i32>} : memref<2x8x8x128xf32, #tpu.memory_space<vmem>>, vector<1x8x1x128xf32>,
    %367 = vector.extract_strided_slice %338 {offsets = [0, 896], sizes = [8, 128], strides = [1, 1]} : vector<8x2048xf32> to vector<8x128xf32>
    %c0_373 = arith.constant 0 : index
    %c0_374 = arith.constant 0 : index
    %c7_375 = arith.constant 7 : index
    %c0_376 = arith.constant 0 : index
    %368 = vector.load %arg8[%c0_373, %c0_374, %c7_375, %c0_376] : memref<2x8x8x128xf32, #tpu.memory_space<vmem>>, vector<1x8x1x128xf32>
    %369 = vector.shape_cast %368 : vector<1x8x1x128xf32> to vector<8x128xf32>
    %370 = vector.shape_cast %367 : vector<8x128xf32> to vector<1x8x1x128xf32>
    tpu.vector_store %arg8[%c0_373, %c0_374, %c7_375, %c0_376], %370 {strides = array<i32>} : memref<2x8x8x128xf32, #tpu.memory_space<vmem>>, vector<1x8x1x128xf32>,
    %371 = vector.extract_strided_slice %338 {offsets = [0, 1024], sizes = [8, 128], strides = [1, 1]} : vector<8x2048xf32> to vector<8x128xf32>
    %c1_377 = arith.constant 1 : index
    %c0_378 = arith.constant 0 : index
    %c0_379 = arith.constant 0 : index
    %c0_380 = arith.constant 0 : index
    %372 = vector.load %arg8[%c1_377, %c0_378, %c0_379, %c0_380] : memref<2x8x8x128xf32, #tpu.memory_space<vmem>>, vector<1x8x1x128xf32>
    %373 = vector.shape_cast %372 : vector<1x8x1x128xf32> to vector<8x128xf32>
    %374 = vector.shape_cast %371 : vector<8x128xf32> to vector<1x8x1x128xf32>
    tpu.vector_store %arg8[%c1_377, %c0_378, %c0_379, %c0_380], %374 {strides = array<i32>} : memref<2x8x8x128xf32, #tpu.memory_space<vmem>>, vector<1x8x1x128xf32>,
    %375 = vector.extract_strided_slice %338 {offsets = [0, 1152], sizes = [8, 128], strides = [1, 1]} : vector<8x2048xf32> to vector<8x128xf32>
    %c1_381 = arith.constant 1 : index
    %c0_382 = arith.constant 0 : index
    %c1_383 = arith.constant 1 : index
    %c0_384 = arith.constant 0 : index
    %376 = vector.load %arg8[%c1_381, %c0_382, %c1_383, %c0_384] : memref<2x8x8x128xf32, #tpu.memory_space<vmem>>, vector<1x8x1x128xf32>
    %377 = vector.shape_cast %376 : vector<1x8x1x128xf32> to vector<8x128xf32>
    %378 = vector.shape_cast %375 : vector<8x128xf32> to vector<1x8x1x128xf32>
    tpu.vector_store %arg8[%c1_381, %c0_382, %c1_383, %c0_384], %378 {strides = array<i32>} : memref<2x8x8x128xf32, #tpu.memory_space<vmem>>, vector<1x8x1x128xf32>,
    %379 = vector.extract_strided_slice %338 {offsets = [0, 1280], sizes = [8, 128], strides = [1, 1]} : vector<8x2048xf32> to vector<8x128xf32>
    %c1_385 = arith.constant 1 : index
    %c0_386 = arith.constant 0 : index
    %c2_387 = arith.constant 2 : index
    %c0_388 = arith.constant 0 : index
    %380 = vector.load %arg8[%c1_385, %c0_386, %c2_387, %c0_388] : memref<2x8x8x128xf32, #tpu.memory_space<vmem>>, vector<1x8x1x128xf32>
    %381 = vector.shape_cast %380 : vector<1x8x1x128xf32> to vector<8x128xf32>
    %382 = vector.shape_cast %379 : vector<8x128xf32> to vector<1x8x1x128xf32>
    tpu.vector_store %arg8[%c1_385, %c0_386, %c2_387, %c0_388], %382 {strides = array<i32>} : memref<2x8x8x128xf32, #tpu.memory_space<vmem>>, vector<1x8x1x128xf32>,
    %383 = vector.extract_strided_slice %338 {offsets = [0, 1408], sizes = [8, 128], strides = [1, 1]} : vector<8x2048xf32> to vector<8x128xf32>
    %c1_389 = arith.constant 1 : index
    %c0_390 = arith.constant 0 : index
    %c3_391 = arith.constant 3 : index
    %c0_392 = arith.constant 0 : index
    %384 = vector.load %arg8[%c1_389, %c0_390, %c3_391, %c0_392] : memref<2x8x8x128xf32, #tpu.memory_space<vmem>>, vector<1x8x1x128xf32>
    %385 = vector.shape_cast %384 : vector<1x8x1x128xf32> to vector<8x128xf32>
    %386 = vector.shape_cast %383 : vector<8x128xf32> to vector<1x8x1x128xf32>
    tpu.vector_store %arg8[%c1_389, %c0_390, %c3_391, %c0_392], %386 {strides = array<i32>} : memref<2x8x8x128xf32, #tpu.memory_space<vmem>>, vector<1x8x1x128xf32>,
    %387 = vector.extract_strided_slice %338 {offsets = [0, 1536], sizes = [8, 128], strides = [1, 1]} : vector<8x2048xf32> to vector<8x128xf32>
    %c1_393 = arith.constant 1 : index
    %c0_394 = arith.constant 0 : index
    %c4_395 = arith.constant 4 : index
    %c0_396 = arith.constant 0 : index
    %388 = vector.load %arg8[%c1_393, %c0_394, %c4_395, %c0_396] : memref<2x8x8x128xf32, #tpu.memory_space<vmem>>, vector<1x8x1x128xf32>
    %389 = vector.shape_cast %388 : vector<1x8x1x128xf32> to vector<8x128xf32>
    %390 = vector.shape_cast %387 : vector<8x128xf32> to vector<1x8x1x128xf32>
    tpu.vector_store %arg8[%c1_393, %c0_394, %c4_395, %c0_396], %390 {strides = array<i32>} : memref<2x8x8x128xf32, #tpu.memory_space<vmem>>, vector<1x8x1x128xf32>,
    %391 = vector.extract_strided_slice %338 {offsets = [0, 1664], sizes = [8, 128], strides = [1, 1]} : vector<8x2048xf32> to vector<8x128xf32>
    %c1_397 = arith.constant 1 : index
    %c0_398 = arith.constant 0 : index
    %c5_399 = arith.constant 5 : index
    %c0_400 = arith.constant 0 : index
    %392 = vector.load %arg8[%c1_397, %c0_398, %c5_399, %c0_400] : memref<2x8x8x128xf32, #tpu.memory_space<vmem>>, vector<1x8x1x128xf32>
    %393 = vector.shape_cast %392 : vector<1x8x1x128xf32> to vector<8x128xf32>
    %394 = vector.shape_cast %391 : vector<8x128xf32> to vector<1x8x1x128xf32>
    tpu.vector_store %arg8[%c1_397, %c0_398, %c5_399, %c0_400], %394 {strides = array<i32>} : memref<2x8x8x128xf32, #tpu.memory_space<vmem>>, vector<1x8x1x128xf32>,
    %395 = vector.extract_strided_slice %338 {offsets = [0, 1792], sizes = [8, 128], strides = [1, 1]} : vector<8x2048xf32> to vector<8x128xf32>
    %c1_401 = arith.constant 1 : index
    %c0_402 = arith.constant 0 : index
    %c6_403 = arith.constant 6 : index
    %c0_404 = arith.constant 0 : index
    %396 = vector.load %arg8[%c1_401, %c0_402, %c6_403, %c0_404] : memref<2x8x8x128xf32, #tpu.memory_space<vmem>>, vector<1x8x1x128xf32>
    %397 = vector.shape_cast %396 : vector<1x8x1x128xf32> to vector<8x128xf32>
    %398 = vector.shape_cast %395 : vector<8x128xf32> to vector<1x8x1x128xf32>
    tpu.vector_store %arg8[%c1_401, %c0_402, %c6_403, %c0_404], %398 {strides = array<i32>} : memref<2x8x8x128xf32, #tpu.memory_space<vmem>>, vector<1x8x1x128xf32>,
    %399 = vector.extract_strided_slice %338 {offsets = [0, 1920], sizes = [8, 128], strides = [1, 1]} : vector<8x2048xf32> to vector<8x128xf32>
    %c1_405 = arith.constant 1 : index
    %c0_406 = arith.constant 0 : index
    %c7_407 = arith.constant 7 : index
    %c0_408 = arith.constant 0 : index
    %400 = vector.load %arg8[%c1_405, %c0_406, %c7_407, %c0_408] : memref<2x8x8x128xf32, #tpu.memory_space<vmem>>, vector<1x8x1x128xf32>
    %401 = vector.shape_cast %400 : vector<1x8x1x128xf32> to vector<8x128xf32>
    %402 = vector.shape_cast %399 : vector<8x128xf32> to vector<1x8x1x128xf32>
    tpu.vector_store %arg8[%c1_405, %c0_406, %c7_407, %c0_408], %402 {strides = array<i32>} : memref<2x8x8x128xf32, #tpu.memory_space<vmem>>, vector<1x8x1x128xf32>,
    %c0_409 = arith.constant 0 : index
    %c0_410 = arith.constant 0 : index
    %c0_411 = arith.constant 0 : index
    %c0_412 = arith.constant 0 : index
    %403 = vector.load %arg8[%c0_409, %c0_410, %c0_411, %c0_412] : memref<2x8x8x128xf32, #tpu.memory_space<vmem>>, vector<1x1x8x128xf32>
    %404 = vector.shape_cast %403 : vector<1x1x8x128xf32> to vector<8x128xf32>
    %405 = tpu.transpose %404, [1, 0] : vector<8x128xf32> -> vector<128x8xf32>
    %c0_413 = arith.constant 0 : index
    %c0_414 = arith.constant 0 : index
    %c0_415 = arith.constant 0 : index
    %c0_416 = arith.constant 0 : index
    %406 = vector.load %arg5[%c0_413, %c0_414, %c0_415, %c0_416] : memref<2x8x128x8xf32, #tpu.memory_space<vmem>>, vector<1x1x128x8xf32>
    %407 = vector.shape_cast %406 : vector<1x1x128x8xf32> to vector<128x8xf32>
    %408 = vector.shape_cast %405 : vector<128x8xf32> to vector<1x1x128x8xf32>
    tpu.vector_store %arg5[%c0_413, %c0_414, %c0_415, %c0_416], %408 {strides = array<i32>} : memref<2x8x128x8xf32, #tpu.memory_space<vmem>>, vector<1x1x128x8xf32>,
    %c0_417 = arith.constant 0 : index
    %c1_418 = arith.constant 1 : index
    %c0_419 = arith.constant 0 : index
    %c0_420 = arith.constant 0 : index
    %409 = vector.load %arg8[%c0_417, %c1_418, %c0_419, %c0_420] : memref<2x8x8x128xf32, #tpu.memory_space<vmem>>, vector<1x1x8x128xf32>
    %410 = vector.shape_cast %409 : vector<1x1x8x128xf32> to vector<8x128xf32>
    %411 = tpu.transpose %410, [1, 0] : vector<8x128xf32> -> vector<128x8xf32>
    %c0_421 = arith.constant 0 : index
    %c1_422 = arith.constant 1 : index
    %c0_423 = arith.constant 0 : index
    %c0_424 = arith.constant 0 : index
    %412 = vector.load %arg5[%c0_421, %c1_422, %c0_423, %c0_424] : memref<2x8x128x8xf32, #tpu.memory_space<vmem>>, vector<1x1x128x8xf32>
    %413 = vector.shape_cast %412 : vector<1x1x128x8xf32> to vector<128x8xf32>
    %414 = vector.shape_cast %411 : vector<128x8xf32> to vector<1x1x128x8xf32>
    tpu.vector_store %arg5[%c0_421, %c1_422, %c0_423, %c0_424], %414 {strides = array<i32>} : memref<2x8x128x8xf32, #tpu.memory_space<vmem>>, vector<1x1x128x8xf32>,
    %c0_425 = arith.constant 0 : index
    %c2_426 = arith.constant 2 : index
    %c0_427 = arith.constant 0 : index
    %c0_428 = arith.constant 0 : index
    %415 = vector.load %arg8[%c0_425, %c2_426, %c0_427, %c0_428] : memref<2x8x8x128xf32, #tpu.memory_space<vmem>>, vector<1x1x8x128xf32>
    %416 = vector.shape_cast %415 : vector<1x1x8x128xf32> to vector<8x128xf32>
    %417 = tpu.transpose %416, [1, 0] : vector<8x128xf32> -> vector<128x8xf32>
    %c0_429 = arith.constant 0 : index
    %c2_430 = arith.constant 2 : index
    %c0_431 = arith.constant 0 : index
    %c0_432 = arith.constant 0 : index
    %418 = vector.load %arg5[%c0_429, %c2_430, %c0_431, %c0_432] : memref<2x8x128x8xf32, #tpu.memory_space<vmem>>, vector<1x1x128x8xf32>
    %419 = vector.shape_cast %418 : vector<1x1x128x8xf32> to vector<128x8xf32>
    %420 = vector.shape_cast %417 : vector<128x8xf32> to vector<1x1x128x8xf32>
    tpu.vector_store %arg5[%c0_429, %c2_430, %c0_431, %c0_432], %420 {strides = array<i32>} : memref<2x8x128x8xf32, #tpu.memory_space<vmem>>, vector<1x1x128x8xf32>,
    %c0_433 = arith.constant 0 : index
    %c3_434 = arith.constant 3 : index
    %c0_435 = arith.constant 0 : index
    %c0_436 = arith.constant 0 : index
    %421 = vector.load %arg8[%c0_433, %c3_434, %c0_435, %c0_436] : memref<2x8x8x128xf32, #tpu.memory_space<vmem>>, vector<1x1x8x128xf32>
    %422 = vector.shape_cast %421 : vector<1x1x8x128xf32> to vector<8x128xf32>
    %423 = tpu.transpose %422, [1, 0] : vector<8x128xf32> -> vector<128x8xf32>
    %c0_437 = arith.constant 0 : index
    %c3_438 = arith.constant 3 : index
    %c0_439 = arith.constant 0 : index
    %c0_440 = arith.constant 0 : index
    %424 = vector.load %arg5[%c0_437, %c3_438, %c0_439, %c0_440] : memref<2x8x128x8xf32, #tpu.memory_space<vmem>>, vector<1x1x128x8xf32>
    %425 = vector.shape_cast %424 : vector<1x1x128x8xf32> to vector<128x8xf32>
    %426 = vector.shape_cast %423 : vector<128x8xf32> to vector<1x1x128x8xf32>
    tpu.vector_store %arg5[%c0_437, %c3_438, %c0_439, %c0_440], %426 {strides = array<i32>} : memref<2x8x128x8xf32, #tpu.memory_space<vmem>>, vector<1x1x128x8xf32>,
    %c0_441 = arith.constant 0 : index
    %c4_442 = arith.constant 4 : index
    %c0_443 = arith.constant 0 : index
    %c0_444 = arith.constant 0 : index
    %427 = vector.load %arg8[%c0_441, %c4_442, %c0_443, %c0_444] : memref<2x8x8x128xf32, #tpu.memory_space<vmem>>, vector<1x1x8x128xf32>
    %428 = vector.shape_cast %427 : vector<1x1x8x128xf32> to vector<8x128xf32>
    %429 = tpu.transpose %428, [1, 0] : vector<8x128xf32> -> vector<128x8xf32>
    %c0_445 = arith.constant 0 : index
    %c4_446 = arith.constant 4 : index
    %c0_447 = arith.constant 0 : index
    %c0_448 = arith.constant 0 : index
    %430 = vector.load %arg5[%c0_445, %c4_446, %c0_447, %c0_448] : memref<2x8x128x8xf32, #tpu.memory_space<vmem>>, vector<1x1x128x8xf32>
    %431 = vector.shape_cast %430 : vector<1x1x128x8xf32> to vector<128x8xf32>
    %432 = vector.shape_cast %429 : vector<128x8xf32> to vector<1x1x128x8xf32>
    tpu.vector_store %arg5[%c0_445, %c4_446, %c0_447, %c0_448], %432 {strides = array<i32>} : memref<2x8x128x8xf32, #tpu.memory_space<vmem>>, vector<1x1x128x8xf32>,
    %c0_449 = arith.constant 0 : index
    %c5_450 = arith.constant 5 : index
    %c0_451 = arith.constant 0 : index
    %c0_452 = arith.constant 0 : index
    %433 = vector.load %arg8[%c0_449, %c5_450, %c0_451, %c0_452] : memref<2x8x8x128xf32, #tpu.memory_space<vmem>>, vector<1x1x8x128xf32>
    %434 = vector.shape_cast %433 : vector<1x1x8x128xf32> to vector<8x128xf32>
    %435 = tpu.transpose %434, [1, 0] : vector<8x128xf32> -> vector<128x8xf32>
    %c0_453 = arith.constant 0 : index
    %c5_454 = arith.constant 5 : index
    %c0_455 = arith.constant 0 : index
    %c0_456 = arith.constant 0 : index
    %436 = vector.load %arg5[%c0_453, %c5_454, %c0_455, %c0_456] : memref<2x8x128x8xf32, #tpu.memory_space<vmem>>, vector<1x1x128x8xf32>
    %437 = vector.shape_cast %436 : vector<1x1x128x8xf32> to vector<128x8xf32>
    %438 = vector.shape_cast %435 : vector<128x8xf32> to vector<1x1x128x8xf32>
    tpu.vector_store %arg5[%c0_453, %c5_454, %c0_455, %c0_456], %438 {strides = array<i32>} : memref<2x8x128x8xf32, #tpu.memory_space<vmem>>, vector<1x1x128x8xf32>,
    %c0_457 = arith.constant 0 : index
    %c6_458 = arith.constant 6 : index
    %c0_459 = arith.constant 0 : index
    %c0_460 = arith.constant 0 : index
    %439 = vector.load %arg8[%c0_457, %c6_458, %c0_459, %c0_460] : memref<2x8x8x128xf32, #tpu.memory_space<vmem>>, vector<1x1x8x128xf32>
    %440 = vector.shape_cast %439 : vector<1x1x8x128xf32> to vector<8x128xf32>
    %441 = tpu.transpose %440, [1, 0] : vector<8x128xf32> -> vector<128x8xf32>
    %c0_461 = arith.constant 0 : index
    %c6_462 = arith.constant 6 : index
    %c0_463 = arith.constant 0 : index
    %c0_464 = arith.constant 0 : index
    %442 = vector.load %arg5[%c0_461, %c6_462, %c0_463, %c0_464] : memref<2x8x128x8xf32, #tpu.memory_space<vmem>>, vector<1x1x128x8xf32>
    %443 = vector.shape_cast %442 : vector<1x1x128x8xf32> to vector<128x8xf32>
    %444 = vector.shape_cast %441 : vector<128x8xf32> to vector<1x1x128x8xf32>
    tpu.vector_store %arg5[%c0_461, %c6_462, %c0_463, %c0_464], %444 {strides = array<i32>} : memref<2x8x128x8xf32, #tpu.memory_space<vmem>>, vector<1x1x128x8xf32>,
    %c0_465 = arith.constant 0 : index
    %c7_466 = arith.constant 7 : index
    %c0_467 = arith.constant 0 : index
    %c0_468 = arith.constant 0 : index
    %445 = vector.load %arg8[%c0_465, %c7_466, %c0_467, %c0_468] : memref<2x8x8x128xf32, #tpu.memory_space<vmem>>, vector<1x1x8x128xf32>
    %446 = vector.shape_cast %445 : vector<1x1x8x128xf32> to vector<8x128xf32>
    %447 = tpu.transpose %446, [1, 0] : vector<8x128xf32> -> vector<128x8xf32>
    %c0_469 = arith.constant 0 : index
    %c7_470 = arith.constant 7 : index
    %c0_471 = arith.constant 0 : index
    %c0_472 = arith.constant 0 : index
    %448 = vector.load %arg5[%c0_469, %c7_470, %c0_471, %c0_472] : memref<2x8x128x8xf32, #tpu.memory_space<vmem>>, vector<1x1x128x8xf32>
    %449 = vector.shape_cast %448 : vector<1x1x128x8xf32> to vector<128x8xf32>
    %450 = vector.shape_cast %447 : vector<128x8xf32> to vector<1x1x128x8xf32>
    tpu.vector_store %arg5[%c0_469, %c7_470, %c0_471, %c0_472], %450 {strides = array<i32>} : memref<2x8x128x8xf32, #tpu.memory_space<vmem>>, vector<1x1x128x8xf32>,
    %c1_473 = arith.constant 1 : index
    %c0_474 = arith.constant 0 : index
    %c0_475 = arith.constant 0 : index
    %c0_476 = arith.constant 0 : index
    %451 = vector.load %arg8[%c1_473, %c0_474, %c0_475, %c0_476] : memref<2x8x8x128xf32, #tpu.memory_space<vmem>>, vector<1x1x8x128xf32>
    %452 = vector.shape_cast %451 : vector<1x1x8x128xf32> to vector<8x128xf32>
    %453 = tpu.transpose %452, [1, 0] : vector<8x128xf32> -> vector<128x8xf32>
    %c1_477 = arith.constant 1 : index
    %c0_478 = arith.constant 0 : index
    %c0_479 = arith.constant 0 : index
    %c0_480 = arith.constant 0 : index
    %454 = vector.load %arg5[%c1_477, %c0_478, %c0_479, %c0_480] : memref<2x8x128x8xf32, #tpu.memory_space<vmem>>, vector<1x1x128x8xf32>
    %455 = vector.shape_cast %454 : vector<1x1x128x8xf32> to vector<128x8xf32>
    %456 = vector.shape_cast %453 : vector<128x8xf32> to vector<1x1x128x8xf32>
    tpu.vector_store %arg5[%c1_477, %c0_478, %c0_479, %c0_480], %456 {strides = array<i32>} : memref<2x8x128x8xf32, #tpu.memory_space<vmem>>, vector<1x1x128x8xf32>,
    %c1_481 = arith.constant 1 : index
    %c1_482 = arith.constant 1 : index
    %c0_483 = arith.constant 0 : index
    %c0_484 = arith.constant 0 : index
    %457 = vector.load %arg8[%c1_481, %c1_482, %c0_483, %c0_484] : memref<2x8x8x128xf32, #tpu.memory_space<vmem>>, vector<1x1x8x128xf32>
    %458 = vector.shape_cast %457 : vector<1x1x8x128xf32> to vector<8x128xf32>
    %459 = tpu.transpose %458, [1, 0] : vector<8x128xf32> -> vector<128x8xf32>
    %c1_485 = arith.constant 1 : index
    %c1_486 = arith.constant 1 : index
    %c0_487 = arith.constant 0 : index
    %c0_488 = arith.constant 0 : index
    %460 = vector.load %arg5[%c1_485, %c1_486, %c0_487, %c0_488] : memref<2x8x128x8xf32, #tpu.memory_space<vmem>>, vector<1x1x128x8xf32>
    %461 = vector.shape_cast %460 : vector<1x1x128x8xf32> to vector<128x8xf32>
    %462 = vector.shape_cast %459 : vector<128x8xf32> to vector<1x1x128x8xf32>
    tpu.vector_store %arg5[%c1_485, %c1_486, %c0_487, %c0_488], %462 {strides = array<i32>} : memref<2x8x128x8xf32, #tpu.memory_space<vmem>>, vector<1x1x128x8xf32>,
    %c1_489 = arith.constant 1 : index
    %c2_490 = arith.constant 2 : index
    %c0_491 = arith.constant 0 : index
    %c0_492 = arith.constant 0 : index
    %463 = vector.load %arg8[%c1_489, %c2_490, %c0_491, %c0_492] : memref<2x8x8x128xf32, #tpu.memory_space<vmem>>, vector<1x1x8x128xf32>
    %464 = vector.shape_cast %463 : vector<1x1x8x128xf32> to vector<8x128xf32>
    %465 = tpu.transpose %464, [1, 0] : vector<8x128xf32> -> vector<128x8xf32>
    %c1_493 = arith.constant 1 : index
    %c2_494 = arith.constant 2 : index
    %c0_495 = arith.constant 0 : index
    %c0_496 = arith.constant 0 : index
    %466 = vector.load %arg5[%c1_493, %c2_494, %c0_495, %c0_496] : memref<2x8x128x8xf32, #tpu.memory_space<vmem>>, vector<1x1x128x8xf32>
    %467 = vector.shape_cast %466 : vector<1x1x128x8xf32> to vector<128x8xf32>
    %468 = vector.shape_cast %465 : vector<128x8xf32> to vector<1x1x128x8xf32>
    tpu.vector_store %arg5[%c1_493, %c2_494, %c0_495, %c0_496], %468 {strides = array<i32>} : memref<2x8x128x8xf32, #tpu.memory_space<vmem>>, vector<1x1x128x8xf32>,
    %c1_497 = arith.constant 1 : index
    %c3_498 = arith.constant 3 : index
    %c0_499 = arith.constant 0 : index
    %c0_500 = arith.constant 0 : index
    %469 = vector.load %arg8[%c1_497, %c3_498, %c0_499, %c0_500] : memref<2x8x8x128xf32, #tpu.memory_space<vmem>>, vector<1x1x8x128xf32>
    %470 = vector.shape_cast %469 : vector<1x1x8x128xf32> to vector<8x128xf32>
    %471 = tpu.transpose %470, [1, 0] : vector<8x128xf32> -> vector<128x8xf32>
    %c1_501 = arith.constant 1 : index
    %c3_502 = arith.constant 3 : index
    %c0_503 = arith.constant 0 : index
    %c0_504 = arith.constant 0 : index
    %472 = vector.load %arg5[%c1_501, %c3_502, %c0_503, %c0_504] : memref<2x8x128x8xf32, #tpu.memory_space<vmem>>, vector<1x1x128x8xf32>
    %473 = vector.shape_cast %472 : vector<1x1x128x8xf32> to vector<128x8xf32>
    %474 = vector.shape_cast %471 : vector<128x8xf32> to vector<1x1x128x8xf32>
    tpu.vector_store %arg5[%c1_501, %c3_502, %c0_503, %c0_504], %474 {strides = array<i32>} : memref<2x8x128x8xf32, #tpu.memory_space<vmem>>, vector<1x1x128x8xf32>,
    %c1_505 = arith.constant 1 : index
    %c4_506 = arith.constant 4 : index
    %c0_507 = arith.constant 0 : index
    %c0_508 = arith.constant 0 : index
    %475 = vector.load %arg8[%c1_505, %c4_506, %c0_507, %c0_508] : memref<2x8x8x128xf32, #tpu.memory_space<vmem>>, vector<1x1x8x128xf32>
    %476 = vector.shape_cast %475 : vector<1x1x8x128xf32> to vector<8x128xf32>
    %477 = tpu.transpose %476, [1, 0] : vector<8x128xf32> -> vector<128x8xf32>
    %c1_509 = arith.constant 1 : index
    %c4_510 = arith.constant 4 : index
    %c0_511 = arith.constant 0 : index
    %c0_512 = arith.constant 0 : index
    %478 = vector.load %arg5[%c1_509, %c4_510, %c0_511, %c0_512] : memref<2x8x128x8xf32, #tpu.memory_space<vmem>>, vector<1x1x128x8xf32>
    %479 = vector.shape_cast %478 : vector<1x1x128x8xf32> to vector<128x8xf32>
    %480 = vector.shape_cast %477 : vector<128x8xf32> to vector<1x1x128x8xf32>
    tpu.vector_store %arg5[%c1_509, %c4_510, %c0_511, %c0_512], %480 {strides = array<i32>} : memref<2x8x128x8xf32, #tpu.memory_space<vmem>>, vector<1x1x128x8xf32>,
    %c1_513 = arith.constant 1 : index
    %c5_514 = arith.constant 5 : index
    %c0_515 = arith.constant 0 : index
    %c0_516 = arith.constant 0 : index
    %481 = vector.load %arg8[%c1_513, %c5_514, %c0_515, %c0_516] : memref<2x8x8x128xf32, #tpu.memory_space<vmem>>, vector<1x1x8x128xf32>
    %482 = vector.shape_cast %481 : vector<1x1x8x128xf32> to vector<8x128xf32>
    %483 = tpu.transpose %482, [1, 0] : vector<8x128xf32> -> vector<128x8xf32>
    %c1_517 = arith.constant 1 : index
    %c5_518 = arith.constant 5 : index
    %c0_519 = arith.constant 0 : index
    %c0_520 = arith.constant 0 : index
    %484 = vector.load %arg5[%c1_517, %c5_518, %c0_519, %c0_520] : memref<2x8x128x8xf32, #tpu.memory_space<vmem>>, vector<1x1x128x8xf32>
    %485 = vector.shape_cast %484 : vector<1x1x128x8xf32> to vector<128x8xf32>
    %486 = vector.shape_cast %483 : vector<128x8xf32> to vector<1x1x128x8xf32>
    tpu.vector_store %arg5[%c1_517, %c5_518, %c0_519, %c0_520], %486 {strides = array<i32>} : memref<2x8x128x8xf32, #tpu.memory_space<vmem>>, vector<1x1x128x8xf32>,
    %c1_521 = arith.constant 1 : index
    %c6_522 = arith.constant 6 : index
    %c0_523 = arith.constant 0 : index
    %c0_524 = arith.constant 0 : index
    %487 = vector.load %arg8[%c1_521, %c6_522, %c0_523, %c0_524] : memref<2x8x8x128xf32, #tpu.memory_space<vmem>>, vector<1x1x8x128xf32>
    %488 = vector.shape_cast %487 : vector<1x1x8x128xf32> to vector<8x128xf32>
    %489 = tpu.transpose %488, [1, 0] : vector<8x128xf32> -> vector<128x8xf32>
    %c1_525 = arith.constant 1 : index
    %c6_526 = arith.constant 6 : index
    %c0_527 = arith.constant 0 : index
    %c0_528 = arith.constant 0 : index
    %490 = vector.load %arg5[%c1_525, %c6_526, %c0_527, %c0_528] : memref<2x8x128x8xf32, #tpu.memory_space<vmem>>, vector<1x1x128x8xf32>
    %491 = vector.shape_cast %490 : vector<1x1x128x8xf32> to vector<128x8xf32>
    %492 = vector.shape_cast %489 : vector<128x8xf32> to vector<1x1x128x8xf32>
    tpu.vector_store %arg5[%c1_525, %c6_526, %c0_527, %c0_528], %492 {strides = array<i32>} : memref<2x8x128x8xf32, #tpu.memory_space<vmem>>, vector<1x1x128x8xf32>,
    %c1_529 = arith.constant 1 : index
    %c7_530 = arith.constant 7 : index
    %c0_531 = arith.constant 0 : index
    %c0_532 = arith.constant 0 : index
    %493 = vector.load %arg8[%c1_529, %c7_530, %c0_531, %c0_532] : memref<2x8x8x128xf32, #tpu.memory_space<vmem>>, vector<1x1x8x128xf32>
    %494 = vector.shape_cast %493 : vector<1x1x8x128xf32> to vector<8x128xf32>
    %495 = tpu.transpose %494, [1, 0] : vector<8x128xf32> -> vector<128x8xf32>
    %c1_533 = arith.constant 1 : index
    %c7_534 = arith.constant 7 : index
    %c0_535 = arith.constant 0 : index
    %c0_536 = arith.constant 0 : index
    %496 = vector.load %arg5[%c1_533, %c7_534, %c0_535, %c0_536] : memref<2x8x128x8xf32, #tpu.memory_space<vmem>>, vector<1x1x128x8xf32>
    %497 = vector.shape_cast %496 : vector<1x1x128x8xf32> to vector<128x8xf32>
    %498 = vector.shape_cast %495 : vector<128x8xf32> to vector<1x1x128x8xf32>
    tpu.vector_store %arg5[%c1_533, %c7_534, %c0_535, %c0_536], %498 {strides = array<i32>} : memref<2x8x128x8xf32, #tpu.memory_space<vmem>>, vector<1x1x128x8xf32>,
    return
  }
  func.func @transform_0(%arg0: i32) -> (i32, i32, i32, i32) {
    %c0_i32 = arith.constant 0 : i32
    %c0_i32_0 = arith.constant 0 : i32
    %c0_i32_1 = arith.constant 0 : i32
    %c0_i32_2 = arith.constant 0 : i32
    return %arg0, %c0_i32, %c0_i32_0, %c0_i32_1 : i32, i32, i32, i32
  }
  func.func @transform_1(%arg0: i32) -> (i32, i32) {
    %c0_i32 = arith.constant 0 : i32
    %c0_i32_0 = arith.constant 0 : i32
    %c0_i32_1 = arith.constant 0 : i32
    return %c0_i32, %c0_i32_0 : i32, i32
  }
  func.func @transform_2(%arg0: i32) -> (i32, i32) {
    %c0_i32 = arith.constant 0 : i32
    %c0_i32_0 = arith.constant 0 : i32
    %c0_i32_1 = arith.constant 0 : i32
    return %c0_i32, %c0_i32_0 : i32, i32
  }
  func.func @transform_3(%arg0: i32) -> (i32, i32) {
    %c0_i32 = arith.constant 0 : i32
    %c0_i32_0 = arith.constant 0 : i32
    %c0_i32_1 = arith.constant 0 : i32
    return %c0_i32, %c0_i32_0 : i32, i32
  }
  func.func @transform_4(%arg0: i32) -> (i32, i32, i32, i32) {
    %c0_i32 = arith.constant 0 : i32
    %c0_i32_0 = arith.constant 0 : i32
    %c0_i32_1 = arith.constant 0 : i32
    %c0_i32_2 = arith.constant 0 : i32
    return %arg0, %c0_i32, %c0_i32_0, %c0_i32_1 : i32, i32, i32, i32
  }
}

</mosaic_0001>

<bundles_post_ra>
// kernel: tpu_custom_call.1
= control target key start
LH: loop header
LB: loop body
LE: loop exit
PB: predicated region body
PF: predicated region fallthrough
CT: control target
= control target key end

     0   :  { %v6358_v7 = vmov 0   ;;  %vm1902_vm0 = vcmask 457728   ;;  %vm2628_vm1 = vcmask 64512   ;;  %s6353_s0 = inlined_call_operand.vmem [shape: f32[2,8,128,8], index: 0, kind: input, shape index: {}]   ;;  %s6354_s3 = inlined_call_operand.vmem [shape: f32[8,1], index: 3, kind: input, shape index: {}]   ;;  %s6355_s1 = inlined_call_operand.vmem [shape: f32[128,384], index: 1, kind: input, shape index: {}]   ;;  %s6356_s2 = inlined_call_operand.vmem [shape: f32[8,56], index: 2, kind: input, shape index: {}]   ;;  %s6357_s4 = inlined_call_operand.vmem [shape: f32[2,8,128,8], index: 4, kind: output, shape index: {}]  }
   0x1   :  { %v17_v0 = vld [vmem:[%s6353_s0] sm:$0xff]  ;;  %v18_v1 = vld [vmem:[%s6353_s0 + $0x8] sm:$0xff]  ;;  %v19_v2 = vld [vmem:[%s6353_s0 + $0x10] sm:$0xff]  ;;  %3911 = vset.pattern.permute.xlu1 %v6358_v7 }
   0x2   :  { %33 = vxpose.xlu0.b32.start [1/16] (narrow) %v17_v0, 8  ;;  %v20_v3 = vld [vmem:[%s6353_s0 + $0x18] sm:$0xff]  ;;  %v21_v4 = vld [vmem:[%s6353_s0 + $0x20] sm:$0xff]  ;;  %v22_v5 = vld [vmem:[%s6353_s0 + $0x28] sm:$0xff] }
   0x3   :  { %v1896_v6 = vld [vmem:[%s6354_s3] sm:$0xff]  ;;  %v23_v8 = vld [vmem:[%s6353_s0 + $0x30] sm:$0xff]  ;;  %v24_v9 = vld [vmem:[%s6353_s0 + $0x38] sm:$0xff] }
   0x4   :  { %1899 = vperm.xlu1 %3911, %v1896_v6   ;;  %v25_v10 = vld [vmem:[%s6353_s0 + $0x40] sm:$0xff]  ;;  %v26_v11 = vld [vmem:[%s6353_s0 + $0x48] sm:$0xff]  ;;  %v27_v12 = vld [vmem:[%s6353_s0 + $0x50] sm:$0xff] }
   0x5   :  { %v28_v13 = vld [vmem:[%s6353_s0 + $0x58] sm:$0xff]  ;;  %v3413_v14 = vld [vmem:[%s6353_s0 + $0x80] sm:$0xff]  ;;  %v3414_v16 = vld [vmem:[%s6353_s0 + $0x88] sm:$0xff] }
   0x6   :  { %v29_v15 = vld [vmem:[%s6353_s0 + $0x60] sm:$0xff]  ;;  %v30_v17 = vld [vmem:[%s6353_s0 + $0x68] sm:$0xff]  ;;  %v3415_v19 = vld [vmem:[%s6353_s0 + $0x90] sm:$0xff] }
   0x7   :  { %v3429_v18 = vld [vmem:[%s6353_s0 + $0x100] sm:$0xff]  ;;  %v31_v20 = vld [vmem:[%s6353_s0 + $0x70] sm:$0xff]  ;;  %v3430_v21 = vld [vmem:[%s6353_s0 + $0x108] sm:$0xff] }
   0x8   :  { %177 = vxpose.xlu2.b32.start [1/16] (narrow) %v3429_v18, 8  ;;  %v3416_v22 = vld [vmem:[%s6353_s0 + $0x98] sm:$0xff]  ;;  %v3431_v24 = vld [vmem:[%s6353_s0 + $0x110] sm:$0xff]  ;;  %v3417_v25 = vld [vmem:[%s6353_s0 + $0xa0] sm:$0xff] }
   0x9   :  { %v32_v23 = vld [vmem:[%s6353_s0 + $0x78] sm:$0xff]  ;;  %v3445_v26 = vld [vmem:[%s6353_s0 + $0x180] sm:$0xff]  ;;  %v3418_v28 = vld [vmem:[%s6353_s0 + $0xa8] sm:$0xff] }
   0xa   :  { %34 = vxpose.xlu0.b32.cont [2/16] (narrow) %v18_v1, 8  ;;  %v3432_v27 = vld [vmem:[%s6353_s0 + $0x118] sm:$0xff]  ;;  %v3446_v29 = vld [vmem:[%s6353_s0 + $0x188] sm:$0xff]  ;;  %v3433_v30 = vld [vmem:[%s6353_s0 + $0x120] sm:$0xff] }
   0xb   :  { %v3419_v31 = vld [vmem:[%s6353_s0 + $0xb0] sm:$0xff]  ;;  %v3434_v33 = vld [vmem:[%s6353_s0 + $0x128] sm:$0xff]  ;;  %v3420_v34 = vld [vmem:[%s6353_s0 + $0xb8] sm:$0xff] }
   0xc   :  { %v3447_v32 = vld [vmem:[%s6353_s0 + $0x190] sm:$0xff]  ;;  %v3448_v35 = vld [vmem:[%s6353_s0 + $0x198] sm:$0xff]  ;;  %v3421_v37 = vld [vmem:[%s6353_s0 + $0xc0] sm:$0xff] }
   0xd   :  { %v3435_v36 = vld [vmem:[%s6353_s0 + $0x130] sm:$0xff]  ;;  %v3449_v38 = vld [vmem:[%s6353_s0 + $0x1a0] sm:$0xff]  ;;  %v3436_v39 = vld [vmem:[%s6353_s0 + $0x138] sm:$0xff] }
   0xe   :  { %v3422_v40 = vld [vmem:[%s6353_s0 + $0xc8] sm:$0xff]  ;;  %v3437_v42 = vld [vmem:[%s6353_s0 + $0x140] sm:$0xff]  ;;  %v3423_v43 = vld [vmem:[%s6353_s0 + $0xd0] sm:$0xff] }
   0xf   :  { %v3450_v41 = vld [vmem:[%s6353_s0 + $0x1a8] sm:$0xff]  ;;  %v3451_v44 = vld [vmem:[%s6353_s0 + $0x1b0] sm:$0xff]  ;;  %v3424_v46 = vld [vmem:[%s6353_s0 + $0xd8] sm:$0xff] }
  0x10   :  { %178 = vxpose.xlu2.b32.cont [2/16] (narrow) %v3430_v21, 8  ;;  %v3438_v45 = vld [vmem:[%s6353_s0 + $0x148] sm:$0xff]  ;;  %v3452_v47 = vld [vmem:[%s6353_s0 + $0x1b8] sm:$0xff]  ;;  %v3439_v48 = vld [vmem:[%s6353_s0 + $0x150] sm:$0xff] }
  0x11   :  { %v3425_v49 = vld [vmem:[%s6353_s0 + $0xe0] sm:$0xff]  ;;  %v3440_v51 = vld [vmem:[%s6353_s0 + $0x158] sm:$0xff]  ;;  %v3426_v52 = vld [vmem:[%s6353_s0 + $0xe8] sm:$0xff] }
  0x12   :  { %35 = vxpose.xlu0.b32.cont [3/16] (narrow) %v19_v2, 8  ;;  %v3453_v50 = vld [vmem:[%s6353_s0 + $0x1c0] sm:$0xff]  ;;  %v3454_v53 = vld [vmem:[%s6353_s0 + $0x1c8] sm:$0xff]  ;;  %v3427_v55 = vld [vmem:[%s6353_s0 + $0xf0] sm:$0xff] }
  0x13   :  { %v3441_v54 = vld [vmem:[%s6353_s0 + $0x160] sm:$0xff]  ;;  %v3455_v56 = vld [vmem:[%s6353_s0 + $0x1d0] sm:$0xff]  ;;  %v3442_v57 = vld [vmem:[%s6353_s0 + $0x168] sm:$0xff] }
  0x14   :  { %v3428_v58 = vld [vmem:[%s6353_s0 + $0xf8] sm:$0xff]  ;;  %v3443_v60 = vld [vmem:[%s6353_s0 + $0x170] sm:$0xff]  ;;  %v3461_v61 = vld [vmem:[%s6353_s0 + $0x200] sm:$0xff] }
  0x15   :  { %v3456_v59 = vld [vmem:[%s6353_s0 + $0x1d8] sm:$0xff]  ;;  %v3457_v62 = vld [vmem:[%s6353_s0 + $0x1e0] sm:$0xff]  ;;  %v3462_v0 = vld [vmem:[%s6353_s0 + $0x208] sm:$0xff] }
  0x16   :  { %v3444_v63 = vld [vmem:[%s6353_s0 + $0x178] sm:$0xff]  ;;  %v3458_v1 = vld [vmem:[%s6353_s0 + $0x1e8] sm:$0xff]  ;;  %v3477_v2 = vld [vmem:[%s6353_s0 + $0x280] sm:$0xff] }
  0x17   :  { %v3464_v6 = vld [vmem:[%s6353_s0 + $0x218] sm:$0xff]  ;;  %v3482_v18 = vld [vmem:[%s6353_s0 + $0x2a8] sm:$0xff]  ;;  %v3483_v21 = vld [vmem:[%s6353_s0 + $0x2b0] sm:$0xff] }
  0x18   :  { %179 = vxpose.xlu2.b32.cont [3/16] (narrow) %v3431_v24, 8  ;;  %v3484_v24 = vld [vmem:[%s6353_s0 + $0x2b8] sm:$0xff] }
  0x1a   :  { %36 = vxpose.xlu0.b32.cont [4/16] (narrow) %v20_v3, 8  ;;  %v3463_v3 = vld [vmem:[%s6353_s0 + $0x210] sm:$0xff] }
  0x20   :  { %180 = vxpose.xlu2.b32.cont [4/16] (narrow) %v3432_v27, 8  ;;  %v3485_v27 = vld [vmem:[%s6353_s0 + $0x2c0] sm:$0xff] }
  0x22   :  { %37 = vxpose.xlu0.b32.cont [5/16] (narrow) %v21_v4, 8  ;;  %v3459_v4 = vld [vmem:[%s6353_s0 + $0x1f0] sm:$0xff] }
  0x28   :  { %181 = vxpose.xlu2.b32.cont [5/16] (narrow) %v3433_v30, 8  ;;  %v3486_v30 = vld [vmem:[%s6353_s0 + $0x2c8] sm:$0xff] }
  0x2a   :  { %38 = vxpose.xlu0.b32.cont [6/16] (narrow) %v22_v5, 8  ;;  %v3478_v5 = vld [vmem:[%s6353_s0 + $0x288] sm:$0xff] }
  0x30   :  { %182 = vxpose.xlu2.b32.cont [6/16] (narrow) %v3434_v33, 8  ;;  %v3487_v33 = vld [vmem:[%s6353_s0 + $0x2d0] sm:$0xff] }
  0x32   :  { %39 = vxpose.xlu0.b32.cont [7/16] (narrow) %v23_v8, 8  ;;  %v3460_v8 = vld [vmem:[%s6353_s0 + $0x1f8] sm:$0xff] }
  0x38   :  { %183 = vxpose.xlu2.b32.cont [7/16] (narrow) %v3435_v36, 8  ;;  %v3488_v36 = vld [vmem:[%s6353_s0 + $0x2d8] sm:$0xff] }
  0x39   :  { %105 = vxpose.xlu1.b32.start [1/16] (narrow) %v3413_v14, 8  ;;  %v3494_v14 = vld [vmem:[%s6353_s0 + $0x308] sm:$0xff] }
  0x3a   :  { %40 = vxpose.xlu0.b32.cont [8/16] (narrow) %v24_v9, 8  ;;  %v3479_v9 = vld [vmem:[%s6353_s0 + $0x290] sm:$0xff] }
  0x40   :  { %184 = vxpose.xlu2.b32.cont [8/16] (narrow) %v3436_v39, 8  ;;  %v3489_v39 = vld [vmem:[%s6353_s0 + $0x2e0] sm:$0xff] }
  0x41   :  { %106 = vxpose.xlu1.b32.cont [2/16] (narrow) %v3414_v16, 8  ;;  %v3467_v16 = vld [vmem:[%s6353_s0 + $0x230] sm:$0xff] }
  0x42   :  { %41 = vxpose.xlu0.b32.cont [9/16] (narrow) %v25_v10, 8  ;;  %v3465_v10 = vld [vmem:[%s6353_s0 + $0x220] sm:$0xff] }
  0x48   :  { %185 = vxpose.xlu2.b32.cont [9/16] (narrow) %v3437_v42, 8  ;;  %v3490_v42 = vld [vmem:[%s6353_s0 + $0x2e8] sm:$0xff] }
  0x49   :  { %107 = vxpose.xlu1.b32.cont [3/16] (narrow) %v3415_v19, 8  ;;  %v3468_v19 = vld [vmem:[%s6353_s0 + $0x238] sm:$0xff] }
  0x4a   :  { %42 = vxpose.xlu0.b32.cont [10/16] (narrow) %v26_v11, 8  ;;  %v3493_v11 = vld [vmem:[%s6353_s0 + $0x300] sm:$0xff] }
  0x50   :  { %186 = vxpose.xlu2.b32.cont [10/16] (narrow) %v3438_v45, 8  ;;  %v3491_v45 = vld [vmem:[%s6353_s0 + $0x2f0] sm:$0xff] }
  0x51   :  { %108 = vxpose.xlu1.b32.cont [4/16] (narrow) %v3416_v22, 8  ;;  %v3469_v22 = vld [vmem:[%s6353_s0 + $0x240] sm:$0xff] }
  0x52   :  { %43 = vxpose.xlu0.b32.cont [11/16] (narrow) %v27_v12, 8  ;;  %v3480_v12 = vld [vmem:[%s6353_s0 + $0x298] sm:$0xff] }
  0x58   :  { %187 = vxpose.xlu2.b32.cont [11/16] (narrow) %v3439_v48, 8  ;;  %v3492_v48 = vld [vmem:[%s6353_s0 + $0x2f8] sm:$0xff] }
  0x59   :  { %109 = vxpose.xlu1.b32.cont [5/16] (narrow) %v3417_v25, 8  ;;  %v3470_v25 = vld [vmem:[%s6353_s0 + $0x248] sm:$0xff] }
  0x5a   :  { %44 = vxpose.xlu0.b32.cont [12/16] (narrow) %v28_v13, 8  ;;  %v3466_v13 = vld [vmem:[%s6353_s0 + $0x228] sm:$0xff] }
  0x60   :  { %188 = vxpose.xlu2.b32.cont [12/16] (narrow) %v3440_v51, 8  ;;  %v3525_v51 = vld [vmem:[%s6353_s0 + $0x400] sm:$0xff] }
  0x61   :  { %110 = vxpose.xlu1.b32.cont [6/16] (narrow) %v3418_v28, 8  ;;  %v3471_v28 = vld [vmem:[%s6353_s0 + $0x250] sm:$0xff] }
  0x62   :  { %45 = vxpose.xlu0.b32.cont [13/16] (narrow) %v29_v15, 8  ;;  %v3481_v15 = vld [vmem:[%s6353_s0 + $0x2a0] sm:$0xff] }
  0x68   :  { %189 = vxpose.xlu2.b32.cont [13/16] (narrow) %v3441_v54, 8  ;;  %v3526_v54 = vld [vmem:[%s6353_s0 + $0x408] sm:$0xff] }
  0x69   :  { %111 = vxpose.xlu1.b32.cont [7/16] (narrow) %v3419_v31, 8  ;;  %v3472_v31 = vld [vmem:[%s6353_s0 + $0x258] sm:$0xff] }
  0x6a   :  { %46 = vxpose.xlu0.b32.cont [14/16] (narrow) %v30_v17, 8  ;;  %v3495_v17 = vld [vmem:[%s6353_s0 + $0x310] sm:$0xff] }
  0x70   :  { %190 = vxpose.xlu2.b32.cont [14/16] (narrow) %v3442_v57, 8  ;;  %v3527_v57 = vld [vmem:[%s6353_s0 + $0x410] sm:$0xff] }
  0x71   :  { %112 = vxpose.xlu1.b32.cont [8/16] (narrow) %v3420_v34, 8  ;;  %v3473_v34 = vld [vmem:[%s6353_s0 + $0x260] sm:$0xff] }
  0x72   :  { %47 = vxpose.xlu0.b32.cont [15/16] (narrow) %v31_v20, 8  ;;  %v3496_v20 = vld [vmem:[%s6353_s0 + $0x318] sm:$0xff] }
  0x78   :  { %191 = vxpose.xlu2.b32.cont [15/16] (narrow) %v3443_v60, 8  ;;  %v3528_v60 = vld [vmem:[%s6353_s0 + $0x418] sm:$0xff] }
  0x79   :  { %113 = vxpose.xlu1.b32.cont [9/16] (narrow) %v3421_v37, 8  ;;  %v3474_v37 = vld [vmem:[%s6353_s0 + $0x268] sm:$0xff] }
  0x7a   :  { %48 = vxpose.xlu0.b32.end [16/16] (narrow) %v32_v23, 8  ;;  %v3497_v23 = vld [vmem:[%s6353_s0 + $0x320] sm:$0xff] }
  0x80   :  { %192 = vxpose.xlu2.b32.end [16/16] (narrow) %v3444_v63, 8  ;;  %v3529_v63 = vld [vmem:[%s6353_s0 + $0x420] sm:$0xff] }
  0x81   :  { %114 = vxpose.xlu1.b32.cont [10/16] (narrow) %v3422_v40, 8  ;;  %v3475_v40 = vld [vmem:[%s6353_s0 + $0x270] sm:$0xff] }
  0x82   :  { %249 = vxpose.xlu0.b32.start [1/16] (narrow) %v3445_v26, 8  ;;  %v3498_v26 = vld [vmem:[%s6353_s0 + $0x328] sm:$0xff] }
  0x88   :  { %393 = vxpose.xlu2.b32.start [1/16] (narrow) %v3477_v2, 8  ;;  %v3530_v2 = vld [vmem:[%s6353_s0 + $0x428] sm:$0xff] }
  0x89   :  { %115 = vxpose.xlu1.b32.cont [11/16] (narrow) %v3423_v43, 8  ;;  %v3476_v43 = vld [vmem:[%s6353_s0 + $0x278] sm:$0xff] }
  0x8a   :  { %250 = vxpose.xlu0.b32.cont [2/16] (narrow) %v3446_v29, 8  ;;  %v3499_v29 = vld [vmem:[%s6353_s0 + $0x330] sm:$0xff] }
  0x90   :  { %394 = vxpose.xlu2.b32.cont [2/16] (narrow) %v3478_v5, 8  ;;  %v3531_v5 = vld [vmem:[%s6353_s0 + $0x430] sm:$0xff] }
  0x91   :  { %116 = vxpose.xlu1.b32.cont [12/16] (narrow) %v3424_v46, 8  ;;  %v3509_v46 = vld [vmem:[%s6353_s0 + $0x380] sm:$0xff] }
  0x92   :  { %251 = vxpose.xlu0.b32.cont [3/16] (narrow) %v3447_v32, 8  ;;  %v3500_v32 = vld [vmem:[%s6353_s0 + $0x338] sm:$0xff] }
  0x98   :  { %395 = vxpose.xlu2.b32.cont [3/16] (narrow) %v3479_v9, 8  ;;  %v3532_v9 = vld [vmem:[%s6353_s0 + $0x438] sm:$0xff] }
  0x99   :  { %117 = vxpose.xlu1.b32.cont [13/16] (narrow) %v3425_v49, 8  ;;  %v3510_v49 = vld [vmem:[%s6353_s0 + $0x388] sm:$0xff] }
  0x9a   :  { %252 = vxpose.xlu0.b32.cont [4/16] (narrow) %v3448_v35, 8  ;;  %v3501_v35 = vld [vmem:[%s6353_s0 + $0x340] sm:$0xff] }
  0xa0   :  { %396 = vxpose.xlu2.b32.cont [4/16] (narrow) %v3480_v12, 8  ;;  %v3533_v12 = vld [vmem:[%s6353_s0 + $0x440] sm:$0xff] }
  0xa1   :  { %118 = vxpose.xlu1.b32.cont [14/16] (narrow) %v3426_v52, 8  ;;  %v3511_v52 = vld [vmem:[%s6353_s0 + $0x390] sm:$0xff] }
  0xa2   :  { %253 = vxpose.xlu0.b32.cont [5/16] (narrow) %v3449_v38, 8  ;;  %v3502_v38 = vld [vmem:[%s6353_s0 + $0x348] sm:$0xff] }
  0xa8   :  { %397 = vxpose.xlu2.b32.cont [5/16] (narrow) %v3481_v15, 8  ;;  %v3534_v15 = vld [vmem:[%s6353_s0 + $0x448] sm:$0xff] }
  0xa9   :  { %119 = vxpose.xlu1.b32.cont [15/16] (narrow) %v3427_v55, 8  ;;  %v3512_v55 = vld [vmem:[%s6353_s0 + $0x398] sm:$0xff] }
  0xaa   :  { %254 = vxpose.xlu0.b32.cont [6/16] (narrow) %v3450_v41, 8  ;;  %v3503_v41 = vld [vmem:[%s6353_s0 + $0x350] sm:$0xff] }
  0xb0   :  { %398 = vxpose.xlu2.b32.cont [6/16] (narrow) %v3482_v18, 8  ;;  %v3535_v18 = vld [vmem:[%s6353_s0 + $0x450] sm:$0xff] }
  0xb1   :  { %120 = vxpose.xlu1.b32.end [16/16] (narrow) %v3428_v58, 8  ;;  %v3513_v58 = vld [vmem:[%s6353_s0 + $0x3a0] sm:$0xff] }
  0xb2   :  { %255 = vxpose.xlu0.b32.cont [7/16] (narrow) %v3451_v44, 8  ;;  %v3504_v44 = vld [vmem:[%s6353_s0 + $0x358] sm:$0xff] }
  0xb8   :  { %399 = vxpose.xlu2.b32.cont [7/16] (narrow) %v3483_v21, 8  ;;  %v3536_v21 = vld [vmem:[%s6353_s0 + $0x458] sm:$0xff] }
  0xb9   :  { %321 = vxpose.xlu1.b32.start [1/16] (narrow) %v3461_v61, 8  ;;  %v3514_v61 = vld [vmem:[%s6353_s0 + $0x3a8] sm:$0xff] }
  0xba   :  { %256 = vxpose.xlu0.b32.cont [8/16] (narrow) %v3452_v47, 8  ;;  %v3505_v47 = vld [vmem:[%s6353_s0 + $0x360] sm:$0xff] }
  0xc0   :  { %400 = vxpose.xlu2.b32.cont [8/16] (narrow) %v3484_v24, 8  ;;  %v3537_v24 = vld [vmem:[%s6353_s0 + $0x460] sm:$0xff] }
  0xc1   :  { %322 = vxpose.xlu1.b32.cont [2/16] (narrow) %v3462_v0, 8  ;;  %v3515_v0 = vld [vmem:[%s6353_s0 + $0x3b0] sm:$0xff] }
  0xc2   :  { %257 = vxpose.xlu0.b32.cont [9/16] (narrow) %v3453_v50, 8  ;;  %v3506_v50 = vld [vmem:[%s6353_s0 + $0x368] sm:$0xff] }
  0xc8   :  { %401 = vxpose.xlu2.b32.cont [9/16] (narrow) %v3485_v27, 8  ;;  %v3538_v27 = vld [vmem:[%s6353_s0 + $0x468] sm:$0xff] }
  0xc9   :  { %323 = vxpose.xlu1.b32.cont [3/16] (narrow) %v3463_v3, 8  ;;  %v3516_v3 = vld [vmem:[%s6353_s0 + $0x3b8] sm:$0xff] }
  0xca   :  { %258 = vxpose.xlu0.b32.cont [10/16] (narrow) %v3454_v53, 8  ;;  %v3507_v53 = vld [vmem:[%s6353_s0 + $0x370] sm:$0xff] }
  0xd0   :  { %402 = vxpose.xlu2.b32.cont [10/16] (narrow) %v3486_v30, 8  ;;  %v3539_v30 = vld [vmem:[%s6353_s0 + $0x470] sm:$0xff] }
  0xd1   :  { %324 = vxpose.xlu1.b32.cont [4/16] (narrow) %v3464_v6, 8  ;;  %v3517_v6 = vld [vmem:[%s6353_s0 + $0x3c0] sm:$0xff] }
  0xd2   :  { %259 = vxpose.xlu0.b32.cont [11/16] (narrow) %v3455_v56, 8  ;;  %v3508_v56 = vld [vmem:[%s6353_s0 + $0x378] sm:$0xff] }
  0xd8   :  { %403 = vxpose.xlu2.b32.cont [11/16] (narrow) %v3487_v33, 8  ;;  %v3540_v33 = vld [vmem:[%s6353_s0 + $0x478] sm:$0xff] }
  0xd9   :  { %325 = vxpose.xlu1.b32.cont [5/16] (narrow) %v3465_v10, 8  ;;  %v3518_v10 = vld [vmem:[%s6353_s0 + $0x3c8] sm:$0xff] }
  0xda   :  { %260 = vxpose.xlu0.b32.cont [12/16] (narrow) %v3456_v59, 8  ;;  %v3541_v59 = vld [vmem:[%s6353_s0 + $0x480] sm:$0xff] }
  0xe0   :  { %404 = vxpose.xlu2.b32.cont [12/16] (narrow) %v3488_v36, 8  ;;  %v3573_v36 = vld [vmem:[%s6353_s0 + $0x580] sm:$0xff] }
  0xe1   :  { %326 = vxpose.xlu1.b32.cont [6/16] (narrow) %v3466_v13, 8  ;;  %v3519_v13 = vld [vmem:[%s6353_s0 + $0x3d0] sm:$0xff] }
  0xe2   :  { %261 = vxpose.xlu0.b32.cont [13/16] (narrow) %v3457_v62, 8  ;;  %v3542_v62 = vld [vmem:[%s6353_s0 + $0x488] sm:$0xff] }
  0xe8   :  { %405 = vxpose.xlu2.b32.cont [13/16] (narrow) %v3489_v39, 8  ;;  %v3574_v39 = vld [vmem:[%s6353_s0 + $0x588] sm:$0xff] }
  0xe9   :  { %327 = vxpose.xlu1.b32.cont [7/16] (narrow) %v3467_v16, 8  ;;  %v3520_v16 = vld [vmem:[%s6353_s0 + $0x3d8] sm:$0xff] }
  0xea   :  { %262 = vxpose.xlu0.b32.cont [14/16] (narrow) %v3458_v1, 8  ;;  %v3543_v1 = vld [vmem:[%s6353_s0 + $0x490] sm:$0xff] }
  0xf0   :  { %406 = vxpose.xlu2.b32.cont [14/16] (narrow) %v3490_v42, 8  ;;  %v3575_v42 = vld [vmem:[%s6353_s0 + $0x590] sm:$0xff] }
  0xf1   :  { %328 = vxpose.xlu1.b32.cont [8/16] (narrow) %v3468_v19, 8  ;;  %v3521_v19 = vld [vmem:[%s6353_s0 + $0x3e0] sm:$0xff] }
  0xf2   :  { %263 = vxpose.xlu0.b32.cont [15/16] (narrow) %v3459_v4, 8  ;;  %v3544_v4 = vld [vmem:[%s6353_s0 + $0x498] sm:$0xff] }
  0xf8   :  { %407 = vxpose.xlu2.b32.cont [15/16] (narrow) %v3491_v45, 8  ;;  %v3576_v45 = vld [vmem:[%s6353_s0 + $0x598] sm:$0xff] }
  0xf9   :  { %329 = vxpose.xlu1.b32.cont [9/16] (narrow) %v3469_v22, 8  ;;  %v3522_v22 = vld [vmem:[%s6353_s0 + $0x3e8] sm:$0xff] }
  0xfa   :  { %264 = vxpose.xlu0.b32.end [16/16] (narrow) %v3460_v8, 8  ;;  %v3545_v8 = vld [vmem:[%s6353_s0 + $0x4a0] sm:$0xff] }
 0x100   :  { %408 = vxpose.xlu2.b32.end [16/16] (narrow) %v3492_v48, 8  ;;  %v3577_v48 = vld [vmem:[%s6353_s0 + $0x5a0] sm:$0xff] }
 0x101   :  { %330 = vxpose.xlu1.b32.cont [10/16] (narrow) %v3470_v25, 8  ;;  %v3523_v25 = vld [vmem:[%s6353_s0 + $0x3f0] sm:$0xff] }
 0x102   :  { %465 = vxpose.xlu0.b32.start [1/16] (narrow) %v3493_v11, 8  ;;  %v3546_v11 = vld [vmem:[%s6353_s0 + $0x4a8] sm:$0xff] }
 0x108   :  { %609 = vxpose.xlu2.b32.start [1/16] (narrow) %v3525_v51, 8  ;;  %v3578_v51 = vld [vmem:[%s6353_s0 + $0x5a8] sm:$0xff] }
 0x109   :  { %331 = vxpose.xlu1.b32.cont [11/16] (narrow) %v3471_v28, 8  ;;  %v3524_v28 = vld [vmem:[%s6353_s0 + $0x3f8] sm:$0xff] }
 0x10a   :  { %466 = vxpose.xlu0.b32.cont [2/16] (narrow) %v3494_v14, 8  ;;  %v3547_v14 = vld [vmem:[%s6353_s0 + $0x4b0] sm:$0xff] }
 0x110   :  { %610 = vxpose.xlu2.b32.cont [2/16] (narrow) %v3526_v54, 8  ;;  %v3579_v54 = vld [vmem:[%s6353_s0 + $0x5b0] sm:$0xff] }
 0x111   :  { %332 = vxpose.xlu1.b32.cont [12/16] (narrow) %v3472_v31, 8  ;;  %v3557_v31 = vld [vmem:[%s6353_s0 + $0x500] sm:$0xff] }
 0x112   :  { %467 = vxpose.xlu0.b32.cont [3/16] (narrow) %v3495_v17, 8  ;;  %v3548_v17 = vld [vmem:[%s6353_s0 + $0x4b8] sm:$0xff] }
 0x118   :  { %611 = vxpose.xlu2.b32.cont [3/16] (narrow) %v3527_v57, 8  ;;  %v3580_v57 = vld [vmem:[%s6353_s0 + $0x5b8] sm:$0xff] }
 0x119   :  { %333 = vxpose.xlu1.b32.cont [13/16] (narrow) %v3473_v34, 8  ;;  %v3558_v34 = vld [vmem:[%s6353_s0 + $0x508] sm:$0xff] }
 0x11a   :  { %468 = vxpose.xlu0.b32.cont [4/16] (narrow) %v3496_v20, 8  ;;  %v3549_v20 = vld [vmem:[%s6353_s0 + $0x4c0] sm:$0xff] }
 0x120   :  { %612 = vxpose.xlu2.b32.cont [4/16] (narrow) %v3528_v60, 8  ;;  %v3581_v60 = vld [vmem:[%s6353_s0 + $0x5c0] sm:$0xff] }
 0x121   :  { %334 = vxpose.xlu1.b32.cont [14/16] (narrow) %v3474_v37, 8  ;;  %v3559_v37 = vld [vmem:[%s6353_s0 + $0x510] sm:$0xff] }
 0x122   :  { %469 = vxpose.xlu0.b32.cont [5/16] (narrow) %v3497_v23, 8  ;;  %v3550_v23 = vld [vmem:[%s6353_s0 + $0x4c8] sm:$0xff] }
 0x128   :  { %613 = vxpose.xlu2.b32.cont [5/16] (narrow) %v3529_v63, 8  ;;  %v3582_v63 = vld [vmem:[%s6353_s0 + $0x5c8] sm:$0xff] }
 0x129   :  { %335 = vxpose.xlu1.b32.cont [15/16] (narrow) %v3475_v40, 8  ;;  %v3560_v40 = vld [vmem:[%s6353_s0 + $0x518] sm:$0xff] }
 0x12a   :  { %470 = vxpose.xlu0.b32.cont [6/16] (narrow) %v3498_v26, 8  ;;  %v3551_v26 = vld [vmem:[%s6353_s0 + $0x4d0] sm:$0xff] }
 0x130   :  { %614 = vxpose.xlu2.b32.cont [6/16] (narrow) %v3530_v2, 8  ;;  %v3583_v2 = vld [vmem:[%s6353_s0 + $0x5d0] sm:$0xff] }
 0x131   :  { %336 = vxpose.xlu1.b32.end [16/16] (narrow) %v3476_v43, 8  ;;  %v3561_v43 = vld [vmem:[%s6353_s0 + $0x520] sm:$0xff] }
 0x132   :  { %471 = vxpose.xlu0.b32.cont [7/16] (narrow) %v3499_v29, 8  ;;  %v3552_v29 = vld [vmem:[%s6353_s0 + $0x4d8] sm:$0xff] }
 0x138   :  { %615 = vxpose.xlu2.b32.cont [7/16] (narrow) %v3531_v5, 8  ;;  %v3584_v5 = vld [vmem:[%s6353_s0 + $0x5d8] sm:$0xff] }
 0x139   :  { %537 = vxpose.xlu1.b32.start [1/16] (narrow) %v3509_v46, 8  ;;  %v3562_v46 = vld [vmem:[%s6353_s0 + $0x528] sm:$0xff] }
 0x13a   :  { %472 = vxpose.xlu0.b32.cont [8/16] (narrow) %v3500_v32, 8  ;;  %v3553_v32 = vld [vmem:[%s6353_s0 + $0x4e0] sm:$0xff] }
 0x140   :  { %616 = vxpose.xlu2.b32.cont [8/16] (narrow) %v3532_v9, 8  ;;  %v3585_v9 = vld [vmem:[%s6353_s0 + $0x5e0] sm:$0xff] }
 0x141   :  { %538 = vxpose.xlu1.b32.cont [2/16] (narrow) %v3510_v49, 8  ;;  %v3563_v49 = vld [vmem:[%s6353_s0 + $0x530] sm:$0xff] }
 0x142   :  { %473 = vxpose.xlu0.b32.cont [9/16] (narrow) %v3501_v35, 8  ;;  %v3554_v35 = vld [vmem:[%s6353_s0 + $0x4e8] sm:$0xff] }
 0x148   :  { %617 = vxpose.xlu2.b32.cont [9/16] (narrow) %v3533_v12, 8  ;;  %v3586_v12 = vld [vmem:[%s6353_s0 + $0x5e8] sm:$0xff] }
 0x149   :  { %539 = vxpose.xlu1.b32.cont [3/16] (narrow) %v3511_v52, 8  ;;  %v3564_v52 = vld [vmem:[%s6353_s0 + $0x538] sm:$0xff] }
 0x14a   :  { %474 = vxpose.xlu0.b32.cont [10/16] (narrow) %v3502_v38, 8  ;;  %v3555_v38 = vld [vmem:[%s6353_s0 + $0x4f0] sm:$0xff] }
 0x150   :  { %618 = vxpose.xlu2.b32.cont [10/16] (narrow) %v3534_v15, 8  ;;  %v3587_v15 = vld [vmem:[%s6353_s0 + $0x5f0] sm:$0xff] }
 0x151   :  { %540 = vxpose.xlu1.b32.cont [4/16] (narrow) %v3512_v55, 8  ;;  %v3565_v55 = vld [vmem:[%s6353_s0 + $0x540] sm:$0xff] }
 0x152   :  { %475 = vxpose.xlu0.b32.cont [11/16] (narrow) %v3503_v41, 8  ;;  %v3556_v41 = vld [vmem:[%s6353_s0 + $0x4f8] sm:$0xff] }
 0x158   :  { %619 = vxpose.xlu2.b32.cont [11/16] (narrow) %v3535_v18, 8  ;;  %v4558_v18 = vpop.permute.xlu1 %1899 }
 0x159   :  { %541 = vxpose.xlu1.b32.cont [5/16] (narrow) %v3513_v58, 8  ;;  %v3566_v58 = vld [vmem:[%s6353_s0 + $0x548] sm:$0xff]  ;;  %6368 = vst [vmem:[#allocation5_spill] sm:$0xff] %v4558_v18 }
 0x15a   :  { %476 = vxpose.xlu0.b32.cont [12/16] (narrow) %v3504_v44, 8  ;;  %v3589_v44 = vld [vmem:[%s6353_s0 + $0x600] sm:$0xff] }
 0x160   :  { %620 = vxpose.xlu2.b32.cont [12/16] (narrow) %v3536_v21, 8  ;;  %v1247_v21 = vld [vmem:[%s6355_s1 + $0x170] sm:$0xff] }
 0x161   :  { %542 = vxpose.xlu1.b32.cont [6/16] (narrow) %v3514_v61, 8  ;;  %v3567_v61 = vld [vmem:[%s6353_s0 + $0x550] sm:$0xff]  ;;  %1314 = vmatpush.msra.mxu1 %v1247_v21 }
 0x162   :  { %477 = vxpose.xlu0.b32.cont [13/16] (narrow) %v3505_v47, 8  ;;  %v3590_v47 = vld [vmem:[%s6353_s0 + $0x608] sm:$0xff] }
 0x168   :  { %621 = vxpose.xlu2.b32.cont [13/16] (narrow) %v3537_v24, 8  ;;  %v1244_v24 = vld [vmem:[%s6355_s1 + $0x158] sm:$0xff] }
 0x169   :  { %543 = vxpose.xlu1.b32.cont [7/16] (narrow) %v3515_v0, 8  ;;  %v3568_v0 = vld [vmem:[%s6353_s0 + $0x558] sm:$0xff]  ;;  %1315 = vmatpush.msra.mxu1 %v1244_v24  ;;  %v4742_v24 = vld [vmem:[%s6355_s1 + $0x68] sm:$0xff] }
 0x16a   :  { %478 = vxpose.xlu0.b32.cont [14/16] (narrow) %v3506_v50, 8  ;;  %v3591_v50 = vld [vmem:[%s6353_s0 + $0x610] sm:$0xff] }
 0x170   :  { %622 = vxpose.xlu2.b32.cont [14/16] (narrow) %v3538_v27, 8  ;;  %v1241_v27 = vld [vmem:[%s6355_s1 + $0x140] sm:$0xff] }
 0x171   :  { %544 = vxpose.xlu1.b32.cont [8/16] (narrow) %v3516_v3, 8  ;;  %v3569_v3 = vld [vmem:[%s6353_s0 + $0x560] sm:$0xff]  ;;  %1316 = vmatpush.msra.mxu1 %v1241_v27 }
 0x172   :  { %479 = vxpose.xlu0.b32.cont [15/16] (narrow) %v3507_v53, 8  ;;  %v3592_v53 = vld [vmem:[%s6353_s0 + $0x618] sm:$0xff] }
 0x178   :  { %623 = vxpose.xlu2.b32.cont [15/16] (narrow) %v3539_v30, 8  ;;  %v3602_v30 = vld [vmem:[%s6353_s0 + $0x668] sm:$0xff] }
 0x179   :  { %545 = vxpose.xlu1.b32.cont [9/16] (narrow) %v3517_v6, 8  ;;  %v3570_v6 = vld [vmem:[%s6353_s0 + $0x568] sm:$0xff] }
 0x17a   :  { %480 = vxpose.xlu0.b32.end [16/16] (narrow) %v3508_v56, 8  ;;  %v3593_v56 = vld [vmem:[%s6353_s0 + $0x620] sm:$0xff] }
 0x180   :  { %624 = vxpose.xlu2.b32.end [16/16] (narrow) %v3540_v33, 8  ;;  %v1239_v33 = vld [vmem:[%s6355_s1 + $0x130] sm:$0xff] }
 0x181   :  { %546 = vxpose.xlu1.b32.cont [10/16] (narrow) %v3518_v10, 8  ;;  %v3571_v10 = vld [vmem:[%s6353_s0 + $0x570] sm:$0xff] }
 0x182   :  { %682 = vxpose.xlu0.b32.start [1/16] (narrow) %v3541_v59, 8  ;;  %v3594_v59 = vld [vmem:[%s6353_s0 + $0x628] sm:$0xff] }
 0x188   :  { %826 = vxpose.xlu2.b32.start [1/16] (narrow) %v3573_v36, 8 }
 0x189   :  { %547 = vxpose.xlu1.b32.cont [11/16] (narrow) %v3519_v13, 8  ;;  %v3572_v13 = vld [vmem:[%s6353_s0 + $0x578] sm:$0xff] }
 0x18a   :  { %683 = vxpose.xlu0.b32.cont [2/16] (narrow) %v3542_v62, 8  ;;  %v3595_v62 = vld [vmem:[%s6353_s0 + $0x630] sm:$0xff] }
 0x190   :  { %827 = vxpose.xlu2.b32.cont [2/16] (narrow) %v3574_v39, 8 }
 0x191   :  { %548 = vxpose.xlu1.b32.cont [12/16] (narrow) %v3520_v16, 8  ;;  %v3605_v16 = vld [vmem:[%s6353_s0 + $0x680] sm:$0xff] }
 0x192   :  { %684 = vxpose.xlu0.b32.cont [3/16] (narrow) %v3543_v1, 8  ;;  %v3596_v1 = vld [vmem:[%s6353_s0 + $0x638] sm:$0xff] }
 0x198   :  { %828 = vxpose.xlu2.b32.cont [3/16] (narrow) %v3575_v42, 8 }
 0x199   :  { %549 = vxpose.xlu1.b32.cont [13/16] (narrow) %v3521_v19, 8  ;;  %v3588_v19 = vld [vmem:[%s6353_s0 + $0x5f8] sm:$0xff] }
 0x19a   :  { %685 = vxpose.xlu0.b32.cont [4/16] (narrow) %v3544_v4, 8  ;;  %v3597_v4 = vld [vmem:[%s6353_s0 + $0x640] sm:$0xff] }
 0x1a0   :  { %829 = vxpose.xlu2.b32.cont [4/16] (narrow) %v3576_v45, 8  ;;  %v1234_v45 = vld [vmem:[%s6355_s1 + $0x108] sm:$0xff] }
 0x1a1   :  { %550 = vxpose.xlu1.b32.cont [14/16] (narrow) %v3522_v22, 8  ;;  %v1248_v22 = vld [vmem:[%s6355_s1 + $0x178] sm:$0xff] }
 0x1a2   :  { %686 = vxpose.xlu0.b32.cont [5/16] (narrow) %v3545_v8, 8  ;;  %v3598_v8 = vld [vmem:[%s6353_s0 + $0x648] sm:$0xff]  ;;  %1379 = vmatpush.msra.mxu2 %v1248_v22  ;;  %v1213_v22 = vld [vmem:[%s6355_s1 + $0x60] sm:$0xff] }
 0x1a8   :  { %830 = vxpose.xlu2.b32.cont [5/16] (narrow) %v3577_v48, 8  ;;  %v1231_v48 = vld [vmem:[%s6355_s1 + $0xf0] sm:$0xff] }
 0x1a9   :  { %551 = vxpose.xlu1.b32.cont [15/16] (narrow) %v3523_v25, 8  ;;  %v1245_v25 = vld [vmem:[%s6355_s1 + $0x160] sm:$0xff] }
 0x1aa   :  { %687 = vxpose.xlu0.b32.cont [6/16] (narrow) %v3546_v11, 8  ;;  %v3599_v11 = vld [vmem:[%s6353_s0 + $0x650] sm:$0xff]  ;;  %1380 = vmatpush.msra.mxu2 %v1245_v25 }
 0x1ab   :  { %v4747_v25 = vld [vmem:[%s6355_s1 + $0x70] sm:$0xff] }
 0x1b0   :  { %831 = vxpose.xlu2.b32.cont [6/16] (narrow) %v3578_v51, 8  ;;  %v4641_v51 = vld [vmem:[%s6355_s1 + $0x100] sm:$0xff] }
 0x1b1   :  { %552 = vxpose.xlu1.b32.end [16/16] (narrow) %v3524_v28, 8  ;;  %v1242_v28 = vld [vmem:[%s6355_s1 + $0x148] sm:$0xff] }
 0x1b2   :  { %688 = vxpose.xlu0.b32.cont [7/16] (narrow) %v3547_v14, 8  ;;  %v3600_v14 = vld [vmem:[%s6353_s0 + $0x658] sm:$0xff]  ;;  %1381 = vmatpush.msra.mxu2 %v1242_v28 }
 0x1b4   :  { %1382 = vmatpush.msra.mxu2 %v1239_v33 }
 0x1b8   :  { %832 = vxpose.xlu2.b32.cont [7/16] (narrow) %v3579_v54, 8  ;;  %v4650_v54 = vld [vmem:[%s6355_s1 + $0xe0] sm:$0xff] }
 0x1b9   :  { %754 = vxpose.xlu1.b32.start [1/16] (narrow) %v3557_v31, 8  ;;  %v1237_v31 = vld [vmem:[%s6355_s1 + $0x120] sm:$0xff] }
 0x1ba   :  { %689 = vxpose.xlu0.b32.cont [8/16] (narrow) %v3548_v17, 8  ;;  %v3601_v17 = vld [vmem:[%s6353_s0 + $0x660] sm:$0xff] }
 0x1c0   :  { %833 = vxpose.xlu2.b32.cont [8/16] (narrow) %v3580_v57, 8  ;;  %v4660_v57 = vld [vmem:[%s6355_s1 + $0xe8] sm:$0xff] }
 0x1c1   :  { %755 = vxpose.xlu1.b32.cont [2/16] (narrow) %v3558_v34, 8  ;;  %v121_v34 = vpop.trf.xlu1 }
 0x1c2   :  { %690 = vxpose.xlu0.b32.cont [9/16] (narrow) %v3549_v20, 8  ;;  %v1246_v20 = vld [vmem:[%s6355_s1 + $0x168] sm:$0xff]  ;;  %v139_v36 = vrot.slane %v121_v34, 2  ;;  %152 = vst [vmem:[#allocation2 + $0x1] sm:$0x1] %v121_v34  ;;  %v141_v39 = vrot.slane %v121_v34, 4 }
 0x1c3   :  { %1249 = vmatpush.msra.mxu0 %v1246_v20  ;;  %1476 = vmatpush.msra.mxu3 %v1246_v20  ;;  %v143_v42 = vrot.slane %v121_v34, 6  ;;  %v3608_v20 = vld [vmem:[%s6353_s0 + $0x698] sm:$0xff] }
 0x1c4   :  { %154 = vst [vmem:[#allocation2 + $0x11] sm:$0x1] %v139_v36  ;;  %v4765_v36 = vld [vmem:[%s6355_s1 + $0x50] sm:$0xff] }
 0x1c5   :  { %156 = vst [vmem:[#allocation2 + $0x21] sm:$0x1] %v141_v39  ;;  %v4778_v39 = vld [vmem:[%s6355_s1 + $0x38] sm:$0xff] }
 0x1c6   :  { %158 = vst [vmem:[#allocation2 + $0x31] sm:$0x1] %v143_v42  ;;  %v3638_v42 = vld [vmem:[%s6353_s0 + $0x788] sm:$0xff] }
 0x1c8   :  { %834 = vxpose.xlu2.b32.cont [9/16] (narrow) %v3581_v60, 8  ;;  %v4670_v60 = vld [vmem:[%s6355_s1 + $0xc8] sm:$0xff] }
 0x1c9   :  { %756 = vxpose.xlu1.b32.cont [3/16] (narrow) %v3559_v37, 8  ;;  %v140_v37 = vrot.slane %v121_v34, 3  ;;  %v337_v27 = vpop.trf.xlu1 }
 0x1ca   :  { %691 = vxpose.xlu0.b32.cont [10/16] (narrow) %v3550_v23, 8  ;;  %v1243_v23 = vld [vmem:[%s6355_s1 + $0x150] sm:$0xff]  ;;  %v354_v28 = vrot.slane %v337_v27, 1  ;;  %368 = vst [vmem:[#allocation2 + $0x4] sm:$0x1] %v337_v27  ;;  %v359_v33 = vrot.slane %v337_v27, 6 }
 0x1cb   :  { %1250 = vmatpush.msra.mxu0 %v1243_v23  ;;  %1477 = vmatpush.msra.mxu3 %v1243_v23  ;;  %155 = vst [vmem:[#allocation2 + $0x19] sm:$0x1] %v140_v37  ;;  %v4770_v37 = vld [vmem:[%s6355_s1 + $0x58] sm:$0xff] }
 0x1cc   :  { %369 = vst [vmem:[#allocation2 + $0xc] sm:$0x1] %v354_v28 }
 0x1cd   :  { %374 = vst [vmem:[#allocation2 + $0x34] sm:$0x1] %v359_v33 }
 0x1d0   :  { %835 = vxpose.xlu2.b32.cont [10/16] (narrow) %v3582_v63, 8 }
 0x1d1   :  { %757 = vxpose.xlu1.b32.cont [4/16] (narrow) %v3560_v40, 8  ;;  %v3603_v40 = vld [vmem:[%s6353_s0 + $0x670] sm:$0xff] }
 0x1d2   :  { %692 = vxpose.xlu0.b32.cont [11/16] (narrow) %v3551_v26, 8  ;;  %v1240_v26 = vld [vmem:[%s6355_s1 + $0x138] sm:$0xff] }
 0x1d3   :  { %1251 = vmatpush.msra.mxu0 %v1240_v26  ;;  %1478 = vmatpush.msra.mxu3 %v1240_v26  ;;  %v3637_v26 = vld [vmem:[%s6353_s0 + $0x780] sm:$0xff] }
 0x1d5   :  { %1252 = vmatpush.msra.mxu0 %v1237_v31  ;;  %1479 = vmatpush.msra.mxu3 %v1237_v31  ;;  %v357_v31 = vrot.slane %v337_v27, 4 }
 0x1d7   :  { %1253 = vmatpush.msra.mxu0 %v1234_v45  ;;  %1480 = vmatpush.msra.mxu3 %v1234_v45  ;;  %372 = vst [vmem:[#allocation2 + $0x24] sm:$0x1] %v357_v31  ;;  %v4796_v45 = vld [vmem:[%s6355_s1 + $0x20] sm:$0xff] }
 0x1d8   :  { %836 = vxpose.xlu2.b32.cont [11/16] (narrow) %v3583_v2, 8  ;;  %v193_v2 = vpop.trf.xlu2 }
 0x1d9   :  { %758 = vxpose.xlu1.b32.cont [5/16] (narrow) %v3561_v43, 8  ;;  %v144_v43 = vrot.slane %v121_v34, 7  ;;  %1254 = vmatpush.msra.mxu0 %v1231_v48  ;;  %224 = vst [vmem:[#allocation2 + $0x2] sm:$0x1] %v193_v2  ;;  %v215_v21 = vrot.slane %v193_v2, 6  ;;  %v216_v23 = vrot.slane %v193_v2, 7 }
 0x1da   :  { %693 = vxpose.xlu0.b32.cont [12/16] (narrow) %v3552_v29, 8  ;;  %v3606_v29 = vld [vmem:[%s6353_s0 + $0x688] sm:$0xff]  ;;  %1481 = vmatpush.msra.mxu3 %v1231_v48 }
 0x1db   :  { %159 = vst [vmem:[#allocation2 + $0x39] sm:$0x1] %v144_v43 }
 0x1dc   :  { %230 = vst [vmem:[#allocation2 + $0x32] sm:$0x1] %v215_v21 }
 0x1dd   :  { %231 = vst [vmem:[#allocation2 + $0x3a] sm:$0x1] %v216_v23  ;;  %v3640_v23 = vld [vmem:[%s6353_s0 + $0x798] sm:$0xff] }
 0x1e0   :  { %837 = vxpose.xlu2.b32.cont [12/16] (narrow) %v3584_v5, 8  ;;  %v212_v5 = vrot.slane %v193_v2, 3 }
 0x1e1   :  { %759 = vxpose.xlu1.b32.cont [6/16] (narrow) %v3562_v46, 8  ;;  %v4620_v46 = vld [vmem:[%s6355_s1 + $0x110] sm:$0xff] }
 0x1e2   :  { %694 = vxpose.xlu0.b32.cont [13/16] (narrow) %v3553_v32, 8  ;;  %v1238_v32 = vld [vmem:[%s6355_s1 + $0x128] sm:$0xff]  ;;  %227 = vst [vmem:[#allocation2 + $0x1a] sm:$0x1] %v212_v5  ;;  %v409_v5 = vpop.trf.xlu2 }
 0x1e3   :  { %1317 = vmatpush.msra.mxu1 %v1238_v32  ;;  %v358_v32 = vrot.slane %v337_v27, 5  ;;  %440 = vst [vmem:[#allocation2 + $0x5] sm:$0x1] %v409_v5  ;;  %v432_v21 = vrot.slane %v409_v5, 7 }
 0x1e5   :  { %1318 = vmatpush.msra.mxu1 %v4620_v46  ;;  %373 = vst [vmem:[#allocation2 + $0x2c] sm:$0x1] %v358_v32 }
 0x1e6   :  { %447 = vst [vmem:[#allocation2 + $0x3d] sm:$0x1] %v432_v21  ;;  %v3631_v21 = vld [vmem:[%s6353_s0 + $0x750] sm:$0xff] }
 0x1e8   :  { %838 = vxpose.xlu2.b32.cont [13/16] (narrow) %v3585_v9, 8  ;;  %v4696_v9 = vld [vmem:[%s6355_s1 + $0xb0] sm:$0xff] }
 0x1e9   :  { %760 = vxpose.xlu1.b32.cont [7/16] (narrow) %v3563_v49, 8 }
 0x1ea   :  { %695 = vxpose.xlu0.b32.cont [14/16] (narrow) %v3554_v35, 8  ;;  %v138_v35 = vrot.slane %v121_v34, 1 }
 0x1ec   :  { %153 = vst [vmem:[#allocation2 + $0x9] sm:$0x1] %v138_v35  ;;  %v1210_v35 = vld [vmem:[%s6355_s1 + $0x48] sm:$0xff] }
 0x1f0   :  { %839 = vxpose.xlu2.b32.cont [14/16] (narrow) %v3586_v12, 8  ;;  %v4709_v12 = vld [vmem:[%s6355_s1 + $0x98] sm:$0xff] }
 0x1f1   :  { %761 = vxpose.xlu1.b32.cont [8/16] (narrow) %v3564_v52, 8  ;;  %v1228_v52 = vld [vmem:[%s6355_s1 + $0xd8] sm:$0xff] }
 0x1f2   :  { %696 = vxpose.xlu0.b32.cont [15/16] (narrow) %v3555_v38, 8  ;;  %v4605_v38 = vpop.trf.xlu0  ;;  %1255 = vmatpush.msra.mxu0 %v1228_v52 }
 0x1f3   :  { %80 = vst [vmem:[#allocation2] sm:$0x1] %v4605_v38  ;;  %v66_v49 = vrot.slane %v4605_v38, 1  ;;  %v71_v63 = vrot.slane %v4605_v38, 6  ;;  %1482 = vmatpush.msra.mxu3 %v1228_v52  ;;  %v3609_v52 = vld [vmem:[%s6353_s0 + $0x6a0] sm:$0xff] }
 0x1f5   :  { %81 = vst [vmem:[#allocation2 + $0x8] sm:$0x1] %v66_v49  ;;  %v4803_v49 = vld [vmem:[%s6355_s1 + $0x28] sm:$0xff] }
 0x1f6   :  { %86 = vst [vmem:[#allocation2 + $0x30] sm:$0x1] %v71_v63 }
 0x1f8   :  { %840 = vxpose.xlu2.b32.cont [15/16] (narrow) %v3587_v15, 8  ;;  %v1216_v15 = vld [vmem:[%s6355_s1 + $0x78] sm:$0xff] }
 0x1f9   :  { %762 = vxpose.xlu1.b32.cont [9/16] (narrow) %v3565_v55, 8  ;;  %v3607_v55 = vld [vmem:[%s6353_s0 + $0x690] sm:$0xff] }
 0x1fa   :  { %697 = vxpose.xlu0.b32.end [16/16] (narrow) %v3556_v41, 8  ;;  %v142_v41 = vrot.slane %v121_v34, 5  ;;  %v3623_v34 = vld [vmem:[%s6353_s0 + $0x710] sm:$0xff]  ;;  %v265_v43 = vpop.trf.xlu0 }
 0x1fb   :  { %v282_v48 = vrot.slane %v265_v43, 1  ;;  %v285_v63 = vrot.slane %v265_v43, 4  ;;  %296 = vst [vmem:[#allocation2 + $0x3] sm:$0x1] %v265_v43 }
 0x1fc   :  { %157 = vst [vmem:[#allocation2 + $0x29] sm:$0x1] %v142_v41  ;;  %v4785_v41 = vld [vmem:[%s6355_s1 + $0x40] sm:$0xff] }
 0x1fd   :  { %297 = vst [vmem:[#allocation2 + $0xb] sm:$0x1] %v282_v48  ;;  %v3627_v48 = vld [vmem:[%s6353_s0 + $0x730] sm:$0xff] }
 0x1fe   :  { %300 = vst [vmem:[#allocation2 + $0x23] sm:$0x1] %v285_v63  ;;  %v3642_v63 = vld [vmem:[%s6353_s0 + $0x7a8] sm:$0xff] }
 0x200   :  { %841 = vxpose.xlu2.b32.end [16/16] (narrow) %v3588_v19, 8  ;;  %v4729_v19 = vld [vmem:[%s6355_s1 + $0x88] sm:$0xff] }
 0x201   :  { %763 = vxpose.xlu1.b32.cont [10/16] (narrow) %v3566_v58, 8  ;;  %v1225_v58 = vld [vmem:[%s6355_s1 + $0xc0] sm:$0xff] }
 0x202   :  { %898 = vxpose.xlu0.b32.start [1/16] (narrow) %v3589_v44, 8  ;;  %v3621_v44 = vld [vmem:[%s6353_s0 + $0x700] sm:$0xff]  ;;  %1256 = vmatpush.msra.mxu0 %v1225_v58 }
 0x203   :  { %1483 = vmatpush.msra.mxu3 %v1225_v58  ;;  %v284_v58 = vrot.slane %v265_v43, 3 }
 0x205   :  { %299 = vst [vmem:[#allocation2 + $0x1b] sm:$0x1] %v284_v58 }
 0x208   :  { %1042 = vxpose.xlu2.b32.start [1/16] (narrow) %v3621_v44, 8  ;;  %v1204_v44 = vld [vmem:[%s6355_s1 + $0x18] sm:$0xff] }
 0x209   :  { %764 = vxpose.xlu1.b32.cont [11/16] (narrow) %v3567_v61, 8  ;;  %v70_v61 = vrot.slane %v4605_v38, 5 }
 0x20a   :  { %899 = vxpose.xlu0.b32.cont [2/16] (narrow) %v3590_v47, 8  ;;  %v4625_v47 = vld [vmem:[%s6355_s1 + $0x118] sm:$0xff] }
 0x20b   :  { %1383 = vmatpush.msra.mxu2 %v4625_v47  ;;  %85 = vst [vmem:[#allocation2 + $0x28] sm:$0x1] %v70_v61  ;;  %v3624_v61 = vld [vmem:[%s6353_s0 + $0x718] sm:$0xff] }
 0x20d   :  { %1384 = vmatpush.msra.mxu2 %v4641_v51 }
 0x20f   :  { %1385 = vmatpush.msra.mxu2 %v4660_v57 }
 0x211   :  { %765 = vxpose.xlu1.b32.cont [12/16] (narrow) %v3568_v0, 8  ;;  %v72_v0 = vrot.slane %v4605_v38, 7 }
 0x212   :  { %900 = vxpose.xlu0.b32.cont [3/16] (narrow) %v3591_v50, 8  ;;  %v4636_v50 = vld [vmem:[%s6355_s1 + $0xf8] sm:$0xff] }
 0x213   :  { %1319 = vmatpush.msra.mxu1 %v4636_v50  ;;  %87 = vst [vmem:[#allocation2 + $0x38] sm:$0x1] %v72_v0  ;;  %v286_v0 = vrot.slane %v265_v43, 5 }
 0x215   :  { %1320 = vmatpush.msra.mxu1 %v4650_v54  ;;  %301 = vst [vmem:[#allocation2 + $0x2b] sm:$0x1] %v286_v0 }
 0x217   :  { %1321 = vmatpush.msra.mxu1 %v4670_v60 }
 0x219   :  { %766 = vxpose.xlu1.b32.cont [13/16] (narrow) %v3569_v3, 8  ;;  %v210_v3 = vrot.slane %v193_v2, 1  ;;  %1322 = vmatpush.msra.mxu1 %v4696_v9 }
 0x21a   :  { %901 = vxpose.xlu0.b32.cont [4/16] (narrow) %v3592_v53, 8  ;;  %v67_v53 = vrot.slane %v4605_v38, 2 }
 0x21b   :  { %225 = vst [vmem:[#allocation2 + $0xa] sm:$0x1] %v210_v3  ;;  %1323 = vmatpush.msra.mxu1 %v4709_v12  ;;  %v3610_v3 = vld [vmem:[%s6353_s0 + $0x6a8] sm:$0xff] }
 0x21c   :  { %82 = vst [vmem:[#allocation2 + $0x10] sm:$0x1] %v67_v53  ;;  %v283_v53 = vrot.slane %v265_v43, 2 }
 0x21e   :  { %298 = vst [vmem:[#allocation2 + $0x13] sm:$0x1] %v283_v53 }
 0x221   :  { %767 = vxpose.xlu1.b32.cont [14/16] (narrow) %v3570_v6, 8  ;;  %v3622_v6 = vld [vmem:[%s6353_s0 + $0x708] sm:$0xff] }
 0x222   :  { %902 = vxpose.xlu0.b32.cont [5/16] (narrow) %v3593_v56, 8  ;;  %v68_v56 = vrot.slane %v4605_v38, 3  ;;  %1043 = vxpose.xlu2.b32.cont [2/16] (narrow) %v3622_v6, 8  ;;  %v426_v6 = vrot.slane %v409_v5, 1 }
 0x224   :  { %83 = vst [vmem:[#allocation2 + $0x18] sm:$0x1] %v68_v56  ;;  %v4814_v56 = vld [vmem:[%s6355_s1 + $0x8] sm:$0xff] }
 0x225   :  { %441 = vst [vmem:[#allocation2 + $0xd] sm:$0x1] %v426_v6  ;;  %v3615_v6 = vld [vmem:[%s6353_s0 + $0x6d0] sm:$0xff] }
 0x229   :  { %768 = vxpose.xlu1.b32.cont [15/16] (narrow) %v3571_v10, 8  ;;  %v4701_v10 = vld [vmem:[%s6355_s1 + $0xb8] sm:$0xff] }
 0x22a   :  { %903 = vxpose.xlu0.b32.cont [6/16] (narrow) %v3594_v59, 8  ;;  %v69_v59 = vrot.slane %v4605_v38, 4  ;;  %1044 = vxpose.xlu2.b32.cont [3/16] (narrow) %v3623_v34, 8  ;;  %v1207_v38 = vld [vmem:[%s6355_s1 + $0x30] sm:$0xff] }
 0x22c   :  { %84 = vst [vmem:[#allocation2 + $0x20] sm:$0x1] %v69_v59  ;;  %v4820_v59 = vld [vmem:[%s6355_s1 + $0x10] sm:$0xff] }
 0x231   :  { %769 = vxpose.xlu1.b32.end [16/16] (narrow) %v3572_v13, 8  ;;  %v4714_v13 = vld [vmem:[%s6355_s1 + $0xa0] sm:$0xff] }
 0x232   :  { %904 = vxpose.xlu0.b32.cont [7/16] (narrow) %v3595_v62, 8  ;;  %v4677_v62 = vld [vmem:[%s6355_s1 + $0xd0] sm:$0xff]  ;;  %1045 = vxpose.xlu2.b32.cont [4/16] (narrow) %v3624_v61, 8  ;;  %v3613_v61 = vld [vmem:[%s6353_s0 + $0x6c0] sm:$0xff] }
 0x233   :  { %1386 = vmatpush.msra.mxu2 %v4677_v62 }
 0x235   :  { %1387 = vmatpush.msra.mxu2 %v4701_v10 }
 0x237   :  { %1388 = vmatpush.msra.mxu2 %v4714_v13 }
 0x239   :  { %970 = vxpose.xlu1.b32.start [1/16] (narrow) %v3605_v16, 8  ;;  %v214_v16 = vrot.slane %v193_v2, 5  ;;  %1389 = vmatpush.msra.mxu2 %v4729_v19 }
 0x23a   :  { %905 = vxpose.xlu0.b32.cont [8/16] (narrow) %v3596_v1, 8  ;;  %v3604_v1 = vld [vmem:[%s6353_s0 + $0x678] sm:$0xff] }
 0x23b   :  { %229 = vst [vmem:[#allocation2 + $0x2a] sm:$0x1] %v214_v16  ;;  %1390 = vmatpush.msra.mxu2 %v4747_v25  ;;  %v430_v16 = vrot.slane %v409_v5, 5 }
 0x23d   :  { %1391 = vmatpush.msra.mxu2 %v4770_v37  ;;  %445 = vst [vmem:[#allocation2 + $0x2d] sm:$0x1] %v430_v16  ;;  %v3645_v16 = vld [vmem:[%s6353_s0 + $0x7c0] sm:$0xff] }
 0x23f   :  { %1392 = vmatpush.msra.mxu2 %v4785_v41 }
 0x241   :  { %971 = vxpose.xlu1.b32.cont [2/16] (narrow) %v3606_v29, 8  ;;  %v355_v29 = vrot.slane %v337_v27, 2  ;;  %1393 = vmatpush.msra.mxu2 %v4803_v49 }
 0x242   :  { %906 = vxpose.xlu0.b32.cont [9/16] (narrow) %v3597_v4, 8  ;;  %v211_v4 = vrot.slane %v193_v2, 2 }
 0x243   :  { %370 = vst [vmem:[#allocation2 + $0x14] sm:$0x1] %v355_v29  ;;  %1394 = vmatpush.msra.mxu2 %v4820_v59 }
 0x244   :  { %226 = vst [vmem:[#allocation2 + $0x12] sm:$0x1] %v211_v4  ;;  %v3639_v4 = vld [vmem:[%s6353_s0 + $0x790] sm:$0xff] }
 0x249   :  { %972 = vxpose.xlu1.b32.cont [3/16] (narrow) %v3607_v55, 8  ;;  %v1201_v55 = vld [vmem:[%s6355_s1] sm:$0xff] }
 0x24a   :  { %907 = vxpose.xlu0.b32.cont [10/16] (narrow) %v3598_v8, 8  ;;  %v1222_v8 = vld [vmem:[%s6355_s1 + $0xa8] sm:$0xff] }
 0x24b   :  { %1257 = vmatpush.msra.mxu0 %v1222_v8  ;;  %1484 = vmatpush.msra.mxu3 %v1222_v8  ;;  %v427_v8 = vrot.slane %v409_v5, 2 }
 0x24d   :  { %442 = vst [vmem:[#allocation2 + $0x15] sm:$0x1] %v427_v8  ;;  %v3644_v8 = vld [vmem:[%s6353_s0 + $0x7b8] sm:$0xff] }
 0x251   :  { %973 = vxpose.xlu1.b32.cont [4/16] (narrow) %v3608_v20, 8  ;;  %v431_v20 = vrot.slane %v409_v5, 6 }
 0x252   :  { %908 = vxpose.xlu0.b32.cont [11/16] (narrow) %v3599_v11, 8  ;;  %v1219_v11 = vld [vmem:[%s6355_s1 + $0x90] sm:$0xff] }
 0x253   :  { %1258 = vmatpush.msra.mxu0 %v1219_v11  ;;  %1485 = vmatpush.msra.mxu3 %v1219_v11  ;;  %v428_v11 = vrot.slane %v409_v5, 3  ;;  %446 = vst [vmem:[#allocation2 + $0x35] sm:$0x1] %v431_v20 }
 0x255   :  { %1259 = vmatpush.msra.mxu0 %v1216_v15  ;;  %1486 = vmatpush.msra.mxu3 %v1216_v15  ;;  %v429_v15 = vrot.slane %v409_v5, 4  ;;  %443 = vst [vmem:[#allocation2 + $0x1d] sm:$0x1] %v428_v11  ;;  %v3629_v5 = vld [vmem:[%s6353_s0 + $0x740] sm:$0xff] }
 0x257   :  { %1260 = vmatpush.msra.mxu0 %v1213_v22  ;;  %1487 = vmatpush.msra.mxu3 %v1213_v22  ;;  %v3611_v22 = vld [vmem:[%s6353_s0 + $0x6b0] sm:$0xff]  ;;  %444 = vst [vmem:[#allocation2 + $0x25] sm:$0x1] %v429_v15  ;;  %v3616_v15 = vld [vmem:[%s6353_s0 + $0x6d8] sm:$0xff] }
 0x259   :  { %1261 = vmatpush.msra.mxu0 %v1210_v35  ;;  %974 = vxpose.xlu1.b32.cont [5/16] (narrow) %v3609_v52, 8 }
 0x25a   :  { %909 = vxpose.xlu0.b32.cont [12/16] (narrow) %v3600_v14, 8  ;;  %v213_v14 = vrot.slane %v193_v2, 4  ;;  %1488 = vmatpush.msra.mxu3 %v1210_v35  ;;  %v288_v2 = vrot.slane %v265_v43, 7  ;;  %v3612_v35 = vld [vmem:[%s6353_s0 + $0x6b8] sm:$0xff] }
 0x25b   :  { %1262 = vmatpush.msra.mxu0 %v1207_v38 }
 0x25c   :  { %228 = vst [vmem:[#allocation2 + $0x22] sm:$0x1] %v213_v14  ;;  %1489 = vmatpush.msra.mxu3 %v1207_v38  ;;  %v3625_v14 = vld [vmem:[%s6353_s0 + $0x720] sm:$0xff]  ;;  %v481_v38 = vpop.trf.xlu0 }
 0x25d   :  { %1263 = vmatpush.msra.mxu0 %v1204_v44  ;;  %303 = vst [vmem:[#allocation2 + $0x3b] sm:$0x1] %v288_v2  ;;  %1046 = vxpose.xlu2.b32.cont [5/16] (narrow) %v3625_v14, 8  ;;  %v501_v52 = vrot.slane %v481_v38, 4  ;;  %v502_v53 = vrot.slane %v481_v38, 5  ;;  %v504_v58 = vrot.slane %v481_v38, 7 }
 0x25e   :  { %1490 = vmatpush.msra.mxu3 %v1204_v44  ;;  %v500_v44 = vrot.slane %v481_v38, 3  ;;  %512 = vst [vmem:[#allocation2 + $0x6] sm:$0x1] %v481_v38  ;;  %v3614_v2 = vld [vmem:[%s6353_s0 + $0x6c8] sm:$0xff] }
 0x25f   :  { %1264 = vmatpush.msra.mxu0 %v1201_v55  ;;  %516 = vst [vmem:[#allocation2 + $0x26] sm:$0x1] %v501_v52  ;;  %v3630_v14 = vld [vmem:[%s6353_s0 + $0x748] sm:$0xff] }
 0x260   :  { %1491 = vmatpush.msra.mxu3 %v1201_v55  ;;  %v503_v55 = vrot.slane %v481_v38, 6  ;;  %515 = vst [vmem:[#allocation2 + $0x1e] sm:$0x1] %v500_v44 }
 0x261   :  { %975 = vxpose.xlu1.b32.cont [6/16] (narrow) %v3610_v3, 8  ;;  %517 = vst [vmem:[#allocation2 + $0x2e] sm:$0x1] %v502_v53  ;;  %v3643_v3 = vld [vmem:[%s6353_s0 + $0x7b0] sm:$0xff]  ;;  %v3620_v53 = vld [vmem:[%s6353_s0 + $0x6f8] sm:$0xff] }
 0x262   :  { %910 = vxpose.xlu0.b32.cont [13/16] (narrow) %v3601_v17, 8  ;;  %v4724_v17 = vld [vmem:[%s6355_s1 + $0x80] sm:$0xff]  ;;  %518 = vst [vmem:[#allocation2 + $0x36] sm:$0x1] %v503_v55 }
 0x263   :  { %1324 = vmatpush.msra.mxu1 %v4724_v17  ;;  %519 = vst [vmem:[#allocation2 + $0x3e] sm:$0x1] %v504_v58  ;;  %v3649_v58 = vld [vmem:[%s6353_s0 + $0x7e0] sm:$0xff] }
 0x265   :  { %1325 = vmatpush.msra.mxu1 %v4742_v24 }
 0x267   :  { %1326 = vmatpush.msra.mxu1 %v4765_v36 }
 0x269   :  { %1327 = vmatpush.msra.mxu1 %v4778_v39  ;;  %976 = vxpose.xlu1.b32.cont [7/16] (narrow) %v3611_v22, 8  ;;  %v3617_v22 = vld [vmem:[%s6353_s0 + $0x6e0] sm:$0xff] }
 0x26a   :  { %911 = vxpose.xlu0.b32.cont [14/16] (narrow) %v3602_v30, 8  ;;  %v356_v30 = vrot.slane %v337_v27, 3 }
 0x26b   :  { %1328 = vmatpush.msra.mxu1 %v4796_v45 }
 0x26c   :  { %371 = vst [vmem:[#allocation2 + $0x1c] sm:$0x1] %v356_v30  ;;  %v3626_v30 = vld [vmem:[%s6353_s0 + $0x728] sm:$0xff] }
 0x26d   :  { %1329 = vmatpush.msra.mxu1 %v4814_v56  ;;  %1047 = vxpose.xlu2.b32.cont [6/16] (narrow) %v3626_v30, 8 }
 0x271   :  { %977 = vxpose.xlu1.b32.cont [8/16] (narrow) %v3612_v35, 8  ;;  %v3634_v35 = vld [vmem:[%s6353_s0 + $0x768] sm:$0xff] }
 0x272   :  { %912 = vxpose.xlu0.b32.cont [15/16] (narrow) %v3603_v40, 8  ;;  %v360_v40 = vrot.slane %v337_v27, 7 }
 0x274   :  { %375 = vst [vmem:[#allocation2 + $0x3c] sm:$0x1] %v360_v40  ;;  %v3641_v40 = vld [vmem:[%s6353_s0 + $0x7a0] sm:$0xff] }
 0x275   :  { %1048 = vxpose.xlu2.b32.cont [7/16] (narrow) %v3627_v48, 8 }
 0x279   :  { %978 = vxpose.xlu1.b32.cont [9/16] (narrow) %v3613_v61, 8 }
 0x27a   :  { %913 = vxpose.xlu0.b32.end [16/16] (narrow) %v3604_v1, 8  ;;  %v287_v1 = vrot.slane %v265_v43, 6  ;;  %v499_v43 = vrot.slane %v481_v38, 2 }
 0x27c   :  { %302 = vst [vmem:[#allocation2 + $0x33] sm:$0x1] %v287_v1  ;;  %v3628_v1 = vld [vmem:[%s6353_s0 + $0x738] sm:$0xff] }
 0x27d   :  { %514 = vst [vmem:[#allocation2 + $0x16] sm:$0x1] %v499_v43  ;;  %1049 = vxpose.xlu2.b32.cont [8/16] (narrow) %v3628_v1, 8 }
 0x281   :  { %979 = vxpose.xlu1.b32.cont [10/16] (narrow) %v3614_v2, 8 }
 0x282   :  { %1114 = vxpose.xlu0.b32.start [1/16] (narrow) %v3637_v26, 8  ;;  %v553_v26 = vpop.trf.xlu1 }
 0x283   :  { %v570_v27 = vrot.slane %v553_v26, 1  ;;  %v571_v28 = vrot.slane %v553_v26, 2  ;;  %v572_v29 = vrot.slane %v553_v26, 3  ;;  %v573_v31 = vrot.slane %v553_v26, 4  ;;  %584 = vst [vmem:[#allocation2 + $0x7] sm:$0x1] %v553_v26 }
 0x284   :  { %v574_v32 = vrot.slane %v553_v26, 5  ;;  %v575_v33 = vrot.slane %v553_v26, 6  ;;  %v576_v34 = vrot.slane %v553_v26, 7 }
 0x285   :  { %585 = vst [vmem:[#allocation2 + $0xf] sm:$0x1] %v570_v27  ;;  %1050 = vxpose.xlu2.b32.cont [9/16] (narrow) %v3629_v5, 8  ;;  %v3632_v27 = vld [vmem:[%s6353_s0 + $0x758] sm:$0xff] }
 0x286   :  { %586 = vst [vmem:[#allocation2 + $0x17] sm:$0x1] %v571_v28  ;;  %v3618_v28 = vld [vmem:[%s6353_s0 + $0x6e8] sm:$0xff] }
 0x287   :  { %587 = vst [vmem:[#allocation2 + $0x1f] sm:$0x1] %v572_v29  ;;  %v3647_v29 = vld [vmem:[%s6353_s0 + $0x7d0] sm:$0xff] }
 0x288   :  { %588 = vst [vmem:[#allocation2 + $0x27] sm:$0x1] %v573_v31  ;;  %v3633_v31 = vld [vmem:[%s6353_s0 + $0x760] sm:$0xff] }
 0x289   :  { %589 = vst [vmem:[#allocation2 + $0x2f] sm:$0x1] %v574_v32  ;;  %980 = vxpose.xlu1.b32.cont [11/16] (narrow) %v3615_v6, 8  ;;  %v3619_v32 = vld [vmem:[%s6353_s0 + $0x6f0] sm:$0xff] }
 0x28a   :  { %1115 = vxpose.xlu0.b32.cont [2/16] (narrow) %v3638_v42, 8  ;;  %v498_v42 = vrot.slane %v481_v38, 1  ;;  %590 = vst [vmem:[#allocation2 + $0x37] sm:$0x1] %v575_v33  ;;  %v4861_v0 = vld [vmem:[#allocation2] sm:$0xff]  ;;  %v3648_v33 = vld [vmem:[%s6353_s0 + $0x7d8] sm:$0xff]  ;;  %v625_v38 = vpop.trf.xlu2 }
 0x28b   :  { %591 = vst [vmem:[#allocation2 + $0x3f] sm:$0x1] %v576_v34  ;;  %1265 = vmatmul.f32.vlgmr.msra.gmra.mxu0 %v4861_v0  ;;  %1330 = vmatmul.f32.vlgmr.msra.gmra.mxu1 %v4861_v0  ;;  %v643_v43 = vrot.slane %v625_v38, 2  ;;  %v644_v44 = vrot.slane %v625_v38, 3  ;;  %v645_v48 = vrot.slane %v625_v38, 4  ;;  %v646_v52 = vrot.slane %v625_v38, 5 }
 0x28c   :  { %513 = vst [vmem:[#allocation2 + $0xe] sm:$0x1] %v498_v42  ;;  %1395 = vmatmul.f32.vlgmr.msra.gmra.mxu2 %v4861_v0  ;;  %v642_v42 = vrot.slane %v625_v38, 1  ;;  %v647_v55 = vrot.slane %v625_v38, 6  ;;  %v648_v61 = vrot.slane %v625_v38, 7 }
 0x28d   :  { %v4889_v11 = vld [vmem:[#allocation2 + $0x10] sm:$0xff]  ;;  %1051 = vxpose.xlu2.b32.cont [10/16] (narrow) %v3630_v14, 8  ;;  %657 = vst [vmem:[#allocation2 + $0x40] sm:$0x1] %v625_v38 }
 0x28e   :  { %v4903_v20 = vld [vmem:[#allocation2 + $0x18] sm:$0xff]  ;;  %658 = vst [vmem:[#allocation2 + $0x48] sm:$0x1] %v642_v42  ;;  %v3651_v38 = vld [vmem:[%s6353_s0 + $0x7f0] sm:$0xff] }
 0x28f   :  { %v4917_v26 = vld [vmem:[#allocation2 + $0x20] sm:$0xff]  ;;  %659 = vst [vmem:[#allocation2 + $0x50] sm:$0x1] %v643_v43 }
 0x290   :  { %v4931_v30 = vld [vmem:[#allocation2 + $0x28] sm:$0xff]  ;;  %660 = vst [vmem:[#allocation2 + $0x58] sm:$0x1] %v644_v44 }
 0x291   :  { %981 = vxpose.xlu1.b32.cont [12/16] (narrow) %v3616_v15, 8  ;;  %v4945_v34 = vld [vmem:[#allocation2 + $0x30] sm:$0xff]  ;;  %661 = vst [vmem:[#allocation2 + $0x60] sm:$0x1] %v645_v48 }
 0x292   :  { %1116 = vxpose.xlu0.b32.cont [3/16] (narrow) %v3639_v4, 8  ;;  %662 = vst [vmem:[#allocation2 + $0x68] sm:$0x1] %v646_v52  ;;  %v842_v15 = vpop.trf.xlu2 }
 0x293   :  { %v4875_v4 = vld [vmem:[#allocation2 + $0x8] sm:$0xff]  ;;  %663 = vst [vmem:[#allocation2 + $0x70] sm:$0x1] %v647_v55 }
 0x294   :  { %1268 = vmatmul.f32.gmra.mxu0 %v4875_v4  ;;  %1333 = vmatmul.f32.gmra.mxu1 %v4875_v4  ;;  %664 = vst [vmem:[#allocation2 + $0x78] sm:$0x1] %v648_v61 }
 0x295   :  { %1398 = vmatmul.f32.gmra.mxu2 %v4875_v4  ;;  %1052 = vxpose.xlu2.b32.cont [11/16] (narrow) %v3631_v21, 8  ;;  %v3650_v21 = vld [vmem:[%s6353_s0 + $0x7e8] sm:$0xff]  ;;  %873 = vst [vmem:[#allocation2 + $0x43] sm:$0x1] %v842_v15 }
 0x299   :  { %982 = vxpose.xlu1.b32.cont [13/16] (narrow) %v3617_v22, 8  ;;  %v859_v22 = vrot.slane %v842_v15, 1 }
 0x29a   :  { %1117 = vxpose.xlu0.b32.cont [4/16] (narrow) %v3640_v23, 8  ;;  %v3646_v23 = vld [vmem:[%s6353_s0 + $0x7c8] sm:$0xff] }
 0x29b   :  { %874 = vst [vmem:[#allocation2 + $0x4b] sm:$0x1] %v859_v22 }
 0x29c   :  { %1271 = vmatmul.f32.gmra.mxu0 %v4889_v11  ;;  %1336 = vmatmul.f32.gmra.mxu1 %v4889_v11 }
 0x29d   :  { %1401 = vmatmul.f32.gmra.mxu2 %v4889_v11  ;;  %1053 = vxpose.xlu2.b32.cont [12/16] (narrow) %v3632_v27, 8  ;;  %v3636_v27 = vld [vmem:[%s6353_s0 + $0x778] sm:$0xff] }
 0x2a1   :  { %983 = vxpose.xlu1.b32.cont [14/16] (narrow) %v3618_v28, 8  ;;  %v861_v28 = vrot.slane %v842_v15, 3 }
 0x2a2   :  { %1118 = vxpose.xlu0.b32.cont [5/16] (narrow) %v3641_v40, 8  ;;  %v698_v40 = vpop.trf.xlu0 }
 0x2a3   :  { %729 = vst [vmem:[#allocation2 + $0x41] sm:$0x1] %v698_v40  ;;  %v715_v1 = vrot.slane %v698_v40, 1  ;;  %v716_v2 = vrot.slane %v698_v40, 2  ;;  %v717_v5 = vrot.slane %v698_v40, 3  ;;  %v718_v6 = vrot.slane %v698_v40, 4 }
 0x2a4   :  { %1274 = vmatmul.f32.gmra.mxu0 %v4903_v20  ;;  %1339 = vmatmul.f32.gmra.mxu1 %v4903_v20  ;;  %v720_v14 = vrot.slane %v698_v40, 6  ;;  %876 = vst [vmem:[#allocation2 + $0x5b] sm:$0x1] %v861_v28 }
 0x2a5   :  { %1404 = vmatmul.f32.gmra.mxu2 %v4903_v20  ;;  %1054 = vxpose.xlu2.b32.cont [13/16] (narrow) %v3633_v31, 8  ;;  %730 = vst [vmem:[#allocation2 + $0x49] sm:$0x1] %v715_v1  ;;  %v863_v31 = vrot.slane %v842_v15, 5 }
 0x2a6   :  { %731 = vst [vmem:[#allocation2 + $0x51] sm:$0x1] %v716_v2 }
 0x2a7   :  { %732 = vst [vmem:[#allocation2 + $0x59] sm:$0x1] %v717_v5 }
 0x2a8   :  { %733 = vst [vmem:[#allocation2 + $0x61] sm:$0x1] %v718_v6 }
 0x2a9   :  { %984 = vxpose.xlu1.b32.cont [15/16] (narrow) %v3619_v32, 8  ;;  %735 = vst [vmem:[#allocation2 + $0x71] sm:$0x1] %v720_v14  ;;  %v864_v32 = vrot.slane %v842_v15, 6 }
 0x2aa   :  { %1119 = vxpose.xlu0.b32.cont [6/16] (narrow) %v3642_v63, 8  ;;  %v4959_v63 = vld [vmem:[#allocation2 + $0x38] sm:$0xff]  ;;  %878 = vst [vmem:[#allocation2 + $0x6b] sm:$0x1] %v863_v31 }
 0x2ab   :  { %879 = vst [vmem:[#allocation2 + $0x73] sm:$0x1] %v864_v32 }
 0x2ac   :  { %1277 = vmatmul.f32.gmra.mxu0 %v4917_v26  ;;  %1342 = vmatmul.f32.gmra.mxu1 %v4917_v26 }
 0x2ad   :  { %1407 = vmatmul.f32.gmra.mxu2 %v4917_v26  ;;  %1055 = vxpose.xlu2.b32.cont [14/16] (narrow) %v3634_v35, 8  ;;  %v865_v35 = vrot.slane %v842_v15, 7 }
 0x2af   :  { %880 = vst [vmem:[#allocation2 + $0x7b] sm:$0x1] %v865_v35 }
 0x2b1   :  { %985 = vxpose.xlu1.b32.end [16/16] (narrow) %v3620_v53, 8  ;;  %v914_v53 = vpop.trf.xlu0 }
 0x2b2   :  { %1120 = vxpose.xlu0.b32.cont [7/16] (narrow) %v3643_v3, 8  ;;  %v3635_v3 = vld [vmem:[%s6353_s0 + $0x770] sm:$0xff]  ;;  %v931_v61 = vrot.slane %v914_v53, 1  ;;  %v932_v1 = vrot.slane %v914_v53, 2  ;;  %v933_v2 = vrot.slane %v914_v53, 3  ;;  %v935_v5 = vrot.slane %v914_v53, 5 }
 0x2b3   :  { %945 = vst [vmem:[#allocation2 + $0x44] sm:$0x1] %v914_v53  ;;  %v936_v6 = vrot.slane %v914_v53, 6 }
 0x2b4   :  { %1280 = vmatmul.f32.gmra.mxu0 %v4931_v30  ;;  %1345 = vmatmul.f32.gmra.mxu1 %v4931_v30  ;;  %946 = vst [vmem:[#allocation2 + $0x4c] sm:$0x1] %v931_v61 }
 0x2b5   :  { %1410 = vmatmul.f32.gmra.mxu2 %v4931_v30  ;;  %1056 = vxpose.xlu2.b32.cont [15/16] (narrow) %v3635_v3, 8  ;;  %v934_v3 = vrot.slane %v914_v53, 4  ;;  %947 = vst [vmem:[#allocation2 + $0x54] sm:$0x1] %v932_v1 }
 0x2b6   :  { %948 = vst [vmem:[#allocation2 + $0x5c] sm:$0x1] %v933_v2 }
 0x2b7   :  { %949 = vst [vmem:[#allocation2 + $0x64] sm:$0x1] %v934_v3 }
 0x2b8   :  { %950 = vst [vmem:[#allocation2 + $0x6c] sm:$0x1] %v935_v5  ;;  %v1701_v5 = vld [vmem:[%s6355_s1 + $0x178] sm:$0xff] }
 0x2b9   :  { %951 = vst [vmem:[#allocation2 + $0x74] sm:$0x1] %v936_v6  ;;  %1702 = vmatpush.msrb.mxu1 %v1701_v5  ;;  %v1588_v6 = vld [vmem:[%s6355_s1 + $0x170] sm:$0xff] }
 0x2ba   :  { %1121 = vxpose.xlu0.b32.cont [8/16] (narrow) %v3644_v8, 8  ;;  %v719_v8 = vrot.slane %v698_v40, 5  ;;  %1589 = vmatpush.msrb.mxu0 %v1588_v6 }
 0x2bc   :  { %1283 = vmatmul.f32.gmra.mxu0 %v4945_v34  ;;  %1348 = vmatmul.f32.gmra.mxu1 %v4945_v34  ;;  %734 = vst [vmem:[#allocation2 + $0x69] sm:$0x1] %v719_v8  ;;  %v937_v8 = vrot.slane %v914_v53, 7 }
 0x2bd   :  { %1413 = vmatmul.f32.gmra.mxu2 %v4945_v34  ;;  %1057 = vxpose.xlu2.b32.end [16/16] (narrow) %v3636_v27, 8 }
 0x2be   :  { %952 = vst [vmem:[#allocation2 + $0x7c] sm:$0x1] %v937_v8 }
 0x2c2   :  { %1122 = vxpose.xlu0.b32.cont [9/16] (narrow) %v3645_v16, 8  ;;  %v721_v16 = vrot.slane %v698_v40, 7 }
 0x2c4   :  { %1286 = vmatmul.f32.gmra.mxu0 %v4959_v63  ;;  %1351 = vmatmul.f32.gmra.mxu1 %v4959_v63  ;;  %736 = vst [vmem:[#allocation2 + $0x79] sm:$0x1] %v721_v16 }
 0x2c5   :  { %1416 = vmatmul.f32.gmra.mxu2 %v4959_v63 }
 0x2ca   :  { %1123 = vxpose.xlu0.b32.cont [10/16] (narrow) %v3646_v23, 8  ;;  %v860_v23 = vrot.slane %v842_v15, 2 }
 0x2cc   :  { %875 = vst [vmem:[#allocation2 + $0x53] sm:$0x1] %v860_v23 }
 0x2d2   :  { %1124 = vxpose.xlu0.b32.cont [11/16] (narrow) %v3647_v29, 8  ;;  %v862_v29 = vrot.slane %v842_v15, 4 }
 0x2d4   :  { %877 = vst [vmem:[#allocation2 + $0x63] sm:$0x1] %v862_v29 }
 0x2da   :  { %1125 = vxpose.xlu0.b32.cont [12/16] (narrow) %v3648_v33, 8  ;;  %v770_v33 = vpop.trf.xlu1 }
 0x2db   :  { %v787_v40 = vrot.slane %v770_v33, 1  ;;  %v788_v42 = vrot.slane %v770_v33, 2  ;;  %v789_v43 = vrot.slane %v770_v33, 3  ;;  %v790_v44 = vrot.slane %v770_v33, 4  ;;  %801 = vst [vmem:[#allocation2 + $0x42] sm:$0x1] %v770_v33 }
 0x2dc   :  { %v791_v48 = vrot.slane %v770_v33, 5  ;;  %v792_v52 = vrot.slane %v770_v33, 6  ;;  %v793_v55 = vrot.slane %v770_v33, 7 }
 0x2dd   :  { %802 = vst [vmem:[#allocation2 + $0x4a] sm:$0x1] %v787_v40 }
 0x2de   :  { %803 = vst [vmem:[#allocation2 + $0x52] sm:$0x1] %v788_v42  ;;  %v1058_v15 = vpop.trf.xlu2 }
 0x2df   :  { %804 = vst [vmem:[#allocation2 + $0x5a] sm:$0x1] %v789_v43  ;;  %v1076_v22 = vrot.slane %v1058_v15, 2  ;;  %v1077_v23 = vrot.slane %v1058_v15, 3  ;;  %v1078_v27 = vrot.slane %v1058_v15, 4  ;;  %v1079_v28 = vrot.slane %v1058_v15, 5 }
 0x2e0   :  { %805 = vst [vmem:[#allocation2 + $0x62] sm:$0x1] %v790_v44  ;;  %v1080_v29 = vrot.slane %v1058_v15, 6  ;;  %v1081_v31 = vrot.slane %v1058_v15, 7 }
 0x2e1   :  { %806 = vst [vmem:[#allocation2 + $0x6a] sm:$0x1] %v791_v48 }
 0x2e2   :  { %1126 = vxpose.xlu0.b32.cont [13/16] (narrow) %v3649_v58, 8  ;;  %v3652_v58 = vld [vmem:[%s6353_s0 + $0x7f8] sm:$0xff]  ;;  %807 = vst [vmem:[#allocation2 + $0x72] sm:$0x1] %v792_v52  ;;  %v986_v14 = vpop.trf.xlu1 }
 0x2e3   :  { %808 = vst [vmem:[#allocation2 + $0x7a] sm:$0x1] %v793_v55  ;;  %v1003_v16 = vrot.slane %v986_v14, 1  ;;  %v1004_v32 = vrot.slane %v986_v14, 2  ;;  %v1005_v33 = vrot.slane %v986_v14, 3  ;;  %v1006_v35 = vrot.slane %v986_v14, 4 }
 0x2e4   :  { %1017 = vst [vmem:[#allocation2 + $0x45] sm:$0x1] %v986_v14  ;;  %v1008_v40 = vrot.slane %v986_v14, 6  ;;  %v1009_v42 = vrot.slane %v986_v14, 7 }
 0x2e5   :  { %1089 = vst [vmem:[#allocation2 + $0x46] sm:$0x1] %v1058_v15 }
 0x2e6   :  { %1018 = vst [vmem:[#allocation2 + $0x4d] sm:$0x1] %v1003_v16  ;;  %v1700_v16 = vld [vmem:[%s6355_s1 + $0x160] sm:$0xff] }
 0x2e7   :  { %1091 = vst [vmem:[#allocation2 + $0x56] sm:$0x1] %v1076_v22  ;;  %v1699_v22 = vld [vmem:[%s6355_s1 + $0x148] sm:$0xff]  ;;  %1703 = vmatpush.msrb.mxu1 %v1700_v16 }
 0x2e8   :  { %1092 = vst [vmem:[#allocation2 + $0x5e] sm:$0x1] %v1077_v23  ;;  %v1585_v23 = vld [vmem:[%s6355_s1 + $0x128] sm:$0xff] }
 0x2e9   :  { %1093 = vst [vmem:[#allocation2 + $0x66] sm:$0x1] %v1078_v27  ;;  %v1698_v27 = vld [vmem:[%s6355_s1 + $0x130] sm:$0xff]  ;;  %1704 = vmatpush.msrb.mxu1 %v1699_v22 }
 0x2ea   :  { %1127 = vxpose.xlu0.b32.cont [14/16] (narrow) %v3650_v21, 8  ;;  %v1075_v21 = vrot.slane %v1058_v15, 1  ;;  %1094 = vst [vmem:[#allocation2 + $0x6e] sm:$0x1] %v1079_v28  ;;  %v1587_v15 = vld [vmem:[%s6355_s1 + $0x158] sm:$0xff] }
 0x2eb   :  { %1095 = vst [vmem:[#allocation2 + $0x76] sm:$0x1] %v1080_v29  ;;  %1590 = vmatpush.msrb.mxu0 %v1587_v15  ;;  %1705 = vmatpush.msrb.mxu1 %v1698_v27 }
 0x2ec   :  { %1090 = vst [vmem:[#allocation2 + $0x4e] sm:$0x1] %v1075_v21  ;;  %v1586_v21 = vld [vmem:[%s6355_s1 + $0x140] sm:$0xff] }
 0x2ed   :  { %1096 = vst [vmem:[#allocation2 + $0x7e] sm:$0x1] %v1081_v31  ;;  %1591 = vmatpush.msrb.mxu0 %v1586_v21  ;;  %1706 = vmatpush.msrb.mxu1 %v4625_v47 }
 0x2ee   :  { %1019 = vst [vmem:[#allocation2 + $0x55] sm:$0x1] %v1004_v32 }
 0x2ef   :  { %1020 = vst [vmem:[#allocation2 + $0x5d] sm:$0x1] %v1005_v33  ;;  %1592 = vmatpush.msrb.mxu0 %v1585_v23  ;;  %1707 = vmatpush.msrb.mxu1 %v4641_v51 }
 0x2f0   :  { %1021 = vst [vmem:[#allocation2 + $0x65] sm:$0x1] %v1006_v35 }
 0x2f1   :  { %1023 = vst [vmem:[#allocation2 + $0x75] sm:$0x1] %v1008_v40  ;;  %1593 = vmatpush.msrb.mxu0 %v4620_v46  ;;  %1708 = vmatpush.msrb.mxu1 %v4660_v57 }
 0x2f2   :  { %1128 = vxpose.xlu0.b32.cont [15/16] (narrow) %v3651_v38, 8  ;;  %v1007_v38 = vrot.slane %v986_v14, 5  ;;  %1024 = vst [vmem:[#allocation2 + $0x7d] sm:$0x1] %v1009_v42 }
 0x2f3   :  { %1594 = vmatpush.msrb.mxu0 %v4636_v50  ;;  %1709 = vmatpush.msrb.mxu1 %v4677_v62 }
 0x2f4   :  { %1022 = vst [vmem:[#allocation2 + $0x6d] sm:$0x1] %v1007_v38 }
 0x2f5   :  { %1595 = vmatpush.msrb.mxu0 %v4650_v54  ;;  %1710 = vmatpush.msrb.mxu1 %v4701_v10 }
 0x2f7   :  { %1596 = vmatpush.msrb.mxu0 %v4670_v60  ;;  %1711 = vmatpush.msrb.mxu1 %v4714_v13 }
 0x2f9   :  { %1597 = vmatpush.msrb.mxu0 %v4696_v9  ;;  %1712 = vmatpush.msrb.mxu1 %v4729_v19 }
 0x2fa   :  { %1129 = vxpose.xlu0.b32.end [16/16] (narrow) %v3652_v58, 8 }
 0x2fb   :  { %1598 = vmatpush.msrb.mxu0 %v4709_v12  ;;  %1713 = vmatpush.msrb.mxu1 %v4747_v25 }
 0x2fd   :  { %1599 = vmatpush.msrb.mxu0 %v4724_v17  ;;  %1714 = vmatpush.msrb.mxu1 %v4770_v37 }
 0x2ff   :  { %1600 = vmatpush.msrb.mxu0 %v4742_v24  ;;  %1715 = vmatpush.msrb.mxu1 %v4785_v41 }
 0x301   :  { %1601 = vmatpush.msrb.mxu0 %v4765_v36  ;;  %1716 = vmatpush.msrb.mxu1 %v4803_v49 }
 0x303   :  { %1602 = vmatpush.msrb.mxu0 %v4778_v39  ;;  %1717 = vmatpush.msrb.mxu1 %v4820_v59 }
 0x305   :  { %1603 = vmatpush.msrb.mxu0 %v4796_v45 }
 0x307   :  { %1604 = vmatpush.msrb.mxu0 %v4814_v56 }
 0x308   :  { %v4979_v53 = vpop.f32.mrf.mxu0  ;;  %v5080_v60 = vpop.f32.mrf.mxu1 }
 0x309   :  { %1492 = vmatmul.f32.vlgmr.msra.gmra.mxu3 %v4979_v53 }
 0x30f   :  { %v5084_v62 = vpop.f32.mrf.mxu2 }
 0x311   :  { %v4986_v3 = vpop.f32.mrf.mxu0  ;;  %v5095_v12 = vpop.f32.mrf.mxu1 }
 0x312   :  { %1495 = vmatmul.f32.gmra.mxu3 %v4986_v3 }
 0x318   :  { %v5097_v13 = vpop.f32.mrf.mxu2 }
 0x319   :  { %v5000_v14 = vpop.f32.mrf.mxu0  ;;  %v5101_v17 = vpop.f32.mrf.mxu1 }
 0x31a   :  { %1498 = vmatmul.f32.gmra.mxu3 %v5000_v14 }
 0x320   :  { %v5103_v19 = vpop.f32.mrf.mxu2 }
 0x321   :  { %v5026_v29 = vpop.f32.mrf.mxu0  ;;  %v5107_v24 = vpop.f32.mrf.mxu1 }
 0x322   :  { %1501 = vmatmul.f32.gmra.mxu3 %v5026_v29 }
 0x326   :  { %v1130_v43 = vpop.trf.xlu0 }
 0x327   :  { %v1147_v44 = vrot.slane %v1130_v43, 1  ;;  %v1148_v48 = vrot.slane %v1130_v43, 2  ;;  %v1149_v52 = vrot.slane %v1130_v43, 3  ;;  %1161 = vst [vmem:[#allocation2 + $0x47] sm:$0x1] %v1130_v43  ;;  %v1150_v55 = vrot.slane %v1130_v43, 4 }
 0x328   :  { %v1151_v58 = vrot.slane %v1130_v43, 5  ;;  %v1152_v61 = vrot.slane %v1130_v43, 6  ;;  %v1153_v1 = vrot.slane %v1130_v43, 7  ;;  %v5109_v25 = vpop.f32.mrf.mxu2 }
 0x329   :  { %1162 = vst [vmem:[#allocation2 + $0x4f] sm:$0x1] %v1147_v44  ;;  %v5041_v46 = vpop.f32.mrf.mxu0  ;;  %v5113_v36 = vpop.f32.mrf.mxu1 }
 0x32a   :  { %1163 = vst [vmem:[#allocation2 + $0x57] sm:$0x1] %v1148_v48  ;;  %1504 = vmatmul.f32.gmra.mxu3 %v5041_v46 }
 0x32b   :  { %1164 = vst [vmem:[#allocation2 + $0x5f] sm:$0x1] %v1149_v52 }
 0x32c   :  { %1165 = vst [vmem:[#allocation2 + $0x67] sm:$0x1] %v1150_v55 }
 0x32d   :  { %1166 = vst [vmem:[#allocation2 + $0x6f] sm:$0x1] %v1151_v58 }
 0x32e   :  { %1167 = vst [vmem:[#allocation2 + $0x77] sm:$0x1] %v1152_v61  ;;  %v4982_v2 = vld [vmem:[#allocation2 + $0x40] sm:$0xff] }
 0x32f   :  { %1168 = vst [vmem:[#allocation2 + $0x7f] sm:$0x1] %v1153_v1  ;;  %1289 = vmatmul.f32.gmra.mxu0 %v4982_v2  ;;  %1354 = vmatmul.f32.gmra.mxu1 %v4982_v2 }
 0x330   :  { %1419 = vmatmul.f32.gmra.mxu2 %v4982_v2  ;;  %v4996_v8 = vld [vmem:[#allocation2 + $0x48] sm:$0xff]  ;;  %v5117_v37 = vpop.f32.mrf.mxu2 }
 0x331   :  { %v5022_v28 = vld [vmem:[#allocation2 + $0x50] sm:$0xff]  ;;  %v5056_v50 = vpop.f32.mrf.mxu0  ;;  %v5121_v39 = vpop.f32.mrf.mxu1 }
 0x332   :  { %v5036_v31 = vld [vmem:[#allocation2 + $0x58] sm:$0xff]  ;;  %1507 = vmatmul.f32.gmra.mxu3 %v5056_v50 }
 0x333   :  { %v5051_v47 = vld [vmem:[#allocation2 + $0x60] sm:$0xff] }
 0x334   :  { %v5066_v51 = vld [vmem:[#allocation2 + $0x68] sm:$0xff] }
 0x335   :  { %6369 = vst [vmem:[#allocation6_spill] sm:$0xff] %v5066_v51  ;;  %v5078_v57 = vld [vmem:[#allocation2 + $0x70] sm:$0xff] }
 0x336   :  { %6370 = vst [vmem:[#allocation7_spill] sm:$0xff] %v5078_v57  ;;  %v5090_v10 = vld [vmem:[#allocation2 + $0x78] sm:$0xff] }
 0x337   :  { %1292 = vmatmul.f32.gmra.mxu0 %v4996_v8  ;;  %1357 = vmatmul.f32.gmra.mxu1 %v4996_v8  ;;  %6371 = vst [vmem:[#allocation8_spill] sm:$0xff] %v5090_v10 }
 0x338   :  { %1422 = vmatmul.f32.gmra.mxu2 %v4996_v8  ;;  %v5123_v41 = vpop.f32.mrf.mxu2 }
 0x339   :  { %v5071_v54 = vpop.f32.mrf.mxu0  ;;  %v5127_v45 = vpop.f32.mrf.mxu1 }
 0x33a   :  { %1510 = vmatmul.f32.gmra.mxu3 %v5071_v54 }
 0x33f   :  { %1295 = vmatmul.f32.gmra.mxu0 %v5022_v28  ;;  %1360 = vmatmul.f32.gmra.mxu1 %v5022_v28 }
 0x340   :  { %1425 = vmatmul.f32.gmra.mxu2 %v5022_v28  ;;  %v5129_v49 = vpop.f32.mrf.mxu2 }
 0x341   :  { %v5086_v9 = vpop.f32.mrf.mxu0  ;;  %v5133_v56 = vpop.f32.mrf.mxu1 }
 0x342   :  { %1513 = vmatmul.f32.gmra.mxu3 %v5086_v9 }
 0x347   :  { %1298 = vmatmul.f32.gmra.mxu0 %v5036_v31  ;;  %1363 = vmatmul.f32.gmra.mxu1 %v5036_v31 }
 0x348   :  { %1428 = vmatmul.f32.gmra.mxu2 %v5036_v31  ;;  %v5135_v59 = vpop.f32.mrf.mxu2 }
 0x34f   :  { %1301 = vmatmul.f32.gmra.mxu0 %v5051_v47  ;;  %1366 = vmatmul.f32.gmra.mxu1 %v5051_v47 }
 0x350   :  { %1431 = vmatmul.f32.gmra.mxu2 %v5051_v47 }
 0x357   :  { %1304 = vmatmul.f32.gmra.mxu0 %v5066_v51  ;;  %1369 = vmatmul.f32.gmra.mxu1 %v5066_v51 }
 0x358   :  { %1434 = vmatmul.f32.gmra.mxu2 %v5066_v51 }
 0x35f   :  { %1307 = vmatmul.f32.gmra.mxu0 %v5078_v57  ;;  %1372 = vmatmul.f32.gmra.mxu1 %v5078_v57 }
 0x360   :  { %1437 = vmatmul.f32.gmra.mxu2 %v5078_v57 }
 0x367   :  { %1310 = vmatmul.f32.gmra.mxu0 %v5090_v10  ;;  %1375 = vmatmul.f32.gmra.mxu1 %v5090_v10 }
 0x368   :  { %1440 = vmatmul.f32.gmra.mxu2 %v5090_v10 }
 0x36f   :  { %1605 = vmatmul.f32.vlgmr.msrb.gmra.mxu0 %v5080_v60  ;;  %1718 = vmatmul.f32.vlgmr.msrb.gmra.mxu1 %v5084_v62 }
 0x377   :  { %1608 = vmatmul.f32.gmra.mxu0 %v5095_v12  ;;  %1721 = vmatmul.f32.gmra.mxu1 %v5097_v13 }
 0x37f   :  { %1611 = vmatmul.f32.gmra.mxu0 %v5101_v17  ;;  %1724 = vmatmul.f32.gmra.mxu1 %v5103_v19 }
 0x387   :  { %1614 = vmatmul.f32.gmra.mxu0 %v5107_v24  ;;  %1727 = vmatmul.f32.gmra.mxu1 %v5109_v25 }
 0x38c   :  { %v1493_v23 = vpop.f32.mrf.mxu3 }
 0x38f   :  { %1617 = vmatmul.f32.gmra.mxu0 %v5113_v36  ;;  %1730 = vmatmul.f32.gmra.mxu1 %v5117_v37 }
 0x395   :  { %v1496_v57 = vpop.f32.mrf.mxu3 }
 0x397   :  { %1620 = vmatmul.f32.gmra.mxu0 %v5121_v39  ;;  %1733 = vmatmul.f32.gmra.mxu1 %v5123_v41 }
 0x39f   :  { %1623 = vmatmul.f32.gmra.mxu0 %v5127_v45  ;;  %1736 = vmatmul.f32.gmra.mxu1 %v5129_v49 }
 0x3a7   :  { %1626 = vmatmul.f32.gmra.mxu0 %v5133_v56  ;;  %1739 = vmatmul.f32.gmra.mxu1 %v5135_v59 }
 0x3ac   :  { %v5139_v32 = vpop.f32.mrf.mxu0  ;;  %v5141_v33 = vpop.f32.mrf.mxu1 }
 0x3ad   :  { %1516 = vmatmul.f32.gmra.mxu3 %v5139_v32 }
 0x3af   :  { %1629 = vmatmul.f32.gmra.mxu0 %v5141_v33 }
 0x3b3   :  { %v5145_v35 = vpop.f32.mrf.mxu2 }
 0x3b4   :  { %1742 = vmatmul.f32.gmra.mxu1 %v5145_v35  ;;  %v5148_v38 = vpop.f32.mrf.mxu0  ;;  %v5150_v40 = vpop.f32.mrf.mxu1 }
 0x3b5   :  { %1519 = vmatmul.f32.gmra.mxu3 %v5148_v38 }
 0x3b7   :  { %1632 = vmatmul.f32.gmra.mxu0 %v5150_v40 }
 0x3bb   :  { %v5154_v42 = vpop.f32.mrf.mxu2 }
 0x3bc   :  { %1745 = vmatmul.f32.gmra.mxu1 %v5154_v42  ;;  %v5157_v43 = vpop.f32.mrf.mxu0  ;;  %v5159_v44 = vpop.f32.mrf.mxu1 }
 0x3bd   :  { %1522 = vmatmul.f32.gmra.mxu3 %v5157_v43 }
 0x3bf   :  { %1635 = vmatmul.f32.gmra.mxu0 %v5159_v44 }
 0x3c3   :  { %v5163_v48 = vpop.f32.mrf.mxu2 }
 0x3c4   :  { %1748 = vmatmul.f32.gmra.mxu1 %v5163_v48  ;;  %v5166_v52 = vpop.f32.mrf.mxu0  ;;  %v5168_v55 = vpop.f32.mrf.mxu1 }
 0x3c5   :  { %1525 = vmatmul.f32.gmra.mxu3 %v5166_v52 }
 0x3c7   :  { %1638 = vmatmul.f32.gmra.mxu0 %v5168_v55 }
 0x3cb   :  { %v5172_v58 = vpop.f32.mrf.mxu2 }
 0x3cc   :  { %1751 = vmatmul.f32.gmra.mxu1 %v5172_v58  ;;  %v5175_v61 = vpop.f32.mrf.mxu0  ;;  %v5177_v1 = vpop.f32.mrf.mxu1 }
 0x3cd   :  { %1528 = vmatmul.f32.gmra.mxu3 %v5175_v61 }
 0x3cf   :  { %1641 = vmatmul.f32.gmra.mxu0 %v5177_v1 }
 0x3d3   :  { %v5181_v5 = vpop.f32.mrf.mxu2 }
 0x3d4   :  { %1754 = vmatmul.f32.gmra.mxu1 %v5181_v5  ;;  %v5184_v6 = vpop.f32.mrf.mxu0  ;;  %v5186_v15 = vpop.f32.mrf.mxu1 }
 0x3d5   :  { %6372 = vst [vmem:[#allocation9_spill] sm:$0xff] %v5184_v6  ;;  %1531 = vmatmul.f32.gmra.mxu3 %v5184_v6  ;;  %v1499_v6 = vpop.f32.mrf.mxu3 }
 0x3d7   :  { %1644 = vmatmul.f32.gmra.mxu0 %v5186_v15 }
 0x3db   :  { %v5190_v16 = vpop.f32.mrf.mxu2 }
 0x3dc   :  { %1757 = vmatmul.f32.gmra.mxu1 %v5190_v16  ;;  %v5193_v21 = vpop.f32.mrf.mxu0  ;;  %v5195_v22 = vpop.f32.mrf.mxu1 }
 0x3dd   :  { %6373 = vst [vmem:[#allocation10_spill] sm:$0xff] %v5193_v21  ;;  %1534 = vmatmul.f32.gmra.mxu3 %v5193_v21 }
 0x3de   :  { %6374 = vst [vmem:[#allocation11_spill] sm:$0xff] %v5195_v22 }
 0x3df   :  { %1647 = vmatmul.f32.gmra.mxu0 %v5195_v22 }
 0x3e3   :  { %v5199_v27 = vpop.f32.mrf.mxu2 }
 0x3e4   :  { %6375 = vst [vmem:[#allocation12_spill] sm:$0xff] %v5199_v27  ;;  %1760 = vmatmul.f32.gmra.mxu1 %v5199_v27  ;;  %v5202_v7 = vpop.f32.mrf.mxu0  ;;  %v5204_v18 = vpop.f32.mrf.mxu1 }
 0x3e5   :  { %6376 = vst [vmem:[#allocation13_spill] sm:$0xff] %v5202_v7  ;;  %1537 = vmatmul.f32.gmra.mxu3 %v5202_v7  ;;  %v5218_v7 = vld [vmem:[%s6356_s2] sm:$0xff] }
 0x3e7   :  { %1650 = vmatmul.f32.gmra.mxu0 %v5204_v18 }
 0x3eb   :  { %v5208_v10 = vpop.f32.mrf.mxu2 }
 0x3ec   :  { %1763 = vmatmul.f32.gmra.mxu1 %v5208_v10  ;;  %v1606_v21 = vpop.f32.mrf.mxu0  ;;  %v1719_v22 = vpop.f32.mrf.mxu1 }
 0x3ed   :  { %1915 = vmatpush.msrb.mxu2 %v1719_v22 }
 0x3ef   :  { %1916 = vmatpush.msrb.mxu2 %v5084_v62 }
 0x3f1   :  { %1917 = vmatpush.msrb.mxu2 %v1606_v21 }
 0x3f3   :  { %1918 = vmatpush.msrb.mxu2 %v5080_v60 }
 0x3f4   :  { %v1609_v51 = vpop.f32.mrf.mxu0  ;;  %v1722_v27 = vpop.f32.mrf.mxu1 }
 0x3f5   :  { %1919 = vmatpush.msrb.mxu2 %v1493_v23  ;;  %1935 = vmatpush.msrb.mxu3 %v1722_v27 }
 0x3f7   :  { %1920 = vmatpush.msrb.mxu2 %v4979_v53  ;;  %1936 = vmatpush.msrb.mxu3 %v5097_v13  ;;  %v1502_v53 = vpop.f32.mrf.mxu3 }
 0x3f9   :  { %1921 = vmatpush.msrb.mxu2 %v4861_v0  ;;  %1937 = vmatpush.msrb.mxu3 %v1609_v51 }
 0x3fa   :  { %3653 = vmatmul.msk.f32.vlgmr.msrb.gmra.mxu2 %vm1902_vm0, %v5218_v7 }
 0x3fb   :  { %1938 = vmatpush.msrb.mxu3 %v5095_v12 }
 0x3fc   :  { %v1612_v60 = vpop.f32.mrf.mxu0  ;;  %v1725_v62 = vpop.f32.mrf.mxu1 }
 0x3fd   :  { %1939 = vmatpush.msrb.mxu3 %v1496_v57  ;;  %1955 = vmatpush.msra.mxu2 %v1725_v62 }
 0x3ff   :  { %1940 = vmatpush.msrb.mxu3 %v4986_v3  ;;  %1956 = vmatpush.msra.mxu2 %v5103_v19  ;;  %v1505_v57 = vpop.f32.mrf.mxu3 }
 0x401   :  { %1941 = vmatpush.msrb.mxu3 %v4875_v4  ;;  %1957 = vmatpush.msra.mxu2 %v1612_v60 }
 0x402   :  { %3654 = vmatmul.msk.f32.vlgmr.msrb.gmra.mxu3 %vm1902_vm0, %v5218_v7 }
 0x403   :  { %1958 = vmatpush.msra.mxu2 %v5101_v17 }
 0x404   :  { %v1615_v0 = vpop.f32.mrf.mxu0  ;;  %v1728_v51 = vpop.f32.mrf.mxu1 }
 0x405   :  { %1959 = vmatpush.msra.mxu2 %v1499_v6  ;;  %1975 = vmatpush.msra.mxu3 %v1728_v51 }
 0x407   :  { %1960 = vmatpush.msra.mxu2 %v5000_v14  ;;  %1976 = vmatpush.msra.mxu3 %v5109_v25 }
 0x409   :  { %1961 = vmatpush.msra.mxu2 %v4889_v11  ;;  %1977 = vmatpush.msra.mxu3 %v1615_v0  ;;  %v1508_v11 = vpop.f32.mrf.mxu3 }
 0x40a   :  { %3655 = vmatmul.msk.f32.vlgmr.msra.gmra.mxu2 %vm1902_vm0, %v5218_v7 }
 0x40b   :  { %1978 = vmatpush.msra.mxu3 %v5107_v24 }
 0x40c   :  { %v1618_v4 = vpop.f32.mrf.mxu0  ;;  %v1731_v3 = vpop.f32.mrf.mxu1 }
 0x40d   :  { %1979 = vmatpush.msra.mxu3 %v1502_v53  ;;  %1995 = vmatpush.msrb.mxu2 %v1731_v3 }
 0x40f   :  { %1980 = vmatpush.msra.mxu3 %v5026_v29  ;;  %1996 = vmatpush.msrb.mxu2 %v5117_v37 }
 0x411   :  { %1981 = vmatpush.msra.mxu3 %v4903_v20  ;;  %1997 = vmatpush.msrb.mxu2 %v1618_v4  ;;  %v1511_v13 = vpop.f32.mrf.mxu3 }
 0x412   :  { %3656 = vmatmul.msk.f32.vlgmr.msra.gmra.mxu3 %vm1902_vm0, %v5218_v7 }
 0x413   :  { %1998 = vmatpush.msrb.mxu2 %v5113_v36 }
 0x414   :  { %v1621_v14 = vpop.f32.mrf.mxu0  ;;  %v1734_v12 = vpop.f32.mrf.mxu1 }
 0x415   :  { %1999 = vmatpush.msrb.mxu2 %v1505_v57  ;;  %2015 = vmatpush.msrb.mxu3 %v1734_v12 }
 0x417   :  { %2000 = vmatpush.msrb.mxu2 %v5041_v46  ;;  %2016 = vmatpush.msrb.mxu3 %v5123_v41 }
 0x419   :  { %2001 = vmatpush.msrb.mxu2 %v4917_v26  ;;  %2017 = vmatpush.msrb.mxu3 %v1621_v14  ;;  %v1514_v17 = vpop.f32.mrf.mxu3 }
 0x41a   :  { %3657 = vmatmul.msk.f32.vlgmr.msrb.gmra.mxu2 %vm1902_vm0, %v5218_v7 }
 0x41b   :  { %2018 = vmatpush.msrb.mxu3 %v5121_v39 }
 0x41c   :  { %v1624_v20 = vpop.f32.mrf.mxu0  ;;  %v1737_v29 = vpop.f32.mrf.mxu1 }
 0x41d   :  { %2019 = vmatpush.msrb.mxu3 %v1508_v11  ;;  %2035 = vmatpush.msra.mxu2 %v1737_v29 }
 0x41f   :  { %2020 = vmatpush.msrb.mxu3 %v5056_v50  ;;  %2036 = vmatpush.msra.mxu2 %v5129_v49 }
 0x421   :  { %2021 = vmatpush.msrb.mxu3 %v4931_v30  ;;  %2037 = vmatpush.msra.mxu2 %v1624_v20 }
 0x422   :  { %3658 = vmatmul.msk.f32.vlgmr.msrb.gmra.mxu3 %vm1902_vm0, %v5218_v7 }
 0x423   :  { %2038 = vmatpush.msra.mxu2 %v5127_v45 }
 0x424   :  { %v1627_v26 = vpop.f32.mrf.mxu0  ;;  %v1740_v46 = vpop.f32.mrf.mxu1 }
 0x425   :  { %2039 = vmatpush.msra.mxu2 %v1511_v13  ;;  %2055 = vmatpush.msra.mxu3 %v1740_v46 }
 0x427   :  { %2040 = vmatpush.msra.mxu2 %v5071_v54  ;;  %2056 = vmatpush.msra.mxu3 %v5135_v59  ;;  %v6377_v59 = vld [vmem:[#allocation9_spill] sm:$0xff] }
 0x429   :  { %2041 = vmatpush.msra.mxu2 %v4945_v34  ;;  %2057 = vmatpush.msra.mxu3 %v1627_v26 }
 0x42a   :  { %3659 = vmatmul.msk.f32.vlgmr.msra.gmra.mxu2 %vm1902_vm0, %v5218_v7 }
 0x42b   :  { %2058 = vmatpush.msra.mxu3 %v5133_v56 }
 0x42c   :  { %v1630_v30 = vpop.f32.mrf.mxu0 }
 0x42d   :  { %2059 = vmatpush.msra.mxu3 %v1514_v17 }
 0x42f   :  { %2060 = vmatpush.msra.mxu3 %v5086_v9 }
 0x430   :  { %v1517_v50 = vpop.f32.mrf.mxu3 }
 0x431   :  { %v1743_v19 = vpop.f32.mrf.mxu1  ;;  %2061 = vmatpush.msra.mxu3 %v4959_v63 }
 0x432   :  { %2075 = vmatpush.msrb.mxu2 %v1743_v19  ;;  %3660 = vmatmul.msk.f32.vlgmr.msra.gmra.mxu3 %vm1902_vm0, %v5218_v7 }
 0x434   :  { %2076 = vmatpush.msrb.mxu2 %v5145_v35  ;;  %v1633_v34 = vpop.f32.mrf.mxu0 }
 0x436   :  { %2077 = vmatpush.msrb.mxu2 %v1630_v30 }
 0x438   :  { %2078 = vmatpush.msrb.mxu2 %v5141_v33  ;;  %v1520_v54 = vpop.f32.mrf.mxu3  ;;  %v6379_v33 = vld [vmem:[#allocation6_spill] sm:$0xff] }
 0x439   :  { %v1746_v24 = vpop.f32.mrf.mxu1 }
 0x43a   :  { %2079 = vmatpush.msrb.mxu2 %v1517_v50  ;;  %2095 = vmatpush.msrb.mxu3 %v1746_v24 }
 0x43c   :  { %2080 = vmatpush.msrb.mxu2 %v5139_v32  ;;  %2096 = vmatpush.msrb.mxu3 %v5154_v42  ;;  %v1636_v9 = vpop.f32.mrf.mxu0  ;;  %v6378_v32 = vld [vmem:[#allocation12_spill] sm:$0xff] }
 0x43e   :  { %2081 = vmatpush.msrb.mxu2 %v4982_v2  ;;  %2097 = vmatpush.msrb.mxu3 %v1633_v34 }
 0x43f   :  { %3661 = vmatmul.msk.f32.vlgmr.msrb.gmra.mxu2 %vm1902_vm0, %v5218_v7 }
 0x440   :  { %2098 = vmatpush.msrb.mxu3 %v5150_v40  ;;  %v1523_v63 = vpop.f32.mrf.mxu3  ;;  %v6381_v40 = vld [vmem:[#allocation10_spill] sm:$0xff] }
 0x441   :  { %v1749_v25 = vpop.f32.mrf.mxu1 }
 0x442   :  { %2099 = vmatpush.msrb.mxu3 %v1520_v54  ;;  %2115 = vmatpush.msra.mxu2 %v1749_v25 }
 0x444   :  { %2100 = vmatpush.msrb.mxu3 %v5148_v38  ;;  %2116 = vmatpush.msra.mxu2 %v5163_v48  ;;  %v1639_v36 = vpop.f32.mrf.mxu0  ;;  %v6383_v48 = vld [vmem:[#allocation13_spill] sm:$0xff] }
 0x446   :  { %2101 = vmatpush.msrb.mxu3 %v4996_v8  ;;  %2117 = vmatpush.msra.mxu2 %v1636_v9 }
 0x447   :  { %3662 = vmatmul.msk.f32.vlgmr.msrb.gmra.mxu3 %vm1902_vm0, %v5218_v7 }
 0x448   :  { %2118 = vmatpush.msra.mxu2 %v5159_v44  ;;  %v1526_v2 = vpop.f32.mrf.mxu3 }
 0x449   :  { %v1752_v37 = vpop.f32.mrf.mxu1 }
 0x44a   :  { %2119 = vmatpush.msra.mxu2 %v1523_v63  ;;  %2135 = vmatpush.msra.mxu3 %v1752_v37 }
 0x44c   :  { %2120 = vmatpush.msra.mxu2 %v5157_v43  ;;  %2136 = vmatpush.msra.mxu3 %v5172_v58  ;;  %v1642_v39 = vpop.f32.mrf.mxu0  ;;  %v6382_v43 = vld [vmem:[#allocation7_spill] sm:$0xff] }
 0x44e   :  { %2121 = vmatpush.msra.mxu2 %v5022_v28  ;;  %2137 = vmatpush.msra.mxu3 %v1639_v36 }
 0x44f   :  { %3663 = vmatmul.msk.f32.vlgmr.msra.gmra.mxu2 %vm1902_vm0, %v5218_v7 }
 0x450   :  { %2138 = vmatpush.msra.mxu3 %v5168_v55  ;;  %v1529_v41 = vpop.f32.mrf.mxu3 }
 0x451   :  { %v1755_v8 = vpop.f32.mrf.mxu1 }
 0x452   :  { %2139 = vmatpush.msra.mxu3 %v1526_v2  ;;  %2155 = vmatpush.msrb.mxu2 %v1755_v8 }
 0x454   :  { %2140 = vmatpush.msra.mxu3 %v5166_v52  ;;  %2156 = vmatpush.msrb.mxu2 %v5181_v5  ;;  %v1645_v28 = vpop.f32.mrf.mxu0  ;;  %v6384_v52 = vld [vmem:[#allocation8_spill] sm:$0xff] }
 0x456   :  { %2141 = vmatpush.msra.mxu3 %v5036_v31  ;;  %2157 = vmatpush.msrb.mxu2 %v1642_v39 }
 0x457   :  { %3664 = vmatmul.msk.f32.vlgmr.msra.gmra.mxu3 %vm1902_vm0, %v5218_v7 }
 0x458   :  { %2158 = vmatpush.msrb.mxu2 %v5177_v1  ;;  %v1532_v49 = vpop.f32.mrf.mxu3 }
 0x459   :  { %v1758_v45 = vpop.f32.mrf.mxu1 }
 0x45a   :  { %2159 = vmatpush.msrb.mxu2 %v1529_v41  ;;  %2175 = vmatpush.msrb.mxu3 %v1758_v45 }
 0x45c   :  { %2160 = vmatpush.msrb.mxu2 %v5175_v61  ;;  %2176 = vmatpush.msrb.mxu3 %v5190_v16  ;;  %v1648_v56 = vpop.f32.mrf.mxu0 }
 0x45e   :  { %2161 = vmatpush.msrb.mxu2 %v5051_v47  ;;  %2177 = vmatpush.msrb.mxu3 %v1645_v28  ;;  %v6380_v47 = vld [vmem:[#allocation11_spill] sm:$0xff] }
 0x45f   :  { %3665 = vmatmul.msk.f32.vlgmr.msrb.gmra.mxu2 %vm1902_vm0, %v5218_v7 }
 0x460   :  { %2178 = vmatpush.msrb.mxu3 %v5186_v15  ;;  %v1535_v35 = vpop.f32.mrf.mxu3 }
 0x461   :  { %v1761_v31 = vpop.f32.mrf.mxu1 }
 0x462   :  { %2179 = vmatpush.msrb.mxu3 %v1532_v49  ;;  %2195 = vmatpush.msra.mxu2 %v1761_v31 }
 0x464   :  { %2180 = vmatpush.msrb.mxu3 %v6377_v59  ;;  %2196 = vmatpush.msra.mxu2 %v6378_v32  ;;  %v1651_v42 = vpop.f32.mrf.mxu0 }
 0x466   :  { %2181 = vmatpush.msrb.mxu3 %v6379_v33  ;;  %2197 = vmatpush.msra.mxu2 %v1648_v56 }
 0x467   :  { %3666 = vmatmul.msk.f32.vlgmr.msrb.gmra.mxu3 %vm1902_vm0, %v5218_v7 }
 0x468   :  { %2198 = vmatpush.msra.mxu2 %v6380_v47  ;;  %v1538_v44 = vpop.f32.mrf.mxu3 }
 0x469   :  { %v1764_v38 = vpop.f32.mrf.mxu1 }
 0x46a   :  { %2199 = vmatpush.msra.mxu2 %v1535_v35  ;;  %2215 = vmatpush.msra.mxu3 %v1764_v38 }
 0x46c   :  { %2200 = vmatpush.msra.mxu2 %v6381_v40  ;;  %2216 = vmatpush.msra.mxu3 %v5208_v10  ;;  %v6385_v10 = vld [vmem:[#allocation5_spill] sm:$0xff] }
 0x46e   :  { %2201 = vmatpush.msra.mxu2 %v6382_v43  ;;  %2217 = vmatpush.msra.mxu3 %v1651_v42 }
 0x46f   :  { %3667 = vmatmul.msk.f32.vlgmr.msra.gmra.mxu2 %vm1902_vm0, %v5218_v7 }
 0x470   :  { %2218 = vmatpush.msra.mxu3 %v5204_v18 }
 0x472   :  { %2219 = vmatpush.msra.mxu3 %v1538_v44 }
 0x474   :  { %2220 = vmatpush.msra.mxu3 %v6383_v48 }
 0x476   :  { %2221 = vmatpush.msra.mxu3 %v6384_v52 }
 0x477   :  { %3668 = vmatmul.msk.f32.vlgmr.msra.gmra.mxu3 %vm1902_vm0, %v5218_v7 }
 0x47d   :  { %v1923_v55 = vpop.f32.mrf.mxu2 }
 0x47e   :  { %v1924_v58 = vadd.f32 %v1923_v55, %v6385_v10 }
 0x480   :  { %v2228_v61 = vrot.slane %v1924_v58, 2  ;;  %2241 = vst [vmem:[#allocation4] sm:$0x1] %v1924_v58  ;;  %v2231_v1 = vrot.slane %v1924_v58, 5  ;;  %v2232_v5 = vrot.slane %v1924_v58, 6  ;;  %v2233_v6 = vrot.slane %v1924_v58, 7 }
 0x481   :  { %v2227_v15 = vrot.slane %v1924_v58, 1  ;;  %v2229_v18 = vrot.slane %v1924_v58, 3  ;;  %v2230_v16 = vrot.slane %v1924_v58, 4 }
 0x482   :  { %2243 = vst [vmem:[#allocation4 + $0x10] sm:$0x1] %v2228_v61 }
 0x483   :  { %2246 = vst [vmem:[#allocation4 + $0x28] sm:$0x1] %v2231_v1 }
 0x484   :  { %2247 = vst [vmem:[#allocation4 + $0x30] sm:$0x1] %v2232_v5 }
 0x485   :  { %2248 = vst [vmem:[#allocation4 + $0x38] sm:$0x1] %v2233_v6  ;;  %v1943_v21 = vpop.f32.mrf.mxu3 }
 0x486   :  { %2242 = vst [vmem:[#allocation4 + $0x8] sm:$0x1] %v2227_v15  ;;  %v1944_v22 = vadd.f32 %v1943_v21, %v6385_v10 }
 0x487   :  { %2244 = vst [vmem:[#allocation4 + $0x18] sm:$0x1] %v2229_v18 }
 0x488   :  { %2245 = vst [vmem:[#allocation4 + $0x20] sm:$0x1] %v2230_v16  ;;  %v2251_v7 = vrot.slane %v1944_v22, 2  ;;  %v2254_v23 = vrot.slane %v1944_v22, 5  ;;  %v2255_v27 = vrot.slane %v1944_v22, 6  ;;  %v2256_v60 = vrot.slane %v1944_v22, 7 }
 0x489   :  { %2264 = vst [vmem:[#allocation4 + $0x1] sm:$0x1] %v1944_v22  ;;  %v2250_v62 = vrot.slane %v1944_v22, 1  ;;  %v2252_v53 = vrot.slane %v1944_v22, 3  ;;  %v2253_v0 = vrot.slane %v1944_v22, 4 }
 0x48a   :  { %2266 = vst [vmem:[#allocation4 + $0x11] sm:$0x1] %v2251_v7 }
 0x48b   :  { %2269 = vst [vmem:[#allocation4 + $0x29] sm:$0x1] %v2254_v23 }
 0x48c   :  { %2270 = vst [vmem:[#allocation4 + $0x31] sm:$0x1] %v2255_v27 }
 0x48d   :  { %2271 = vst [vmem:[#allocation4 + $0x39] sm:$0x1] %v2256_v60  ;;  %v1963_v51 = vpop.f32.mrf.mxu2 }
 0x48e   :  { %2265 = vst [vmem:[#allocation4 + $0x9] sm:$0x1] %v2250_v62  ;;  %v1964_v57 = vadd.f32 %v1963_v51, %v6385_v10 }
 0x48f   :  { %2267 = vst [vmem:[#allocation4 + $0x19] sm:$0x1] %v2252_v53 }
 0x490   :  { %2268 = vst [vmem:[#allocation4 + $0x21] sm:$0x1] %v2253_v0  ;;  %v2274_v4 = vrot.slane %v1964_v57, 2  ;;  %v2277_v3 = vrot.slane %v1964_v57, 5  ;;  %v2278_v11 = vrot.slane %v1964_v57, 6  ;;  %v2279_v14 = vrot.slane %v1964_v57, 7 }
 0x491   :  { %2287 = vst [vmem:[#allocation4 + $0x2] sm:$0x1] %v1964_v57  ;;  %v2273_v12 = vrot.slane %v1964_v57, 1  ;;  %v2275_v20 = vrot.slane %v1964_v57, 3  ;;  %v2276_v29 = vrot.slane %v1964_v57, 4 }
 0x492   :  { %2289 = vst [vmem:[#allocation4 + $0x12] sm:$0x1] %v2274_v4 }
 0x493   :  { %2292 = vst [vmem:[#allocation4 + $0x2a] sm:$0x1] %v2277_v3 }
 0x494   :  { %2293 = vst [vmem:[#allocation4 + $0x32] sm:$0x1] %v2278_v11 }
 0x495   :  { %2294 = vst [vmem:[#allocation4 + $0x3a] sm:$0x1] %v2279_v14  ;;  %v1983_v13 = vpop.f32.mrf.mxu3 }
 0x496   :  { %2288 = vst [vmem:[#allocation4 + $0xa] sm:$0x1] %v2273_v12  ;;  %v1984_v26 = vadd.f32 %v1983_v13, %v6385_v10 }
 0x497   :  { %2290 = vst [vmem:[#allocation4 + $0x1a] sm:$0x1] %v2275_v20 }
 0x498   :  { %2291 = vst [vmem:[#allocation4 + $0x22] sm:$0x1] %v2276_v29  ;;  %v2297_v46 = vrot.slane %v1984_v26, 2  ;;  %v2300_v17 = vrot.slane %v1984_v26, 5  ;;  %v2301_v30 = vrot.slane %v1984_v26, 6  ;;  %v2302_v50 = vrot.slane %v1984_v26, 7 }
 0x499   :  { %2310 = vst [vmem:[#allocation4 + $0x3] sm:$0x1] %v1984_v26  ;;  %v2296_v19 = vrot.slane %v1984_v26, 1  ;;  %v2298_v34 = vrot.slane %v1984_v26, 3  ;;  %v2299_v54 = vrot.slane %v1984_v26, 4 }
 0x49a   :  { %2312 = vst [vmem:[#allocation4 + $0x13] sm:$0x1] %v2297_v46 }
 0x49b   :  { %2315 = vst [vmem:[#allocation4 + $0x2b] sm:$0x1] %v2300_v17 }
 0x49c   :  { %2316 = vst [vmem:[#allocation4 + $0x33] sm:$0x1] %v2301_v30 }
 0x49d   :  { %2317 = vst [vmem:[#allocation4 + $0x3b] sm:$0x1] %v2302_v50  ;;  %v2003_v24 = vpop.f32.mrf.mxu2 }
 0x49e   :  { %2311 = vst [vmem:[#allocation4 + $0xb] sm:$0x1] %v2296_v19  ;;  %v2004_v9 = vadd.f32 %v2003_v24, %v6385_v10 }
 0x49f   :  { %2313 = vst [vmem:[#allocation4 + $0x1b] sm:$0x1] %v2298_v34 }
 0x4a0   :  { %2314 = vst [vmem:[#allocation4 + $0x23] sm:$0x1] %v2299_v54  ;;  %v2320_v63 = vrot.slane %v2004_v9, 2  ;;  %v2323_v25 = vrot.slane %v2004_v9, 5  ;;  %v2324_v36 = vrot.slane %v2004_v9, 6  ;;  %v2325_v2 = vrot.slane %v2004_v9, 7 }
 0x4a1   :  { %2333 = vst [vmem:[#allocation4 + $0x4] sm:$0x1] %v2004_v9  ;;  %v2319_v37 = vrot.slane %v2004_v9, 1  ;;  %v2321_v39 = vrot.slane %v2004_v9, 3  ;;  %v2322_v8 = vrot.slane %v2004_v9, 4 }
 0x4a2   :  { %2335 = vst [vmem:[#allocation4 + $0x14] sm:$0x1] %v2320_v63 }
 0x4a3   :  { %2338 = vst [vmem:[#allocation4 + $0x2c] sm:$0x1] %v2323_v25 }
 0x4a4   :  { %2339 = vst [vmem:[#allocation4 + $0x34] sm:$0x1] %v2324_v36 }
 0x4a5   :  { %2340 = vst [vmem:[#allocation4 + $0x3c] sm:$0x1] %v2325_v2  ;;  %v2023_v41 = vpop.f32.mrf.mxu3 }
 0x4a6   :  { %2334 = vst [vmem:[#allocation4 + $0xc] sm:$0x1] %v2319_v37  ;;  %v2024_v28 = vadd.f32 %v2023_v41, %v6385_v10 }
 0x4a7   :  { %2336 = vst [vmem:[#allocation4 + $0x1c] sm:$0x1] %v2321_v39 }
 0x4a8   :  { %2337 = vst [vmem:[#allocation4 + $0x24] sm:$0x1] %v2322_v8  ;;  %v2343_v45 = vrot.slane %v2024_v28, 2  ;;  %v2346_v49 = vrot.slane %v2024_v28, 5  ;;  %v2347_v31 = vrot.slane %v2024_v28, 6  ;;  %v2348_v56 = vrot.slane %v2024_v28, 7 }
 0x4a9   :  { %2356 = vst [vmem:[#allocation4 + $0x5] sm:$0x1] %v2024_v28  ;;  %v2342_v59 = vrot.slane %v2024_v28, 1  ;;  %v2344_v32 = vrot.slane %v2024_v28, 3  ;;  %v2345_v33 = vrot.slane %v2024_v28, 4 }
 0x4aa   :  { %2358 = vst [vmem:[#allocation4 + $0x15] sm:$0x1] %v2343_v45 }
 0x4ab   :  { %2361 = vst [vmem:[#allocation4 + $0x2d] sm:$0x1] %v2346_v49 }
 0x4ac   :  { %2362 = vst [vmem:[#allocation4 + $0x35] sm:$0x1] %v2347_v31 }
 0x4ad   :  { %2363 = vst [vmem:[#allocation4 + $0x3d] sm:$0x1] %v2348_v56  ;;  %v2043_v35 = vpop.f32.mrf.mxu2 }
 0x4ae   :  { %2357 = vst [vmem:[#allocation4 + $0xd] sm:$0x1] %v2342_v59  ;;  %v2044_v47 = vadd.f32 %v2043_v35, %v6385_v10 }
 0x4af   :  { %2359 = vst [vmem:[#allocation4 + $0x1d] sm:$0x1] %v2344_v32 }
 0x4b0   :  { %2360 = vst [vmem:[#allocation4 + $0x25] sm:$0x1] %v2345_v33  ;;  %v2366_v38 = vrot.slane %v2044_v47, 2  ;;  %v2369_v40 = vrot.slane %v2044_v47, 5  ;;  %v2370_v42 = vrot.slane %v2044_v47, 6  ;;  %v2371_v43 = vrot.slane %v2044_v47, 7 }
 0x4b1   :  { %2379 = vst [vmem:[#allocation4 + $0x6] sm:$0x1] %v2044_v47  ;;  %v2365_v44 = vrot.slane %v2044_v47, 1  ;;  %v2367_v48 = vrot.slane %v2044_v47, 3  ;;  %v2368_v52 = vrot.slane %v2044_v47, 4 }
 0x4b2   :  { %2381 = vst [vmem:[#allocation4 + $0x16] sm:$0x1] %v2366_v38 }
 0x4b3   :  { %2384 = vst [vmem:[#allocation4 + $0x2e] sm:$0x1] %v2369_v40 }
 0x4b4   :  { %2385 = vst [vmem:[#allocation4 + $0x36] sm:$0x1] %v2370_v42 }
 0x4b5   :  { %2386 = vst [vmem:[#allocation4 + $0x3e] sm:$0x1] %v2371_v43  ;;  %v2063_v55 = vpop.f32.mrf.mxu3 }
 0x4b6   :  { %2380 = vst [vmem:[#allocation4 + $0xe] sm:$0x1] %v2365_v44  ;;  %v2064_v58 = vadd.f32 %v2063_v55, %v6385_v10 }
 0x4b7   :  { %2382 = vst [vmem:[#allocation4 + $0x1e] sm:$0x1] %v2367_v48 }
 0x4b8   :  { %2383 = vst [vmem:[#allocation4 + $0x26] sm:$0x1] %v2368_v52  ;;  %v2389_v61 = vrot.slane %v2064_v58, 2  ;;  %v2392_v1 = vrot.slane %v2064_v58, 5  ;;  %v2393_v5 = vrot.slane %v2064_v58, 6  ;;  %v2394_v6 = vrot.slane %v2064_v58, 7 }
 0x4b9   :  { %2402 = vst [vmem:[#allocation4 + $0x7] sm:$0x1] %v2064_v58  ;;  %v2388_v15 = vrot.slane %v2064_v58, 1  ;;  %v2390_v18 = vrot.slane %v2064_v58, 3  ;;  %v2391_v16 = vrot.slane %v2064_v58, 4 }
 0x4ba   :  { %2404 = vst [vmem:[#allocation4 + $0x17] sm:$0x1] %v2389_v61 }
 0x4bb   :  { %2407 = vst [vmem:[#allocation4 + $0x2f] sm:$0x1] %v2392_v1 }
 0x4bc   :  { %2408 = vst [vmem:[#allocation4 + $0x37] sm:$0x1] %v2393_v5 }
 0x4bd   :  { %2409 = vst [vmem:[#allocation4 + $0x3f] sm:$0x1] %v2394_v6 }
 0x4be   :  { %2403 = vst [vmem:[#allocation4 + $0xf] sm:$0x1] %v2388_v15 }
 0x4bf   :  { %2405 = vst [vmem:[#allocation4 + $0x1f] sm:$0x1] %v2390_v18 }
 0x4c0   :  { %2406 = vst [vmem:[#allocation4 + $0x27] sm:$0x1] %v2391_v16  ;;  %v2595_v21 = vld [vmem:[#allocation4] sm:$0xff] }
 0x4c1   :  { %2596 = vxpose.xlu2.b32.start.end [1/1] (short) %v2595_v21, 128  ;;  %v2697_v7 = vld [vmem:[#allocation4 + $0x10] sm:$0xff] }
 0x4c2   :  { %v2083_v22 = vpop.f32.mrf.mxu2  ;;  %2698 = vxpose.xlu1.b32.start.end [1/1] (short) %v2697_v7, 128 }
 0x4c3   :  { %v2084_v23 = vadd.f32 %v2083_v22, %v6385_v10 }
 0x4c5   :  { %v2411_v27 = vrot.slane %v2084_v23, 1  ;;  %v2412_v60 = vrot.slane %v2084_v23, 2  ;;  %v2413_v62 = vrot.slane %v2084_v23, 3  ;;  %2426 = vst [vmem:[#allocation4 + $0x40] sm:$0x1] %v2084_v23  ;;  %v2414_v53 = vrot.slane %v2084_v23, 4 }
 0x4c6   :  { %v2415_v0 = vrot.slane %v2084_v23, 5  ;;  %v2748_v51 = vld [vmem:[#allocation4 + $0x18] sm:$0xff]  ;;  %v2416_v57 = vrot.slane %v2084_v23, 6  ;;  %v2417_v4 = vrot.slane %v2084_v23, 7 }
 0x4c7   :  { %2427 = vst [vmem:[#allocation4 + $0x48] sm:$0x1] %v2411_v27  ;;  %2749 = vxpose.xlu0.b32.start.end [1/1] (short) %v2748_v51, 128 }
 0x4c8   :  { %2428 = vst [vmem:[#allocation4 + $0x50] sm:$0x1] %v2412_v60 }
 0x4c9   :  { %2429 = vst [vmem:[#allocation4 + $0x58] sm:$0x1] %v2413_v62 }
 0x4ca   :  { %2430 = vst [vmem:[#allocation4 + $0x60] sm:$0x1] %v2414_v53  ;;  %v2103_v3 = vpop.f32.mrf.mxu3 }
 0x4cb   :  { %2431 = vst [vmem:[#allocation4 + $0x68] sm:$0x1] %v2415_v0  ;;  %v2104_v11 = vadd.f32 %v2103_v3, %v6385_v10  ;;  %v2646_v3 = vld [vmem:[#allocation4 + $0x8] sm:$0xff] }
 0x4cc   :  { %2432 = vst [vmem:[#allocation4 + $0x70] sm:$0x1] %v2416_v57 }
 0x4cd   :  { %2433 = vst [vmem:[#allocation4 + $0x78] sm:$0x1] %v2417_v4  ;;  %v2435_v14 = vrot.slane %v2104_v11, 1  ;;  %v2436_v12 = vrot.slane %v2104_v11, 2  ;;  %v2437_v20 = vrot.slane %v2104_v11, 3  ;;  %v2438_v29 = vrot.slane %v2104_v11, 4 }
 0x4ce   :  { %2449 = vst [vmem:[#allocation4 + $0x41] sm:$0x1] %v2104_v11  ;;  %v2439_v13 = vrot.slane %v2104_v11, 5  ;;  %v2440_v26 = vrot.slane %v2104_v11, 6  ;;  %v2441_v46 = vrot.slane %v2104_v11, 7  ;;  %v2799_v11 = vld [vmem:[#allocation4 + $0x20] sm:$0xff] }
 0x4cf   :  { %2450 = vst [vmem:[#allocation4 + $0x49] sm:$0x1] %v2435_v14 }
 0x4d0   :  { %2451 = vst [vmem:[#allocation4 + $0x51] sm:$0x1] %v2436_v12 }
 0x4d1   :  { %2452 = vst [vmem:[#allocation4 + $0x59] sm:$0x1] %v2437_v20 }
 0x4d2   :  { %2453 = vst [vmem:[#allocation4 + $0x61] sm:$0x1] %v2438_v29  ;;  %v2123_v17 = vpop.f32.mrf.mxu2 }
 0x4d3   :  { %2454 = vst [vmem:[#allocation4 + $0x69] sm:$0x1] %v2439_v13  ;;  %v2124_v30 = vadd.f32 %v2123_v17, %v6385_v10 }
 0x4d4   :  { %2455 = vst [vmem:[#allocation4 + $0x71] sm:$0x1] %v2440_v26 }
 0x4d5   :  { %2456 = vst [vmem:[#allocation4 + $0x79] sm:$0x1] %v2441_v46  ;;  %v2458_v50 = vrot.slane %v2124_v30, 1  ;;  %v2459_v19 = vrot.slane %v2124_v30, 2  ;;  %v2460_v34 = vrot.slane %v2124_v30, 3  ;;  %v2461_v54 = vrot.slane %v2124_v30, 4 }
 0x4d6   :  { %2472 = vst [vmem:[#allocation4 + $0x42] sm:$0x1] %v2124_v30  ;;  %v2462_v24 = vrot.slane %v2124_v30, 5  ;;  %v2463_v9 = vrot.slane %v2124_v30, 6  ;;  %v2464_v63 = vrot.slane %v2124_v30, 7 }
 0x4d7   :  { %2473 = vst [vmem:[#allocation4 + $0x4a] sm:$0x1] %v2458_v50 }
 0x4d8   :  { %2474 = vst [vmem:[#allocation4 + $0x52] sm:$0x1] %v2459_v19 }
 0x4d9   :  { %2475 = vst [vmem:[#allocation4 + $0x5a] sm:$0x1] %v2460_v34 }
 0x4da   :  { %2476 = vst [vmem:[#allocation4 + $0x62] sm:$0x1] %v2461_v54  ;;  %v2143_v25 = vpop.f32.mrf.mxu3 }
 0x4db   :  { %2477 = vst [vmem:[#allocation4 + $0x6a] sm:$0x1] %v2462_v24  ;;  %v2144_v36 = vadd.f32 %v2143_v25, %v6385_v10 }
 0x4dc   :  { %2478 = vst [vmem:[#allocation4 + $0x72] sm:$0x1] %v2463_v9 }
 0x4dd   :  { %2479 = vst [vmem:[#allocation4 + $0x7a] sm:$0x1] %v2464_v63  ;;  %v2481_v2 = vrot.slane %v2144_v36, 1  ;;  %v2482_v37 = vrot.slane %v2144_v36, 2  ;;  %v2483_v39 = vrot.slane %v2144_v36, 3  ;;  %v2484_v8 = vrot.slane %v2144_v36, 4 }
 0x4de   :  { %2495 = vst [vmem:[#allocation4 + $0x43] sm:$0x1] %v2144_v36  ;;  %v2485_v41 = vrot.slane %v2144_v36, 5  ;;  %v2486_v28 = vrot.slane %v2144_v36, 6  ;;  %v2487_v45 = vrot.slane %v2144_v36, 7 }
 0x4df   :  { %2496 = vst [vmem:[#allocation4 + $0x4b] sm:$0x1] %v2481_v2 }
 0x4e0   :  { %2497 = vst [vmem:[#allocation4 + $0x53] sm:$0x1] %v2482_v37 }
 0x4e1   :  { %2498 = vst [vmem:[#allocation4 + $0x5b] sm:$0x1] %v2483_v39 }
 0x4e2   :  { %2499 = vst [vmem:[#allocation4 + $0x63] sm:$0x1] %v2484_v8  ;;  %v2163_v49 = vpop.f32.mrf.mxu2  ;;  %v2850_v8 = vld [vmem:[#allocation4 + $0x28] sm:$0xff] }
 0x4e3   :  { %2500 = vst [vmem:[#allocation4 + $0x6b] sm:$0x1] %v2485_v41  ;;  %v2164_v31 = vadd.f32 %v2163_v49, %v6385_v10 }
 0x4e4   :  { %2501 = vst [vmem:[#allocation4 + $0x73] sm:$0x1] %v2486_v28 }
 0x4e5   :  { %2502 = vst [vmem:[#allocation4 + $0x7b] sm:$0x1] %v2487_v45  ;;  %v2504_v56 = vrot.slane %v2164_v31, 1  ;;  %v2505_v59 = vrot.slane %v2164_v31, 2  ;;  %v2506_v32 = vrot.slane %v2164_v31, 3  ;;  %v2507_v33 = vrot.slane %v2164_v31, 4 }
 0x4e6   :  { %2518 = vst [vmem:[#allocation4 + $0x44] sm:$0x1] %v2164_v31  ;;  %v2508_v35 = vrot.slane %v2164_v31, 5  ;;  %v2509_v47 = vrot.slane %v2164_v31, 6  ;;  %v2510_v38 = vrot.slane %v2164_v31, 7  ;;  %v2952_v45 = vld [vmem:[#allocation4 + $0x38] sm:$0xff] }
 0x4e7   :  { %2519 = vst [vmem:[#allocation4 + $0x4c] sm:$0x1] %v2504_v56 }
 0x4e8   :  { %2520 = vst [vmem:[#allocation4 + $0x54] sm:$0x1] %v2505_v59 }
 0x4e9   :  { %2521 = vst [vmem:[#allocation4 + $0x5c] sm:$0x1] %v2506_v32 }
 0x4ea   :  { %2522 = vst [vmem:[#allocation4 + $0x64] sm:$0x1] %v2507_v33  ;;  %v2183_v40 = vpop.f32.mrf.mxu3 }
 0x4eb   :  { %2523 = vst [vmem:[#allocation4 + $0x6c] sm:$0x1] %v2508_v35  ;;  %v2184_v42 = vadd.f32 %v2183_v40, %v6385_v10 }
 0x4ec   :  { %2524 = vst [vmem:[#allocation4 + $0x74] sm:$0x1] %v2509_v47 }
 0x4ed   :  { %2525 = vst [vmem:[#allocation4 + $0x7c] sm:$0x1] %v2510_v38  ;;  %v2527_v43 = vrot.slane %v2184_v42, 1  ;;  %v2528_v44 = vrot.slane %v2184_v42, 2  ;;  %v2529_v48 = vrot.slane %v2184_v42, 3  ;;  %v2530_v52 = vrot.slane %v2184_v42, 4 }
 0x4ee   :  { %2541 = vst [vmem:[#allocation4 + $0x45] sm:$0x1] %v2184_v42  ;;  %v2531_v55 = vrot.slane %v2184_v42, 5  ;;  %v2532_v58 = vrot.slane %v2184_v42, 6  ;;  %v2533_v61 = vrot.slane %v2184_v42, 7 }
 0x4ef   :  { %2542 = vst [vmem:[#allocation4 + $0x4d] sm:$0x1] %v2527_v43 }
 0x4f0   :  { %2543 = vst [vmem:[#allocation4 + $0x55] sm:$0x1] %v2528_v44 }
 0x4f1   :  { %2544 = vst [vmem:[#allocation4 + $0x5d] sm:$0x1] %v2529_v48 }
 0x4f2   :  { %2545 = vst [vmem:[#allocation4 + $0x65] sm:$0x1] %v2530_v52  ;;  %v2203_v1 = vpop.f32.mrf.mxu2 }
 0x4f3   :  { %2546 = vst [vmem:[#allocation4 + $0x6d] sm:$0x1] %v2531_v55  ;;  %v2204_v5 = vadd.f32 %v2203_v1, %v6385_v10 }
 0x4f4   :  { %2547 = vst [vmem:[#allocation4 + $0x75] sm:$0x1] %v2532_v58 }
 0x4f5   :  { %2548 = vst [vmem:[#allocation4 + $0x7d] sm:$0x1] %v2533_v61  ;;  %v2550_v6 = vrot.slane %v2204_v5, 1  ;;  %v2551_v15 = vrot.slane %v2204_v5, 2  ;;  %v2552_v18 = vrot.slane %v2204_v5, 3  ;;  %v2553_v16 = vrot.slane %v2204_v5, 4 }
 0x4f6   :  { %2564 = vst [vmem:[#allocation4 + $0x46] sm:$0x1] %v2204_v5  ;;  %v2554_v21 = vrot.slane %v2204_v5, 5  ;;  %v2555_v22 = vrot.slane %v2204_v5, 6  ;;  %v2556_v7 = vrot.slane %v2204_v5, 7 }
 0x4f7   :  { %2565 = vst [vmem:[#allocation4 + $0x4e] sm:$0x1] %v2550_v6 }
 0x4f8   :  { %2566 = vst [vmem:[#allocation4 + $0x56] sm:$0x1] %v2551_v15 }
 0x4f9   :  { %2567 = vst [vmem:[#allocation4 + $0x5e] sm:$0x1] %v2552_v18 }
 0x4fa   :  { %2568 = vst [vmem:[#allocation4 + $0x66] sm:$0x1] %v2553_v16  ;;  %v2223_v23 = vpop.f32.mrf.mxu3 }
 0x4fb   :  { %2569 = vst [vmem:[#allocation4 + $0x6e] sm:$0x1] %v2554_v21  ;;  %v2224_v27 = vadd.f32 %v2223_v23, %v6385_v10  ;;  %v2901_v10 = vld [vmem:[#allocation4 + $0x30] sm:$0xff] }
 0x4fc   :  { %2570 = vst [vmem:[#allocation4 + $0x76] sm:$0x1] %v2555_v22 }
 0x4fd   :  { %2571 = vst [vmem:[#allocation4 + $0x7e] sm:$0x1] %v2556_v7  ;;  %v2573_v60 = vrot.slane %v2224_v27, 1  ;;  %v2574_v62 = vrot.slane %v2224_v27, 2  ;;  %v2575_v53 = vrot.slane %v2224_v27, 3  ;;  %v2576_v0 = vrot.slane %v2224_v27, 4 }
 0x4fe   :  { %2587 = vst [vmem:[#allocation4 + $0x47] sm:$0x1] %v2224_v27  ;;  %v2577_v51 = vrot.slane %v2224_v27, 5  ;;  %v2578_v57 = vrot.slane %v2224_v27, 6  ;;  %v2579_v4 = vrot.slane %v2224_v27, 7 }
 0x4ff   :  { %2588 = vst [vmem:[#allocation4 + $0x4f] sm:$0x1] %v2573_v60 }
 0x500   :  { %2589 = vst [vmem:[#allocation4 + $0x57] sm:$0x1] %v2574_v62 }
 0x501   :  { %2590 = vst [vmem:[#allocation4 + $0x5f] sm:$0x1] %v2575_v53 }
 0x502   :  { %2591 = vst [vmem:[#allocation4 + $0x67] sm:$0x1] %v2576_v0 }
 0x503   :  { %2592 = vst [vmem:[#allocation4 + $0x6f] sm:$0x1] %v2577_v51 }
 0x504   :  { %2593 = vst [vmem:[#allocation4 + $0x77] sm:$0x1] %v2578_v57 }
 0x505   :  { %2594 = vst [vmem:[#allocation4 + $0x7f] sm:$0x1] %v2579_v4 }
 0x506   :  { %v3053_v41 = vld [vmem:[#allocation4 + $0x48] sm:$0xff] }
 0x541   :  { %2647 = vxpose.xlu2.b32.start.end [1/1] (short) %v2646_v3, 128 }
 0x542   :  { %2902 = vxpose.xlu1.b32.start.end [1/1] (short) %v2901_v10, 128 }
 0x547   :  { %2800 = vxpose.xlu0.b32.start.end [1/1] (short) %v2799_v11, 128 }
 0x55a   :  { %v2612_v14 = vpop.trf.xlu2 }
 0x55b   :  { %2629 = vst.msk [vmem:[%s6357_s4] sm:$0xff] %vm2628_vm1, %v2612_v14 }
 0x562   :  { %v2613_v12 = vpop.trf.xlu2 }
 0x563   :  { %2630 = vst.msk [vmem:[%s6357_s4 + $0x8] sm:$0xff] %vm2628_vm1, %v2613_v12 }
 0x566   :  { %v2714_v34 = vpop.trf.xlu1 }
 0x567   :  { %3685 = vst.msk [vmem:[%s6357_s4 + $0x100] sm:$0xff] %vm2628_vm1, %v2714_v34 }
 0x56a   :  { %v2614_v20 = vpop.trf.xlu2 }
 0x56b   :  { %2631 = vst.msk [vmem:[%s6357_s4 + $0x10] sm:$0xff] %vm2628_vm1, %v2614_v20  ;;  %v2765_v19 = vpop.trf.xlu0 }
 0x56c   :  { %3701 = vst.msk [vmem:[%s6357_s4 + $0x180] sm:$0xff] %vm2628_vm1, %v2765_v19 }
 0x56e   :  { %v2715_v9 = vpop.trf.xlu1 }
 0x56f   :  { %3686 = vst.msk [vmem:[%s6357_s4 + $0x108] sm:$0xff] %vm2628_vm1, %v2715_v9 }
 0x572   :  { %v2615_v29 = vpop.trf.xlu2 }
 0x573   :  { %2632 = vst.msk [vmem:[%s6357_s4 + $0x18] sm:$0xff] %vm2628_vm1, %v2615_v29  ;;  %v2766_v24 = vpop.trf.xlu0 }
 0x574   :  { %3702 = vst.msk [vmem:[%s6357_s4 + $0x188] sm:$0xff] %vm2628_vm1, %v2766_v24 }
 0x576   :  { %v2716_v36 = vpop.trf.xlu1 }
 0x577   :  { %3687 = vst.msk [vmem:[%s6357_s4 + $0x110] sm:$0xff] %vm2628_vm1, %v2716_v36 }
 0x57a   :  { %v2616_v13 = vpop.trf.xlu2 }
 0x57b   :  { %2633 = vst.msk [vmem:[%s6357_s4 + $0x20] sm:$0xff] %vm2628_vm1, %v2616_v13  ;;  %v2767_v25 = vpop.trf.xlu0  ;;  %v3002_v13 = vld [vmem:[#allocation4 + $0x40] sm:$0xff] }
 0x57c   :  { %3703 = vst.msk [vmem:[%s6357_s4 + $0x190] sm:$0xff] %vm2628_vm1, %v2767_v25 }
 0x57e   :  { %v2717_v39 = vpop.trf.xlu1 }
 0x57f   :  { %3688 = vst.msk [vmem:[%s6357_s4 + $0x118] sm:$0xff] %vm2628_vm1, %v2717_v39 }
 0x582   :  { %v2617_v26 = vpop.trf.xlu2 }
 0x583   :  { %2634 = vst.msk [vmem:[%s6357_s4 + $0x28] sm:$0xff] %vm2628_vm1, %v2617_v26  ;;  %v2768_v37 = vpop.trf.xlu0  ;;  %v3206_v26 = vld [vmem:[#allocation4 + $0x60] sm:$0xff] }
 0x584   :  { %3704 = vst.msk [vmem:[%s6357_s4 + $0x198] sm:$0xff] %vm2628_vm1, %v2768_v37 }
 0x586   :  { %v2718_v31 = vpop.trf.xlu1 }
 0x587   :  { %3689 = vst.msk [vmem:[%s6357_s4 + $0x120] sm:$0xff] %vm2628_vm1, %v2718_v31 }
 0x58a   :  { %v2618_v46 = vpop.trf.xlu2 }
 0x58b   :  { %2635 = vst.msk [vmem:[%s6357_s4 + $0x30] sm:$0xff] %vm2628_vm1, %v2618_v46  ;;  %v2769_v49 = vpop.trf.xlu0 }
 0x58c   :  { %3705 = vst.msk [vmem:[%s6357_s4 + $0x1a0] sm:$0xff] %vm2628_vm1, %v2769_v49 }
 0x58e   :  { %v2719_v32 = vpop.trf.xlu1 }
 0x58f   :  { %3690 = vst.msk [vmem:[%s6357_s4 + $0x128] sm:$0xff] %vm2628_vm1, %v2719_v32 }
 0x592   :  { %v2619_v17 = vpop.trf.xlu2 }
 0x593   :  { %2636 = vst.msk [vmem:[%s6357_s4 + $0x38] sm:$0xff] %vm2628_vm1, %v2619_v17  ;;  %v2770_v59 = vpop.trf.xlu0 }
 0x594   :  { %3706 = vst.msk [vmem:[%s6357_s4 + $0x1a8] sm:$0xff] %vm2628_vm1, %v2770_v59 }
 0x596   :  { %v2720_v47 = vpop.trf.xlu1 }
 0x597   :  { %3691 = vst.msk [vmem:[%s6357_s4 + $0x130] sm:$0xff] %vm2628_vm1, %v2720_v47 }
 0x59a   :  { %v2620_v30 = vpop.trf.xlu2 }
 0x59b   :  { %2637 = vst.msk [vmem:[%s6357_s4 + $0x40] sm:$0xff] %vm2628_vm1, %v2620_v30  ;;  %v2771_v35 = vpop.trf.xlu0  ;;  %v3104_v30 = vld [vmem:[#allocation4 + $0x50] sm:$0xff] }
 0x59c   :  { %3707 = vst.msk [vmem:[%s6357_s4 + $0x1b0] sm:$0xff] %vm2628_vm1, %v2771_v35 }
 0x59e   :  { %v2721_v42 = vpop.trf.xlu1 }
 0x59f   :  { %3692 = vst.msk [vmem:[%s6357_s4 + $0x138] sm:$0xff] %vm2628_vm1, %v2721_v42 }
 0x5a2   :  { %v2621_v50 = vpop.trf.xlu2 }
 0x5a3   :  { %2638 = vst.msk [vmem:[%s6357_s4 + $0x48] sm:$0xff] %vm2628_vm1, %v2621_v50  ;;  %v2772_v40 = vpop.trf.xlu0 }
 0x5a4   :  { %3708 = vst.msk [vmem:[%s6357_s4 + $0x1b8] sm:$0xff] %vm2628_vm1, %v2772_v40 }
 0x5a6   :  { %v2722_v48 = vpop.trf.xlu1 }
 0x5a7   :  { %3693 = vst.msk [vmem:[%s6357_s4 + $0x140] sm:$0xff] %vm2628_vm1, %v2722_v48 }
 0x5aa   :  { %v2622_v54 = vpop.trf.xlu2 }
 0x5ab   :  { %2639 = vst.msk [vmem:[%s6357_s4 + $0x50] sm:$0xff] %vm2628_vm1, %v2622_v54  ;;  %v2773_v44 = vpop.trf.xlu0 }
 0x5ac   :  { %3709 = vst.msk [vmem:[%s6357_s4 + $0x1c0] sm:$0xff] %vm2628_vm1, %v2773_v44 }
 0x5ae   :  { %v2723_v58 = vpop.trf.xlu1 }
 0x5af   :  { %3694 = vst.msk [vmem:[%s6357_s4 + $0x148] sm:$0xff] %vm2628_vm1, %v2723_v58 }
 0x5b2   :  { %v2623_v63 = vpop.trf.xlu2 }
 0x5b3   :  { %2640 = vst.msk [vmem:[%s6357_s4 + $0x58] sm:$0xff] %vm2628_vm1, %v2623_v63  ;;  %v2774_v55 = vpop.trf.xlu0 }
 0x5b4   :  { %3710 = vst.msk [vmem:[%s6357_s4 + $0x1c8] sm:$0xff] %vm2628_vm1, %v2774_v55 }
 0x5b6   :  { %v2724_v5 = vpop.trf.xlu1 }
 0x5b7   :  { %3695 = vst.msk [vmem:[%s6357_s4 + $0x150] sm:$0xff] %vm2628_vm1, %v2724_v5 }
 0x5ba   :  { %v2624_v2 = vpop.trf.xlu2 }
 0x5bb   :  { %2641 = vst.msk [vmem:[%s6357_s4 + $0x60] sm:$0xff] %vm2628_vm1, %v2624_v2  ;;  %v2775_v1 = vpop.trf.xlu0 }
 0x5bc   :  { %3711 = vst.msk [vmem:[%s6357_s4 + $0x1d0] sm:$0xff] %vm2628_vm1, %v2775_v1 }
 0x5be   :  { %v2725_v18 = vpop.trf.xlu1 }
 0x5bf   :  { %3696 = vst.msk [vmem:[%s6357_s4 + $0x158] sm:$0xff] %vm2628_vm1, %v2725_v18 }
 0x5c1   :  { %2851 = vxpose.xlu2.b32.start.end [1/1] (short) %v2850_v8, 128 }
 0x5c2   :  { %3054 = vxpose.xlu1.b32.start.end [1/1] (short) %v3053_v41, 128  ;;  %v2625_v28 = vpop.trf.xlu2 }
 0x5c3   :  { %2642 = vst.msk [vmem:[%s6357_s4 + $0x68] sm:$0xff] %vm2628_vm1, %v2625_v28  ;;  %v2776_v15 = vpop.trf.xlu0 }
 0x5c4   :  { %3712 = vst.msk [vmem:[%s6357_s4 + $0x1d8] sm:$0xff] %vm2628_vm1, %v2776_v15 }
 0x5c6   :  { %v2726_v22 = vpop.trf.xlu1 }
 0x5c7   :  { %2953 = vxpose.xlu0.b32.start.end [1/1] (short) %v2952_v45, 128  ;;  %3697 = vst.msk [vmem:[%s6357_s4 + $0x160] sm:$0xff] %vm2628_vm1, %v2726_v22 }
 0x5ca   :  { %v2626_v56 = vpop.trf.xlu2 }
 0x5cb   :  { %2643 = vst.msk [vmem:[%s6357_s4 + $0x70] sm:$0xff] %vm2628_vm1, %v2626_v56  ;;  %v2777_v21 = vpop.trf.xlu0 }
 0x5cc   :  { %3713 = vst.msk [vmem:[%s6357_s4 + $0x1e0] sm:$0xff] %vm2628_vm1, %v2777_v21 }
 0x5ce   :  { %v2727_v27 = vpop.trf.xlu1 }
 0x5cf   :  { %3698 = vst.msk [vmem:[%s6357_s4 + $0x168] sm:$0xff] %vm2628_vm1, %v2727_v27 }
 0x5d2   :  { %v2627_v33 = vpop.trf.xlu2 }
 0x5d3   :  { %2644 = vst.msk [vmem:[%s6357_s4 + $0x78] sm:$0xff] %vm2628_vm1, %v2627_v33  ;;  %v2778_v23 = vpop.trf.xlu0 }
 0x5d4   :  { %3714 = vst.msk [vmem:[%s6357_s4 + $0x1e8] sm:$0xff] %vm2628_vm1, %v2778_v23 }
 0x5d6   :  { %v2728_v51 = vpop.trf.xlu1 }
 0x5d7   :  { %3699 = vst.msk [vmem:[%s6357_s4 + $0x170] sm:$0xff] %vm2628_vm1, %v2728_v51  ;;  %v3257_v51 = vld [vmem:[#allocation4 + $0x68] sm:$0xff] }
 0x5da   :  { %v2663_v38 = vpop.trf.xlu2 }
 0x5db   :  { %3669 = vst.msk [vmem:[%s6357_s4 + $0x80] sm:$0xff] %vm2628_vm1, %v2663_v38  ;;  %v2779_v53 = vpop.trf.xlu0 }
 0x5dc   :  { %3715 = vst.msk [vmem:[%s6357_s4 + $0x1f0] sm:$0xff] %vm2628_vm1, %v2779_v53  ;;  %v3359_v53 = vld [vmem:[#allocation4 + $0x78] sm:$0xff] }
 0x5de   :  { %v2729_v3 = vpop.trf.xlu1 }
 0x5df   :  { %3700 = vst.msk [vmem:[%s6357_s4 + $0x178] sm:$0xff] %vm2628_vm1, %v2729_v3 }
 0x5e2   :  { %v2664_v43 = vpop.trf.xlu2 }
 0x5e3   :  { %3670 = vst.msk [vmem:[%s6357_s4 + $0x88] sm:$0xff] %vm2628_vm1, %v2664_v43  ;;  %v2780_v57 = vpop.trf.xlu0 }
 0x5e4   :  { %3716 = vst.msk [vmem:[%s6357_s4 + $0x1f8] sm:$0xff] %vm2628_vm1, %v2780_v57 }
 0x5e6   :  { %v2918_v14 = vpop.trf.xlu1 }
 0x5e7   :  { %3749 = vst.msk [vmem:[%s6357_s4 + $0x300] sm:$0xff] %vm2628_vm1, %v2918_v14 }
 0x5ea   :  { %v2665_v52 = vpop.trf.xlu2 }
 0x5eb   :  { %3671 = vst.msk [vmem:[%s6357_s4 + $0x90] sm:$0xff] %vm2628_vm1, %v2665_v52  ;;  %v2816_v10 = vpop.trf.xlu0 }
 0x5ec   :  { %3717 = vst.msk [vmem:[%s6357_s4 + $0x200] sm:$0xff] %vm2628_vm1, %v2816_v10 }
 0x5ee   :  { %v2919_v29 = vpop.trf.xlu1 }
 0x5ef   :  { %3750 = vst.msk [vmem:[%s6357_s4 + $0x308] sm:$0xff] %vm2628_vm1, %v2919_v29 }
 0x5f2   :  { %v2666_v61 = vpop.trf.xlu2 }
 0x5f3   :  { %3672 = vst.msk [vmem:[%s6357_s4 + $0x98] sm:$0xff] %vm2628_vm1, %v2666_v61  ;;  %v2817_v12 = vpop.trf.xlu0 }
 0x5f4   :  { %3718 = vst.msk [vmem:[%s6357_s4 + $0x208] sm:$0xff] %vm2628_vm1, %v2817_v12 }
 0x5f6   :  { %v2920_v50 = vpop.trf.xlu1 }
 0x5f7   :  { %3751 = vst.msk [vmem:[%s6357_s4 + $0x310] sm:$0xff] %vm2628_vm1, %v2920_v50 }
 0x5fa   :  { %v2667_v6 = vpop.trf.xlu2 }
 0x5fb   :  { %3673 = vst.msk [vmem:[%s6357_s4 + $0xa0] sm:$0xff] %vm2628_vm1, %v2667_v6  ;;  %v2818_v46 = vpop.trf.xlu0 }
 0x5fc   :  { %3719 = vst.msk [vmem:[%s6357_s4 + $0x210] sm:$0xff] %vm2628_vm1, %v2818_v46 }
 0x5fe   :  { %v2921_v54 = vpop.trf.xlu1 }
 0x5ff   :  { %3752 = vst.msk [vmem:[%s6357_s4 + $0x318] sm:$0xff] %vm2628_vm1, %v2921_v54 }
 0x602   :  { %v2668_v16 = vpop.trf.xlu2 }
 0x603   :  { %3674 = vst.msk [vmem:[%s6357_s4 + $0xa8] sm:$0xff] %vm2628_vm1, %v2668_v16  ;;  %v2819_v19 = vpop.trf.xlu0 }
 0x604   :  { %3720 = vst.msk [vmem:[%s6357_s4 + $0x218] sm:$0xff] %vm2628_vm1, %v2819_v19 }
 0x606   :  { %v2922_v63 = vpop.trf.xlu1 }
 0x607   :  { %3753 = vst.msk [vmem:[%s6357_s4 + $0x320] sm:$0xff] %vm2628_vm1, %v2922_v63 }
 0x60a   :  { %v2669_v7 = vpop.trf.xlu2 }
 0x60b   :  { %3675 = vst.msk [vmem:[%s6357_s4 + $0xb0] sm:$0xff] %vm2628_vm1, %v2669_v7  ;;  %v2820_v24 = vpop.trf.xlu0 }
 0x60c   :  { %3721 = vst.msk [vmem:[%s6357_s4 + $0x220] sm:$0xff] %vm2628_vm1, %v2820_v24 }
 0x60e   :  { %v2923_v2 = vpop.trf.xlu1 }
 0x60f   :  { %3754 = vst.msk [vmem:[%s6357_s4 + $0x328] sm:$0xff] %vm2628_vm1, %v2923_v2 }
 0x612   :  { %v2670_v60 = vpop.trf.xlu2 }
 0x613   :  { %3676 = vst.msk [vmem:[%s6357_s4 + $0xb8] sm:$0xff] %vm2628_vm1, %v2670_v60  ;;  %v2821_v25 = vpop.trf.xlu0 }
 0x614   :  { %3722 = vst.msk [vmem:[%s6357_s4 + $0x228] sm:$0xff] %vm2628_vm1, %v2821_v25 }
 0x616   :  { %v2924_v8 = vpop.trf.xlu1 }
 0x617   :  { %3755 = vst.msk [vmem:[%s6357_s4 + $0x330] sm:$0xff] %vm2628_vm1, %v2924_v8 }
 0x61a   :  { %v2671_v62 = vpop.trf.xlu2 }
 0x61b   :  { %3677 = vst.msk [vmem:[%s6357_s4 + $0xc0] sm:$0xff] %vm2628_vm1, %v2671_v62  ;;  %v2822_v37 = vpop.trf.xlu0  ;;  %v3155_v62 = vld [vmem:[#allocation4 + $0x58] sm:$0xff] }
 0x61c   :  { %3723 = vst.msk [vmem:[%s6357_s4 + $0x230] sm:$0xff] %vm2628_vm1, %v2822_v37 }
 0x61e   :  { %v2925_v45 = vpop.trf.xlu1 }
 0x61f   :  { %3756 = vst.msk [vmem:[%s6357_s4 + $0x338] sm:$0xff] %vm2628_vm1, %v2925_v45 }
 0x622   :  { %v2672_v0 = vpop.trf.xlu2 }
 0x623   :  { %3678 = vst.msk [vmem:[%s6357_s4 + $0xc8] sm:$0xff] %vm2628_vm1, %v2672_v0  ;;  %v2823_v41 = vpop.trf.xlu0 }
 0x624   :  { %3724 = vst.msk [vmem:[%s6357_s4 + $0x238] sm:$0xff] %vm2628_vm1, %v2823_v41 }
 0x626   :  { %v2926_v56 = vpop.trf.xlu1 }
 0x627   :  { %3757 = vst.msk [vmem:[%s6357_s4 + $0x340] sm:$0xff] %vm2628_vm1, %v2926_v56 }
 0x62a   :  { %v2673_v4 = vpop.trf.xlu2 }
 0x62b   :  { %3679 = vst.msk [vmem:[%s6357_s4 + $0xd0] sm:$0xff] %vm2628_vm1, %v2673_v4  ;;  %v2824_v49 = vpop.trf.xlu0 }
 0x62c   :  { %3725 = vst.msk [vmem:[%s6357_s4 + $0x240] sm:$0xff] %vm2628_vm1, %v2824_v49 }
 0x62e   :  { %v2927_v33 = vpop.trf.xlu1 }
 0x62f   :  { %3758 = vst.msk [vmem:[%s6357_s4 + $0x348] sm:$0xff] %vm2628_vm1, %v2927_v33 }
 0x632   :  { %v2674_v11 = vpop.trf.xlu2 }
 0x633   :  { %3680 = vst.msk [vmem:[%s6357_s4 + $0xd8] sm:$0xff] %vm2628_vm1, %v2674_v11  ;;  %v2825_v59 = vpop.trf.xlu0 }
 0x634   :  { %3726 = vst.msk [vmem:[%s6357_s4 + $0x248] sm:$0xff] %vm2628_vm1, %v2825_v59 }
 0x636   :  { %v2928_v38 = vpop.trf.xlu1 }
 0x637   :  { %3759 = vst.msk [vmem:[%s6357_s4 + $0x350] sm:$0xff] %vm2628_vm1, %v2928_v38 }
 0x63a   :  { %v2675_v20 = vpop.trf.xlu2 }
 0x63b   :  { %3681 = vst.msk [vmem:[%s6357_s4 + $0xe0] sm:$0xff] %vm2628_vm1, %v2675_v20  ;;  %v2826_v35 = vpop.trf.xlu0 }
 0x63c   :  { %3727 = vst.msk [vmem:[%s6357_s4 + $0x250] sm:$0xff] %vm2628_vm1, %v2826_v35 }
 0x63e   :  { %v2929_v43 = vpop.trf.xlu1 }
 0x63f   :  { %3760 = vst.msk [vmem:[%s6357_s4 + $0x358] sm:$0xff] %vm2628_vm1, %v2929_v43 }
 0x641   :  { %3003 = vxpose.xlu2.b32.start.end [1/1] (short) %v3002_v13, 128 }
 0x642   :  { %3207 = vxpose.xlu1.b32.start.end [1/1] (short) %v3206_v26, 128  ;;  %v2676_v17 = vpop.trf.xlu2 }
 0x643   :  { %3682 = vst.msk [vmem:[%s6357_s4 + $0xe8] sm:$0xff] %vm2628_vm1, %v2676_v17  ;;  %v2827_v40 = vpop.trf.xlu0 }
 0x644   :  { %3728 = vst.msk [vmem:[%s6357_s4 + $0x258] sm:$0xff] %vm2628_vm1, %v2827_v40 }
 0x646   :  { %v2930_v52 = vpop.trf.xlu1 }
 0x647   :  { %3105 = vxpose.xlu0.b32.start.end [1/1] (short) %v3104_v30, 128  ;;  %3761 = vst.msk [vmem:[%s6357_s4 + $0x360] sm:$0xff] %vm2628_vm1, %v2930_v52 }
 0x64a   :  { %v2677_v34 = vpop.trf.xlu2 }
 0x64b   :  { %3683 = vst.msk [vmem:[%s6357_s4 + $0xf0] sm:$0xff] %vm2628_vm1, %v2677_v34  ;;  %v2828_v44 = vpop.trf.xlu0 }
 0x64c   :  { %3729 = vst.msk [vmem:[%s6357_s4 + $0x260] sm:$0xff] %vm2628_vm1, %v2828_v44 }
 0x64e   :  { %v2931_v61 = vpop.trf.xlu1 }
 0x64f   :  { %3762 = vst.msk [vmem:[%s6357_s4 + $0x368] sm:$0xff] %vm2628_vm1, %v2931_v61 }
 0x652   :  { %v2678_v9 = vpop.trf.xlu2 }
 0x653   :  { %3684 = vst.msk [vmem:[%s6357_s4 + $0xf8] sm:$0xff] %vm2628_vm1, %v2678_v9  ;;  %v2829_v55 = vpop.trf.xlu0 }
 0x654   :  { %3730 = vst.msk [vmem:[%s6357_s4 + $0x268] sm:$0xff] %vm2628_vm1, %v2829_v55 }
 0x656   :  { %v2932_v6 = vpop.trf.xlu1 }
 0x657   :  { %3763 = vst.msk [vmem:[%s6357_s4 + $0x370] sm:$0xff] %vm2628_vm1, %v2932_v6 }
 0x65a   :  { %v2867_v36 = vpop.trf.xlu2 }
 0x65b   :  { %3733 = vst.msk [vmem:[%s6357_s4 + $0x280] sm:$0xff] %vm2628_vm1, %v2867_v36  ;;  %v2830_v1 = vpop.trf.xlu0 }
 0x65c   :  { %3731 = vst.msk [vmem:[%s6357_s4 + $0x270] sm:$0xff] %vm2628_vm1, %v2830_v1 }
 0x65e   :  { %v2933_v16 = vpop.trf.xlu1 }
 0x65f   :  { %3764 = vst.msk [vmem:[%s6357_s4 + $0x378] sm:$0xff] %vm2628_vm1, %v2933_v16 }
 0x662   :  { %v2868_v39 = vpop.trf.xlu2 }
 0x663   :  { %3734 = vst.msk [vmem:[%s6357_s4 + $0x288] sm:$0xff] %vm2628_vm1, %v2868_v39  ;;  %v2831_v18 = vpop.trf.xlu0 }
 0x664   :  { %3732 = vst.msk [vmem:[%s6357_s4 + $0x278] sm:$0xff] %vm2628_vm1, %v2831_v18 }
 0x666   :  { %v3070_v7 = vpop.trf.xlu1 }
 0x667   :  { %3797 = vst.msk [vmem:[%s6357_s4 + $0x480] sm:$0xff] %vm2628_vm1, %v3070_v7 }
 0x66a   :  { %v2869_v28 = vpop.trf.xlu2 }
 0x66b   :  { %3735 = vst.msk [vmem:[%s6357_s4 + $0x290] sm:$0xff] %vm2628_vm1, %v2869_v28  ;;  %v2969_v22 = vpop.trf.xlu0 }
 0x66c   :  { %3765 = vst.msk [vmem:[%s6357_s4 + $0x380] sm:$0xff] %vm2628_vm1, %v2969_v22 }
 0x66e   :  { %v3071_v60 = vpop.trf.xlu1 }
 0x66f   :  { %3798 = vst.msk [vmem:[%s6357_s4 + $0x488] sm:$0xff] %vm2628_vm1, %v3071_v60 }
 0x672   :  { %v2870_v31 = vpop.trf.xlu2 }
 0x673   :  { %3736 = vst.msk [vmem:[%s6357_s4 + $0x298] sm:$0xff] %vm2628_vm1, %v2870_v31  ;;  %v2970_v27 = vpop.trf.xlu0 }
 0x674   :  { %3766 = vst.msk [vmem:[%s6357_s4 + $0x388] sm:$0xff] %vm2628_vm1, %v2970_v27 }
 0x676   :  { %v3072_v3 = vpop.trf.xlu1 }
 0x677   :  { %3799 = vst.msk [vmem:[%s6357_s4 + $0x490] sm:$0xff] %vm2628_vm1, %v3072_v3 }
 0x67a   :  { %v2871_v32 = vpop.trf.xlu2 }
 0x67b   :  { %3737 = vst.msk [vmem:[%s6357_s4 + $0x2a0] sm:$0xff] %vm2628_vm1, %v2871_v32  ;;  %v2971_v4 = vpop.trf.xlu0 }
 0x67c   :  { %3767 = vst.msk [vmem:[%s6357_s4 + $0x390] sm:$0xff] %vm2628_vm1, %v2971_v4 }
 0x67e   :  { %v3073_v14 = vpop.trf.xlu1 }
 0x67f   :  { %3800 = vst.msk [vmem:[%s6357_s4 + $0x498] sm:$0xff] %vm2628_vm1, %v3073_v14 }
 0x682   :  { %v2872_v47 = vpop.trf.xlu2 }
 0x683   :  { %3738 = vst.msk [vmem:[%s6357_s4 + $0x2a8] sm:$0xff] %vm2628_vm1, %v2872_v47  ;;  %v2972_v11 = vpop.trf.xlu0  ;;  %v6386_v47 = vmov 0  }
 0x684   :  { %3768 = vst.msk [vmem:[%s6357_s4 + $0x398] sm:$0xff] %vm2628_vm1, %v2972_v11 }
 0x686   :  { %v3074_v29 = vpop.trf.xlu1 }
 0x687   :  { %3801 = vst.msk [vmem:[%s6357_s4 + $0x4a0] sm:$0xff] %vm2628_vm1, %v3074_v29 }
 0x68a   :  { %v2873_v42 = vpop.trf.xlu2 }
 0x68b   :  { %3739 = vst.msk [vmem:[%s6357_s4 + $0x2b0] sm:$0xff] %vm2628_vm1, %v2873_v42  ;;  %v2973_v20 = vpop.trf.xlu0 }
 0x68c   :  { %3769 = vst.msk [vmem:[%s6357_s4 + $0x3a0] sm:$0xff] %vm2628_vm1, %v2973_v20 }
 0x68e   :  { %v3075_v46 = vpop.trf.xlu1 }
 0x68f   :  { %3802 = vst.msk [vmem:[%s6357_s4 + $0x4a8] sm:$0xff] %vm2628_vm1, %v3075_v46 }
 0x692   :  { %v2874_v48 = vpop.trf.xlu2 }
 0x693   :  { %3740 = vst.msk [vmem:[%s6357_s4 + $0x2b8] sm:$0xff] %vm2628_vm1, %v2874_v48  ;;  %v2974_v26 = vpop.trf.xlu0 }
 0x694   :  { %3770 = vst.msk [vmem:[%s6357_s4 + $0x3a8] sm:$0xff] %vm2628_vm1, %v2974_v26 }
 0x696   :  { %v3076_v50 = vpop.trf.xlu1 }
 0x697   :  { %3803 = vst.msk [vmem:[%s6357_s4 + $0x4b0] sm:$0xff] %vm2628_vm1, %v3076_v50 }
 0x69a   :  { %v2875_v58 = vpop.trf.xlu2 }
 0x69b   :  { %3741 = vst.msk [vmem:[%s6357_s4 + $0x2c0] sm:$0xff] %vm2628_vm1, %v2875_v58  ;;  %v2975_v30 = vpop.trf.xlu0  ;;  %v3308_v58 = vld [vmem:[#allocation4 + $0x70] sm:$0xff] }
 0x69c   :  { %3771 = vst.msk [vmem:[%s6357_s4 + $0x3b0] sm:$0xff] %vm2628_vm1, %v2975_v30 }
 0x69e   :  { %v3077_v54 = vpop.trf.xlu1 }
 0x69f   :  { %3804 = vst.msk [vmem:[%s6357_s4 + $0x4b8] sm:$0xff] %vm2628_vm1, %v3077_v54 }
 0x6a2   :  { %v2876_v5 = vpop.trf.xlu2 }
 0x6a3   :  { %3742 = vst.msk [vmem:[%s6357_s4 + $0x2c8] sm:$0xff] %vm2628_vm1, %v2876_v5  ;;  %v2976_v34 = vpop.trf.xlu0 }
 0x6a4   :  { %3772 = vst.msk [vmem:[%s6357_s4 + $0x3b8] sm:$0xff] %vm2628_vm1, %v2976_v34 }
 0x6a6   :  { %v3078_v63 = vpop.trf.xlu1 }
 0x6a7   :  { %3805 = vst.msk [vmem:[%s6357_s4 + $0x4c0] sm:$0xff] %vm2628_vm1, %v3078_v63 }
 0x6aa   :  { %v2877_v15 = vpop.trf.xlu2 }
 0x6ab   :  { %3743 = vst.msk [vmem:[%s6357_s4 + $0x2d0] sm:$0xff] %vm2628_vm1, %v2877_v15  ;;  %v2977_v9 = vpop.trf.xlu0 }
 0x6ac   :  { %3773 = vst.msk [vmem:[%s6357_s4 + $0x3c0] sm:$0xff] %vm2628_vm1, %v2977_v9 }
 0x6ae   :  { %v3079_v2 = vpop.trf.xlu1 }
 0x6af   :  { %3806 = vst.msk [vmem:[%s6357_s4 + $0x4c8] sm:$0xff] %vm2628_vm1, %v3079_v2 }
 0x6b2   :  { %v2878_v21 = vpop.trf.xlu2 }
 0x6b3   :  { %3744 = vst.msk [vmem:[%s6357_s4 + $0x2d8] sm:$0xff] %vm2628_vm1, %v2878_v21  ;;  %v2978_v36 = vpop.trf.xlu0 }
 0x6b4   :  { %3774 = vst.msk [vmem:[%s6357_s4 + $0x3c8] sm:$0xff] %vm2628_vm1, %v2978_v36 }
 0x6b6   :  { %v3080_v8 = vpop.trf.xlu1 }
 0x6b7   :  { %3807 = vst.msk [vmem:[%s6357_s4 + $0x4d0] sm:$0xff] %vm2628_vm1, %v3080_v8 }
 0x6ba   :  { %v2879_v23 = vpop.trf.xlu2 }
 0x6bb   :  { %3745 = vst.msk [vmem:[%s6357_s4 + $0x2e0] sm:$0xff] %vm2628_vm1, %v2879_v23  ;;  %v2979_v39 = vpop.trf.xlu0 }
 0x6bc   :  { %3775 = vst.msk [vmem:[%s6357_s4 + $0x3d0] sm:$0xff] %vm2628_vm1, %v2979_v39 }
 0x6be   :  { %v3081_v45 = vpop.trf.xlu1 }
 0x6bf   :  { %3808 = vst.msk [vmem:[%s6357_s4 + $0x4d8] sm:$0xff] %vm2628_vm1, %v3081_v45 }
 0x6c1   :  { %3156 = vxpose.xlu2.b32.start.end [1/1] (short) %v3155_v62, 128 }
 0x6c2   :  { %3360 = vxpose.xlu1.b32.start.end [1/1] (short) %v3359_v53, 128  ;;  %v2880_v0 = vpop.trf.xlu2 }
 0x6c3   :  { %3746 = vst.msk [vmem:[%s6357_s4 + $0x2e8] sm:$0xff] %vm2628_vm1, %v2880_v0  ;;  %v2980_v28 = vpop.trf.xlu0 }
 0x6c4   :  { %3776 = vst.msk [vmem:[%s6357_s4 + $0x3d8] sm:$0xff] %vm2628_vm1, %v2980_v28 }
 0x6c6   :  { %v3082_v56 = vpop.trf.xlu1 }
 0x6c7   :  { %3258 = vxpose.xlu0.b32.start.end [1/1] (short) %v3257_v51, 128  ;;  %3809 = vst.msk [vmem:[%s6357_s4 + $0x4e0] sm:$0xff] %vm2628_vm1, %v3082_v56 }
 0x6ca   :  { %v2881_v57 = vpop.trf.xlu2 }
 0x6cb   :  { %3747 = vst.msk [vmem:[%s6357_s4 + $0x2f0] sm:$0xff] %vm2628_vm1, %v2881_v57  ;;  %v2981_v31 = vpop.trf.xlu0 }
 0x6cc   :  { %3777 = vst.msk [vmem:[%s6357_s4 + $0x3e0] sm:$0xff] %vm2628_vm1, %v2981_v31 }
 0x6ce   :  { %v3083_v33 = vpop.trf.xlu1 }
 0x6cf   :  { %3810 = vst.msk [vmem:[%s6357_s4 + $0x4e8] sm:$0xff] %vm2628_vm1, %v3083_v33 }
 0x6d2   :  { %v2882_v10 = vpop.trf.xlu2 }
 0x6d3   :  { %3748 = vst.msk [vmem:[%s6357_s4 + $0x2f8] sm:$0xff] %vm2628_vm1, %v2882_v10  ;;  %v2982_v32 = vpop.trf.xlu0 }
 0x6d4   :  { %3778 = vst.msk [vmem:[%s6357_s4 + $0x3e8] sm:$0xff] %vm2628_vm1, %v2982_v32 }
 0x6d6   :  { %v3084_v40 = vpop.trf.xlu1 }
 0x6d7   :  { %3811 = vst.msk [vmem:[%s6357_s4 + $0x4f0] sm:$0xff] %vm2628_vm1, %v3084_v40 }
 0x6da   :  { %v3019_v12 = vpop.trf.xlu2 }
 0x6db   :  { %3781 = vst.msk [vmem:[%s6357_s4 + $0x400] sm:$0xff] %vm2628_vm1, %v3019_v12  ;;  %v2983_v38 = vpop.trf.xlu0 }
 0x6dc   :  { %3779 = vst.msk [vmem:[%s6357_s4 + $0x3f0] sm:$0xff] %vm2628_vm1, %v2983_v38 }
 0x6de   :  { %v3085_v44 = vpop.trf.xlu1 }
 0x6df   :  { %3812 = vst.msk [vmem:[%s6357_s4 + $0x4f8] sm:$0xff] %vm2628_vm1, %v3085_v44 }
 0x6e2   :  { %v3020_v13 = vpop.trf.xlu2 }
 0x6e3   :  { %3782 = vst.msk [vmem:[%s6357_s4 + $0x408] sm:$0xff] %vm2628_vm1, %v3020_v13  ;;  %v2984_v43 = vpop.trf.xlu0 }
 0x6e4   :  { %3780 = vst.msk [vmem:[%s6357_s4 + $0x3f8] sm:$0xff] %vm2628_vm1, %v2984_v43 }
 0x6e6   :  { %v3223_v55 = vpop.trf.xlu1 }
 0x6e7   :  { %3845 = vst.msk [vmem:[%s6357_s4 + $0x600] sm:$0xff] %vm2628_vm1, %v3223_v55 }
 0x6ea   :  { %v3021_v17 = vpop.trf.xlu2 }
 0x6eb   :  { %3783 = vst.msk [vmem:[%s6357_s4 + $0x410] sm:$0xff] %vm2628_vm1, %v3021_v17  ;;  %v3121_v52 = vpop.trf.xlu0 }
 0x6ec   :  { %3813 = vst.msk [vmem:[%s6357_s4 + $0x500] sm:$0xff] %vm2628_vm1, %v3121_v52 }
 0x6ee   :  { %v3224_v5 = vpop.trf.xlu1 }
 0x6ef   :  { %3846 = vst.msk [vmem:[%s6357_s4 + $0x608] sm:$0xff] %vm2628_vm1, %v3224_v5 }
 0x6f2   :  { %v3022_v19 = vpop.trf.xlu2 }
 0x6f3   :  { %3784 = vst.msk [vmem:[%s6357_s4 + $0x418] sm:$0xff] %vm2628_vm1, %v3022_v19  ;;  %v3122_v1 = vpop.trf.xlu0 }
 0x6f4   :  { %3814 = vst.msk [vmem:[%s6357_s4 + $0x508] sm:$0xff] %vm2628_vm1, %v3122_v1 }
 0x6f6   :  { %v3225_v18 = vpop.trf.xlu1 }
 0x6f7   :  { %3847 = vst.msk [vmem:[%s6357_s4 + $0x610] sm:$0xff] %vm2628_vm1, %v3225_v18 }
 0x6fa   :  { %v3023_v24 = vpop.trf.xlu2 }
 0x6fb   :  { %3785 = vst.msk [vmem:[%s6357_s4 + $0x420] sm:$0xff] %vm2628_vm1, %v3023_v24  ;;  %v3123_v15 = vpop.trf.xlu0 }
 0x6fc   :  { %3815 = vst.msk [vmem:[%s6357_s4 + $0x510] sm:$0xff] %vm2628_vm1, %v3123_v15 }
 0x6fe   :  { %v3226_v22 = vpop.trf.xlu1 }
 0x6ff   :  { %3848 = vst.msk [vmem:[%s6357_s4 + $0x618] sm:$0xff] %vm2628_vm1, %v3226_v22 }
 0x702   :  { %v3024_v25 = vpop.trf.xlu2 }
 0x703   :  { %3786 = vst.msk [vmem:[%s6357_s4 + $0x428] sm:$0xff] %vm2628_vm1, %v3024_v25  ;;  %v3124_v21 = vpop.trf.xlu0 }
 0x704   :  { %3816 = vst.msk [vmem:[%s6357_s4 + $0x518] sm:$0xff] %vm2628_vm1, %v3124_v21 }
 0x706   :  { %v3227_v27 = vpop.trf.xlu1 }
 0x707   :  { %3849 = vst.msk [vmem:[%s6357_s4 + $0x620] sm:$0xff] %vm2628_vm1, %v3227_v27 }
 0x70a   :  { %v3025_v37 = vpop.trf.xlu2 }
 0x70b   :  { %3787 = vst.msk [vmem:[%s6357_s4 + $0x430] sm:$0xff] %vm2628_vm1, %v3025_v37  ;;  %v3125_v23 = vpop.trf.xlu0 }
 0x70c   :  { %3817 = vst.msk [vmem:[%s6357_s4 + $0x520] sm:$0xff] %vm2628_vm1, %v3125_v23 }
 0x70e   :  { %v3228_v53 = vpop.trf.xlu1 }
 0x70f   :  { %3850 = vst.msk [vmem:[%s6357_s4 + $0x628] sm:$0xff] %vm2628_vm1, %v3228_v53 }
 0x712   :  { %v3026_v41 = vpop.trf.xlu2 }
 0x713   :  { %3788 = vst.msk [vmem:[%s6357_s4 + $0x438] sm:$0xff] %vm2628_vm1, %v3026_v41  ;;  %v3126_v62 = vpop.trf.xlu0 }
 0x714   :  { %3818 = vst.msk [vmem:[%s6357_s4 + $0x528] sm:$0xff] %vm2628_vm1, %v3126_v62 }
 0x716   :  { %v3229_v57 = vpop.trf.xlu1 }
 0x717   :  { %3851 = vst.msk [vmem:[%s6357_s4 + $0x630] sm:$0xff] %vm2628_vm1, %v3229_v57 }
 0x71a   :  { %v3027_v49 = vpop.trf.xlu2 }
 0x71b   :  { %3789 = vst.msk [vmem:[%s6357_s4 + $0x440] sm:$0xff] %vm2628_vm1, %v3027_v49  ;;  %v3127_v51 = vpop.trf.xlu0 }
 0x71c   :  { %3819 = vst.msk [vmem:[%s6357_s4 + $0x530] sm:$0xff] %vm2628_vm1, %v3127_v51 }
 0x71e   :  { %v3230_v10 = vpop.trf.xlu1 }
 0x71f   :  { %3852 = vst.msk [vmem:[%s6357_s4 + $0x638] sm:$0xff] %vm2628_vm1, %v3230_v10 }
 0x722   :  { %v3028_v59 = vpop.trf.xlu2 }
 0x723   :  { %3790 = vst.msk [vmem:[%s6357_s4 + $0x448] sm:$0xff] %vm2628_vm1, %v3028_v59  ;;  %v3128_v3 = vpop.trf.xlu0 }
 0x724   :  { %3820 = vst.msk [vmem:[%s6357_s4 + $0x538] sm:$0xff] %vm2628_vm1, %v3128_v3 }
 0x726   :  { %v3231_v12 = vpop.trf.xlu1 }
 0x727   :  { %3853 = vst.msk [vmem:[%s6357_s4 + $0x640] sm:$0xff] %vm2628_vm1, %v3231_v12 }
 0x72a   :  { %v3029_v35 = vpop.trf.xlu2 }
 0x72b   :  { %3791 = vst.msk [vmem:[%s6357_s4 + $0x450] sm:$0xff] %vm2628_vm1, %v3029_v35  ;;  %v3129_v14 = vpop.trf.xlu0 }
 0x72c   :  { %3821 = vst.msk [vmem:[%s6357_s4 + $0x540] sm:$0xff] %vm2628_vm1, %v3129_v14 }
 0x72e   :  { %3912 = vset.pattern.permute.xlu0 %v6386_v47  ;;  %v3232_v13 = vpop.trf.xlu1 }
 0x72f   :  { %3854 = vst.msk [vmem:[%s6357_s4 + $0x648] sm:$0xff] %vm2628_vm1, %v3232_v13 }
 0x732   :  { %v3030_v42 = vpop.trf.xlu2 }
 0x733   :  { %3792 = vst.msk [vmem:[%s6357_s4 + $0x458] sm:$0xff] %vm2628_vm1, %v3030_v42  ;;  %v3130_v29 = vpop.trf.xlu0 }
 0x734   :  { %3822 = vst.msk [vmem:[%s6357_s4 + $0x548] sm:$0xff] %vm2628_vm1, %v3130_v29 }
 0x736   :  { %v3233_v17 = vpop.trf.xlu1 }
 0x737   :  { %3855 = vst.msk [vmem:[%s6357_s4 + $0x650] sm:$0xff] %vm2628_vm1, %v3233_v17 }
 0x73a   :  { %v3031_v48 = vpop.trf.xlu2 }
 0x73b   :  { %3793 = vst.msk [vmem:[%s6357_s4 + $0x460] sm:$0xff] %vm2628_vm1, %v3031_v48  ;;  %v3131_v46 = vpop.trf.xlu0 }
 0x73c   :  { %3823 = vst.msk [vmem:[%s6357_s4 + $0x550] sm:$0xff] %vm2628_vm1, %v3131_v46 }
 0x73e   :  { %v3234_v19 = vpop.trf.xlu1 }
 0x73f   :  { %3856 = vst.msk [vmem:[%s6357_s4 + $0x658] sm:$0xff] %vm2628_vm1, %v3234_v19 }
 0x741   :  { %3309 = vxpose.xlu2.b32.start.end [1/1] (short) %v3308_v58, 128 }
 0x742   :  { %v3032_v61 = vpop.trf.xlu2 }
 0x743   :  { %3794 = vst.msk [vmem:[%s6357_s4 + $0x468] sm:$0xff] %vm2628_vm1, %v3032_v61  ;;  %v3132_v50 = vpop.trf.xlu0 }
 0x744   :  { %3824 = vst.msk [vmem:[%s6357_s4 + $0x558] sm:$0xff] %vm2628_vm1, %v3132_v50 }
 0x746   :  { %v3235_v24 = vpop.trf.xlu1 }
 0x747   :  { %3857 = vst.msk [vmem:[%s6357_s4 + $0x660] sm:$0xff] %vm2628_vm1, %v3235_v24 }
 0x74a   :  { %v3033_v6 = vpop.trf.xlu2 }
 0x74b   :  { %3795 = vst.msk [vmem:[%s6357_s4 + $0x470] sm:$0xff] %vm2628_vm1, %v3033_v6  ;;  %v3133_v54 = vpop.trf.xlu0 }
 0x74c   :  { %3825 = vst.msk [vmem:[%s6357_s4 + $0x560] sm:$0xff] %vm2628_vm1, %v3133_v54 }
 0x74e   :  { %v3236_v25 = vpop.trf.xlu1 }
 0x74f   :  { %3858 = vst.msk [vmem:[%s6357_s4 + $0x668] sm:$0xff] %vm2628_vm1, %v3236_v25 }
 0x752   :  { %v3034_v16 = vpop.trf.xlu2 }
 0x753   :  { %3796 = vst.msk [vmem:[%s6357_s4 + $0x478] sm:$0xff] %vm2628_vm1, %v3034_v16  ;;  %v3134_v63 = vpop.trf.xlu0 }
 0x754   :  { %3826 = vst.msk [vmem:[%s6357_s4 + $0x568] sm:$0xff] %vm2628_vm1, %v3134_v63 }
 0x756   :  { %v3237_v37 = vpop.trf.xlu1 }
 0x757   :  { %3859 = vst.msk [vmem:[%s6357_s4 + $0x670] sm:$0xff] %vm2628_vm1, %v3237_v37 }
 0x75a   :  { %v3172_v7 = vpop.trf.xlu2 }
 0x75b   :  { %3829 = vst.msk [vmem:[%s6357_s4 + $0x580] sm:$0xff] %vm2628_vm1, %v3172_v7  ;;  %v3135_v2 = vpop.trf.xlu0 }
 0x75c   :  { %3827 = vst.msk [vmem:[%s6357_s4 + $0x570] sm:$0xff] %vm2628_vm1, %v3135_v2 }
 0x75e   :  { %v3238_v41 = vpop.trf.xlu1 }
 0x75f   :  { %3860 = vst.msk [vmem:[%s6357_s4 + $0x678] sm:$0xff] %vm2628_vm1, %v3238_v41 }
 0x762   :  { %v3173_v60 = vpop.trf.xlu2 }
 0x763   :  { %3830 = vst.msk [vmem:[%s6357_s4 + $0x588] sm:$0xff] %vm2628_vm1, %v3173_v60  ;;  %v3136_v8 = vpop.trf.xlu0 }
 0x764   :  { %3828 = vst.msk [vmem:[%s6357_s4 + $0x578] sm:$0xff] %vm2628_vm1, %v3136_v8 }
 0x766   :  { %v3376_v49 = vpop.trf.xlu1 }
 0x767   :  { %3893 = vst.msk [vmem:[%s6357_s4 + $0x780] sm:$0xff] %vm2628_vm1, %v3376_v49 }
 0x76a   :  { %v3174_v0 = vpop.trf.xlu2 }
 0x76b   :  { %3831 = vst.msk [vmem:[%s6357_s4 + $0x590] sm:$0xff] %vm2628_vm1, %v3174_v0  ;;  %v3274_v45 = vpop.trf.xlu0 }
 0x76c   :  { %3861 = vst.msk [vmem:[%s6357_s4 + $0x680] sm:$0xff] %vm2628_vm1, %v3274_v45 }
 0x76e   :  { %v3377_v59 = vpop.trf.xlu1 }
 0x76f   :  { %3894 = vst.msk [vmem:[%s6357_s4 + $0x788] sm:$0xff] %vm2628_vm1, %v3377_v59 }
 0x772   :  { %v3175_v4 = vpop.trf.xlu2 }
 0x773   :  { %3832 = vst.msk [vmem:[%s6357_s4 + $0x598] sm:$0xff] %vm2628_vm1, %v3175_v4  ;;  %v3275_v56 = vpop.trf.xlu0 }
 0x774   :  { %3862 = vst.msk [vmem:[%s6357_s4 + $0x688] sm:$0xff] %vm2628_vm1, %v3275_v56 }
 0x776   :  { %v3378_v35 = vpop.trf.xlu1 }
 0x777   :  { %3895 = vst.msk [vmem:[%s6357_s4 + $0x790] sm:$0xff] %vm2628_vm1, %v3378_v35 }
 0x77a   :  { %v3176_v11 = vpop.trf.xlu2 }
 0x77b   :  { %3833 = vst.msk [vmem:[%s6357_s4 + $0x5a0] sm:$0xff] %vm2628_vm1, %v3176_v11  ;;  %v3276_v33 = vpop.trf.xlu0 }
 0x77c   :  { %3863 = vst.msk [vmem:[%s6357_s4 + $0x690] sm:$0xff] %vm2628_vm1, %v3276_v33 }
 0x77e   :  { %v3379_v40 = vpop.trf.xlu1 }
 0x77f   :  { %3896 = vst.msk [vmem:[%s6357_s4 + $0x798] sm:$0xff] %vm2628_vm1, %v3379_v40 }
 0x782   :  { %v3177_v20 = vpop.trf.xlu2 }
 0x783   :  { %3834 = vst.msk [vmem:[%s6357_s4 + $0x5a8] sm:$0xff] %vm2628_vm1, %v3177_v20  ;;  %v3277_v38 = vpop.trf.xlu0 }
 0x784   :  { %3864 = vst.msk [vmem:[%s6357_s4 + $0x698] sm:$0xff] %vm2628_vm1, %v3277_v38 }
 0x786   :  { %v3380_v44 = vpop.trf.xlu1 }
 0x787   :  { %3897 = vst.msk [vmem:[%s6357_s4 + $0x7a0] sm:$0xff] %vm2628_vm1, %v3380_v44 }
 0x78a   :  { %v3178_v26 = vpop.trf.xlu2 }
 0x78b   :  { %3835 = vst.msk [vmem:[%s6357_s4 + $0x5b0] sm:$0xff] %vm2628_vm1, %v3178_v26  ;;  %v3278_v43 = vpop.trf.xlu0 }
 0x78c   :  { %3865 = vst.msk [vmem:[%s6357_s4 + $0x6a0] sm:$0xff] %vm2628_vm1, %v3278_v43 }
 0x78e   :  { %v3381_v55 = vpop.trf.xlu1 }
 0x78f   :  { %3898 = vst.msk [vmem:[%s6357_s4 + $0x7a8] sm:$0xff] %vm2628_vm1, %v3381_v55 }
 0x792   :  { %v3179_v30 = vpop.trf.xlu2 }
 0x793   :  { %3836 = vst.msk [vmem:[%s6357_s4 + $0x5b8] sm:$0xff] %vm2628_vm1, %v3179_v30  ;;  %v3279_v52 = vpop.trf.xlu0 }
 0x794   :  { %3866 = vst.msk [vmem:[%s6357_s4 + $0x6a8] sm:$0xff] %vm2628_vm1, %v3279_v52 }
 0x796   :  { %v3382_v1 = vpop.trf.xlu1 }
 0x797   :  { %3899 = vst.msk [vmem:[%s6357_s4 + $0x7b0] sm:$0xff] %vm2628_vm1, %v3382_v1 }
 0x79a   :  { %v3180_v34 = vpop.trf.xlu2 }
 0x79b   :  { %3837 = vst.msk [vmem:[%s6357_s4 + $0x5c0] sm:$0xff] %vm2628_vm1, %v3180_v34  ;;  %v3280_v61 = vpop.trf.xlu0 }
 0x79c   :  { %3867 = vst.msk [vmem:[%s6357_s4 + $0x6b0] sm:$0xff] %vm2628_vm1, %v3280_v61 }
 0x79e   :  { %v3383_v15 = vpop.trf.xlu1 }
 0x79f   :  { %3900 = vst.msk [vmem:[%s6357_s4 + $0x7b8] sm:$0xff] %vm2628_vm1, %v3383_v15 }
 0x7a2   :  { %v3181_v9 = vpop.trf.xlu2 }
 0x7a3   :  { %3838 = vst.msk [vmem:[%s6357_s4 + $0x5c8] sm:$0xff] %vm2628_vm1, %v3181_v9  ;;  %v3281_v6 = vpop.trf.xlu0 }
 0x7a4   :  { %3868 = vst.msk [vmem:[%s6357_s4 + $0x6b8] sm:$0xff] %vm2628_vm1, %v3281_v6 }
 0x7a6   :  { %v3384_v21 = vpop.trf.xlu1 }
 0x7a7   :  { %3901 = vst.msk [vmem:[%s6357_s4 + $0x7c0] sm:$0xff] %vm2628_vm1, %v3384_v21 }
 0x7aa   :  { %v3182_v36 = vpop.trf.xlu2 }
 0x7ab   :  { %3839 = vst.msk [vmem:[%s6357_s4 + $0x5d0] sm:$0xff] %vm2628_vm1, %v3182_v36  ;;  %v3282_v16 = vpop.trf.xlu0 }
 0x7ac   :  { %3869 = vst.msk [vmem:[%s6357_s4 + $0x6c0] sm:$0xff] %vm2628_vm1, %v3282_v16 }
 0x7ae   :  { %v3385_v23 = vpop.trf.xlu1 }
 0x7af   :  { %3902 = vst.msk [vmem:[%s6357_s4 + $0x7c8] sm:$0xff] %vm2628_vm1, %v3385_v23 }
 0x7b2   :  { %v3183_v39 = vpop.trf.xlu2 }
 0x7b3   :  { %3840 = vst.msk [vmem:[%s6357_s4 + $0x5d8] sm:$0xff] %vm2628_vm1, %v3183_v39  ;;  %v3283_v7 = vpop.trf.xlu0 }
 0x7b4   :  { %3870 = vst.msk [vmem:[%s6357_s4 + $0x6c8] sm:$0xff] %vm2628_vm1, %v3283_v7 }
 0x7b6   :  { %v3386_v62 = vpop.trf.xlu1 }
 0x7b7   :  { %3903 = vst.msk [vmem:[%s6357_s4 + $0x7d0] sm:$0xff] %vm2628_vm1, %v3386_v62 }
 0x7ba   :  { %v3184_v28 = vpop.trf.xlu2 }
 0x7bb   :  { %3841 = vst.msk [vmem:[%s6357_s4 + $0x5e0] sm:$0xff] %vm2628_vm1, %v3184_v28  ;;  %v3284_v60 = vpop.trf.xlu0 }
 0x7bc   :  { %3871 = vst.msk [vmem:[%s6357_s4 + $0x6d0] sm:$0xff] %vm2628_vm1, %v3284_v60 }
 0x7be   :  { %v3387_v51 = vpop.trf.xlu1 }
 0x7bf   :  { %3904 = vst.msk [vmem:[%s6357_s4 + $0x7d8] sm:$0xff] %vm2628_vm1, %v3387_v51 }
 0x7c2   :  { %v3185_v31 = vpop.trf.xlu2 }
 0x7c3   :  { %3842 = vst.msk [vmem:[%s6357_s4 + $0x5e8] sm:$0xff] %vm2628_vm1, %v3185_v31  ;;  %v3285_v0 = vpop.trf.xlu0 }
 0x7c4   :  { %3872 = vst.msk [vmem:[%s6357_s4 + $0x6d8] sm:$0xff] %vm2628_vm1, %v3285_v0 }
 0x7c6   :  { %v3388_v3 = vpop.trf.xlu1 }
 0x7c7   :  { %3905 = vst.msk [vmem:[%s6357_s4 + $0x7e0] sm:$0xff] %vm2628_vm1, %v3388_v3 }
 0x7ca   :  { %v3186_v32 = vpop.trf.xlu2 }
 0x7cb   :  { %3843 = vst.msk [vmem:[%s6357_s4 + $0x5f0] sm:$0xff] %vm2628_vm1, %v3186_v32  ;;  %v3286_v4 = vpop.trf.xlu0 }
 0x7cc   :  { %3873 = vst.msk [vmem:[%s6357_s4 + $0x6e0] sm:$0xff] %vm2628_vm1, %v3286_v4 }
 0x7ce   :  { %v3389_v14 = vpop.trf.xlu1 }
 0x7cf   :  { %3906 = vst.msk [vmem:[%s6357_s4 + $0x7e8] sm:$0xff] %vm2628_vm1, %v3389_v14 }
 0x7d2   :  { %v3187_v47 = vpop.trf.xlu2 }
 0x7d3   :  { %3844 = vst.msk [vmem:[%s6357_s4 + $0x5f8] sm:$0xff] %vm2628_vm1, %v3187_v47  ;;  %v3287_v11 = vpop.trf.xlu0 }
 0x7d4   :  { %3874 = vst.msk [vmem:[%s6357_s4 + $0x6e8] sm:$0xff] %vm2628_vm1, %v3287_v11 }
 0x7d6   :  { %v3390_v29 = vpop.trf.xlu1 }
 0x7d7   :  { %3907 = vst.msk [vmem:[%s6357_s4 + $0x7f0] sm:$0xff] %vm2628_vm1, %v3390_v29 }
 0x7da   :  { %v3325_v42 = vpop.trf.xlu2 }
 0x7db   :  { %3877 = vst.msk [vmem:[%s6357_s4 + $0x700] sm:$0xff] %vm2628_vm1, %v3325_v42  ;;  %v3288_v20 = vpop.trf.xlu0 }
 0x7dc   :  { %3875 = vst.msk [vmem:[%s6357_s4 + $0x6f0] sm:$0xff] %vm2628_vm1, %v3288_v20 }
 0x7de   :  { %v3391_v46 = vpop.trf.xlu1 }
 0x7df   :  { %3908 = vst.msk [vmem:[%s6357_s4 + $0x7f8] sm:$0xff] %vm2628_vm1, %v3391_v46 }
 0x7e2   :  { %v3326_v48 = vpop.trf.xlu2 }
 0x7e3   :  { %3878 = vst.msk [vmem:[%s6357_s4 + $0x708] sm:$0xff] %vm2628_vm1, %v3326_v48  ;;  %v3289_v26 = vpop.trf.xlu0 }
 0x7e4   :  { %3876 = vst.msk [vmem:[%s6357_s4 + $0x6f8] sm:$0xff] %vm2628_vm1, %v3289_v26 }
 0x7ea   :  { %v3327_v58 = vpop.trf.xlu2 }
 0x7eb   :  { %3879 = vst.msk [vmem:[%s6357_s4 + $0x710] sm:$0xff] %vm2628_vm1, %v3327_v58 }
 0x7f2   :  { %v3328_v5 = vpop.trf.xlu2 }
 0x7f3   :  { %3880 = vst.msk [vmem:[%s6357_s4 + $0x718] sm:$0xff] %vm2628_vm1, %v3328_v5 }
 0x7fa   :  { %v3329_v18 = vpop.trf.xlu2 }
 0x7fb   :  { %3881 = vst.msk [vmem:[%s6357_s4 + $0x720] sm:$0xff] %vm2628_vm1, %v3329_v18 }
 0x802   :  { %v3330_v22 = vpop.trf.xlu2 }
 0x803   :  { %3882 = vst.msk [vmem:[%s6357_s4 + $0x728] sm:$0xff] %vm2628_vm1, %v3330_v22 }
 0x80a   :  { %v3331_v27 = vpop.trf.xlu2 }
 0x80b   :  { %3883 = vst.msk [vmem:[%s6357_s4 + $0x730] sm:$0xff] %vm2628_vm1, %v3331_v27 }
 0x812   :  { %v3332_v53 = vpop.trf.xlu2 }
 0x813   :  { %3884 = vst.msk [vmem:[%s6357_s4 + $0x738] sm:$0xff] %vm2628_vm1, %v3332_v53 }
 0x81a   :  { %v3333_v57 = vpop.trf.xlu2 }
 0x81b   :  { %3885 = vst.msk [vmem:[%s6357_s4 + $0x740] sm:$0xff] %vm2628_vm1, %v3333_v57 }
 0x822   :  { %v3334_v10 = vpop.trf.xlu2 }
 0x823   :  { %3886 = vst.msk [vmem:[%s6357_s4 + $0x748] sm:$0xff] %vm2628_vm1, %v3334_v10 }
 0x82a   :  { %v3335_v12 = vpop.trf.xlu2 }
 0x82b   :  { %3887 = vst.msk [vmem:[%s6357_s4 + $0x750] sm:$0xff] %vm2628_vm1, %v3335_v12 }
 0x832   :  { %v3336_v13 = vpop.trf.xlu2 }
 0x833   :  { %3888 = vst.msk [vmem:[%s6357_s4 + $0x758] sm:$0xff] %vm2628_vm1, %v3336_v13 }
 0x83a   :  { %v3337_v17 = vpop.trf.xlu2 }
 0x83b   :  { %3889 = vst.msk [vmem:[%s6357_s4 + $0x760] sm:$0xff] %vm2628_vm1, %v3337_v17 }
 0x842   :  { %v3338_v30 = vpop.trf.xlu2 }
 0x843   :  { %3890 = vst.msk [vmem:[%s6357_s4 + $0x768] sm:$0xff] %vm2628_vm1, %v3338_v30 }
 0x84a   :  { %v3339_v50 = vpop.trf.xlu2 }
 0x84b   :  { %3891 = vst.msk [vmem:[%s6357_s4 + $0x770] sm:$0xff] %vm2628_vm1, %v3339_v50 }
 0x852   :  { %v3340_v19 = vpop.trf.xlu2 }
 0x853   :  { %3892 = vst.msk [vmem:[%s6357_s4 + $0x778] sm:$0xff] %vm2628_vm1, %v3340_v19 }

</bundles_post_ra>
